<compile_context>
chip_gen: v6e
topology: v6e:2x2x1
jax: 0.10.0
libtpu: 0.0.40
codegen_flags: <defaults>
</compile_context>

<pallas_src>
import jax
import jax.numpy as jnp
from jax import lax
from jax.experimental import pallas as pl
from jax.experimental.pallas import tpu as pltpu

QDIM = 4
UDIM = 4            # u.unsqueeze(-1) is added to (B, qdim, 1) => udim == qdim
BATCH = 64
EPS = 1e-4
N_TRIL = QDIM * (QDIM + 1) // 2    # 10 Cholesky parameters

MM_HID = [16, 32, 64, 64]          # CholeskyMMNet hidden sizes
POT_HID = [16, 32, 32, 16]         # PotentialNet hidden sizes
F_HID = [32, 64, 64, 16]           # GeneralizedForceNet hidden sizes
DYN_HID = [64, 64, 32, 16]         # NnmodelableDynNet hidden sizes

_N_LAYERS = 5                                       # 4 hidden + linear output
_TRIL = [(i, j) for i in range(QDIM) for j in range(i)]   # strict-lower, row-major
_NT = (((1,), (1,)), ((), ()))                      # contract last dims: g @ W^T

_MM_DIMS = [QDIM] + MM_HID + [N_TRIL]
_POT_DIMS = [QDIM] + POT_HID + [1]
_F_DIMS = [2 * QDIM] + F_HID + [QDIM]
_DYN_DIMS = [3 * QDIM + UDIM + 1] + DYN_HID + [QDIM]


def _round8(n):
    return ((n + 7) // 8) * 8


def _offsets(row_sizes):
    offs, r = [], 0
    for n in row_sizes:
        offs.append(r)
        r += _round8(n)
    return offs, r


# 8-aligned row offsets of each layer's weight inside the per-net slab.
_MM_OFFS, _MM_ROWS = _offsets(_MM_DIMS[:-1])
_POT_OFFS, _POT_ROWS = _offsets(_POT_DIMS[:-1])
_F_OFFS, _F_ROWS = _offsets(_F_DIMS[:-1])
# dyn first-layer weight split into [q,v] (8 rows), qddot (4), [u,dt] (5) chunks
_DYN_ROWSIZES = [2 * QDIM, QDIM, UDIM + 1] + _DYN_DIMS[1:-1]
_DYN_OFFS, _DYN_ROWS = _offsets(_DYN_ROWSIZES)

_MM_W = max(_MM_DIMS[1:])     # 64
_POT_W = max(_POT_DIMS[1:])   # 32
_F_W = max(_F_DIMS[1:])       # 64
_DYN_W = max(_DYN_DIMS[1:])   # 64

_POT_W4T_ROW = 5              # row of pot bias slab holding (last weight)^T


# ----------------------------- packed-MLP view -----------------------------
class _Net:
    """Static view of one packed MLP (weight slab ref + bias slab ref)."""

    def __init__(self, w_ref, b_ref, dims, offs):
        self.w_ref, self.b_ref, self.dims, self.offs = w_ref, b_ref, dims, offs

    def W(self, i):
        o = self.offs[i]
        return self.w_ref[o:o + self.dims[i], 0:self.dims[i + 1]]

    def b(self, i):
        return self.b_ref[i:i + 1, 0:self.dims[i + 1]]


def _forward_hidden(x0, net, keep_deriv):
    """tanh hidden stack; returns (last hidden, list of tanh' = 1 - h^2)."""
    h, ds = x0, []
    for i in range(_N_LAYERS - 1):
        h = jnp.tanh(jnp.dot(h, net.W(i), preferred_element_type=jnp.float32)
                     + net.b(i))
        if keep_deriv:
            ds.append(1.0 - h * h)
    return h, ds


def _out_layer(h_last, net):
    i = _N_LAYERS - 1
    return jnp.dot(h_last, net.W(i), preferred_element_type=jnp.float32) + net.b(i)


def _jvp(t_in, ds, net):
    """Forward-mode tangent of the MLP output along input tangent t_in."""
    t = jnp.dot(t_in, net.W(0), preferred_element_type=jnp.float32) * ds[0]
    for i in range(1, _N_LAYERS):
        t = jnp.dot(t, net.W(i), preferred_element_type=jnp.float32)
        if i < _N_LAYERS - 1:
            t = t * ds[i]
    return t


def _vjp_from_hidden(g, ds, net):
    """Grad wrt MLP input given cotangent g on the last (post-tanh) hidden."""
    g = g * ds[-1]
    for i in range(_N_LAYERS - 2, 0, -1):
        g = lax.dot_general(g, net.W(i), _NT,
                            preferred_element_type=jnp.float32) * ds[i - 1]
    return lax.dot_general(g, net.W(0), _NT, preferred_element_type=jnp.float32)


def _vjp_from_out(g_out, ds, net):
    """Grad wrt MLP input given cotangent g_out on the linear output."""
    g = lax.dot_general(g_out, net.W(_N_LAYERS - 1), _NT,
                        preferred_element_type=jnp.float32)
    return _vjp_from_hidden(g, ds, net)


# --------------------------------- kernel ----------------------------------
def _kernel(x_ref, mmW_ref, mmB_ref, potW_ref, potB_ref, fW_ref, fB_ref,
            dynW_ref, dynB_ref, out_ref):
    x = x_ref[...]                               # (TB, 13) = [q | v | u | dt]
    q = x[:, :QDIM]
    v = x[:, QDIM:2 * QDIM]
    qv = x[:, :2 * QDIM]
    u = x[:, 2 * QDIM:2 * QDIM + UDIM]
    udt = x[:, 2 * QDIM:]

    mm = _Net(mmW_ref, mmB_ref, _MM_DIMS, _MM_OFFS)
    pot = _Net(potW_ref, potB_ref, _POT_DIMS, _POT_OFFS)
    fnet = _Net(fW_ref, fB_ref, _F_DIMS, _F_OFFS)
    dyn = _Net(dynW_ref, dynB_ref, _DYN_DIMS, [_DYN_OFFS[0]] + list(_DYN_OFFS[3:]))

    # ------------ Cholesky mass-matrix net: M = L L^T  (batch-major) ------------
    mm_h, mm_ds = _forward_hidden(q, mm, keep_deriv=True)
    mm_out = _out_layer(mm_h, mm)                # (TB, N_TRIL)
    t_v = _jvp(v, mm_ds, mm)                     # directional deriv of mm_out along v

    # ------------ potential gradient G = dV/dq: ONE reverse pass ------------
    _, pot_ds = _forward_hidden(q, pot, keep_deriv=True)
    pot_w4t = potB_ref[_POT_W4T_ROW:_POT_W4T_ROW + 1, 0:POT_HID[-1]]   # (1, 16)
    G = _vjp_from_hidden(pot_w4t, pot_ds, pot)   # (TB, QDIM)

    # ------------ generalized force F(q, v) ------------
    f_h, _ = _forward_hidden(qv, fnet, keep_deriv=False)
    F_out = _out_layer(f_h, fnet)                # (TB, QDIM)

    # ------------ feature-major section (rows = features, lanes = batch) --------
    oT = mm_out.T                                # (N_TRIL, TB)
    tT = t_v.T                                   # (N_TRIL, TB)
    vT = v.T                                     # (QDIM, TB)

    rawT = oT[:QDIM]                             # raw diagonal of L
    e = jnp.exp(-jnp.abs(rawT))                  # shared by softplus & sigmoid
    inv1pe = 1.0 / (1.0 + e)
    diagT = jnp.maximum(rawT, 0.0) + jnp.log(1.0 + e) + EPS   # softplus(raw)+eps
    dspT = jnp.where(rawT >= 0.0, inv1pe, e * inv1pe)         # sigmoid(raw)
    offT = oT[QDIM:]
    d_diagT = dspT * tT[:QDIM]
    d_offT = tT[QDIM:]

    def row(a, i):
        return a[i:i + 1, :]                     # one (1, TB) vreg row

    L = [[None] * QDIM for _ in range(QDIM)]
    dL = [[None] * QDIM for _ in range(QDIM)]
    for i in range(QDIM):
        L[i][i] = row(diagT, i)
        dL[i][i] = row(d_diagT, i)
    for a, (i, j) in enumerate(_TRIL):
        L[i][j] = row(offT, a)
        dL[i][j] = row(d_offT, a)
    vr = [row(vT, k) for k in range(QDIM)]

    # w = L^T v,  dw = (D_v L)^T v
    w, dw = [], []
    for m in range(QDIM):
        s, dsum = L[m][m] * vr[m], dL[m][m] * vr[m]
        for k in range(m + 1, QDIM):
            s = s + L[k][m] * vr[k]
            dsum = dsum + dL[k][m] * vr[k]
        w.append(s)
        dw.append(dsum)

    # term1 = (D_v M) v = (D_v L)(L^T v) + L ((D_v L)^T v)
    term1 = []
    for i in range(QDIM):
        s = dL[i][0] * w[0] + L[i][0] * dw[0]
        for m in range(1, i + 1):
            s = s + dL[i][m] * w[m] + L[i][m] * dw[m]
        term1.append(s)

    # d(v^T M v)/dq via ONE VJP:  v^T M v = ||L^T v||^2,  d/dL_{im} = 2 v_i w_m
    cot_rows = [2.0 * vr[i] * w[i] * row(dspT, i) for i in range(QDIM)]
    cot_rows += [2.0 * vr[i] * w[j] for (i, j) in _TRIL]
    cot = jnp.concatenate(cot_rows, axis=0).T    # (TB, N_TRIL)
    dvMv_dq = _vjp_from_out(cot, mm_ds, mm)      # (TB, QDIM)

    # ------------ solve M qddot = u + F - Cv - G,  Cv = term1 - 0.5 d(vMv)/dq ----
    rhsT = (u + F_out - G + 0.5 * dvMv_dq).T     # (QDIM, TB)
    rhs = [row(rhsT, i) - term1[i] for i in range(QDIM)]

    inv_d = [1.0 / L[i][i] for i in range(QDIM)]
    y = []
    for i in range(QDIM):                        # forward:  L y = rhs
        s = rhs[i]
        for j in range(i):
            s = s - L[i][j] * y[j]
        y.append(s * inv_d[i])
    xs = [None] * QDIM
    for i in reversed(range(QDIM)):              # backward: L^T x = y
        s = y[i]
        for j in range(i + 1, QDIM):
            s = s - L[j][i] * xs[j]
        xs[i] = s * inv_d[i]
    x_mat = jnp.concatenate(xs, axis=0).T        # (TB, QDIM) = qddot_solve

    # ------------ unmodelable dynamics on [q, v, qddot_solve, u, dt] ------------
    w0a = dynW_ref[_DYN_OFFS[0]:_DYN_OFFS[0] + 2 * QDIM, 0:DYN_HID[0]]   # [q,v]
    w0b = dynW_ref[_DYN_OFFS[1]:_DYN_OFFS[1] + QDIM, 0:DYN_HID[0]]       # qddot
    w0c = dynW_ref[_DYN_OFFS[2]:_DYN_OFFS[2] + UDIM + 1, 0:DYN_HID[0]]   # [u,dt]
    h = jnp.tanh(jnp.dot(qv, w0a, preferred_element_type=jnp.float32)
                 + jnp.dot(x_mat, w0b, preferred_element_type=jnp.float32)
                 + jnp.dot(udt, w0c, preferred_element_type=jnp.float32)
                 + dyn.b(0))
    for i in range(1, _N_LAYERS):
        z = jnp.dot(h, dyn.W(i), preferred_element_type=jnp.float32) + dyn.b(i)
        h = jnp.tanh(z) if i < _N_LAYERS - 1 else z
    qddot = x_mat + h

    # single merged store: [qddot | qddot_solve]  (one output pipeline per tile)
    out_ref[...] = jnp.concatenate([qddot, x_mat], axis=1)


# --------------------------- host-side param packing -----------------------
def _pack_mlp(layers, offs, rows, width, wlast_t_row=None):
    Wslab = jnp.zeros((rows, width), jnp.float32)
    Bslab = jnp.zeros((8, width), jnp.float32)
    for i, (W, b) in enumerate(layers):
        W = W.astype(jnp.float32)
        b = b.astype(jnp.float32)
        Wslab = Wslab.at[offs[i]:offs[i] + W.shape[0], 0:W.shape[1]].set(W)
        Bslab = Bslab.at[i, 0:b.shape[1]].set(b[0])
    if wlast_t_row is not None:
        wlast = layers[-1][0].astype(jnp.float32)          # (hid_last, 1)
        Bslab = Bslab.at[wlast_t_row, 0:wlast.shape[0]].set(wlast[:, 0])
    return Wslab, Bslab


def _pack_dyn(layers):
    Wslab = jnp.zeros((_DYN_ROWS, _DYN_W), jnp.float32)
    Bslab = jnp.zeros((8, _DYN_W), jnp.float32)
    W0, b0 = layers[0]
    W0 = W0.astype(jnp.float32)
    splits = [2 * QDIM, QDIM, UDIM + 1]
    r = 0
    for c, off in zip(splits, _DYN_OFFS[:3]):              # pre-split first layer
        Wslab = Wslab.at[off:off + c, 0:W0.shape[1]].set(W0[r:r + c])
        r += c
    Bslab = Bslab.at[0, 0:b0.shape[1]].set(b0.astype(jnp.float32)[0])
    for i in range(1, len(layers)):
        W, b = layers[i]
        off = _DYN_OFFS[2 + i]
        Wslab = Wslab.at[off:off + W.shape[0], 0:W.shape[1]].set(W.astype(jnp.float32))
        Bslab = Bslab.at[i, 0:b.shape[1]].set(b.astype(jnp.float32)[0])
    return Wslab, Bslab


# -------------------------------- wrapper -----------------------------------
def learned_rigid_body_forward(q, v, u, dt, params, *, num_tiles=1):
    """Returns (qddot, qddot_solve) as in LearnedRigidBody.forward.

    num_tiles=1 -> one full-batch tile (best on single-TC v5e / v6e);
    num_tiles=2 -> two "parallel" half-batch tiles (one per TensorCore on v7x).
    """
    B = q.shape[0]
    x = jnp.concatenate([q, v, u, dt], axis=1).astype(jnp.float32)   # (B, 13)

    mmW, mmB = _pack_mlp(params["mm"], _MM_OFFS, _MM_ROWS, _MM_W)
    potW, potB = _pack_mlp(params["pot"], _POT_OFFS, _POT_ROWS, _POT_W,
                           wlast_t_row=_POT_W4T_ROW)
    fW, fB = _pack_mlp(params["f"], _F_OFFS, _F_ROWS, _F_W)
    dynW, dynB = _pack_dyn(params["dyn"])
    weights = [mmW, mmB, potW, potB, fW, fB, dynW, dynB]

    nblk = int(num_tiles)
    if nblk < 1 or B % nblk != 0 or (nblk != 1 and (B // nblk) % 8 != 0):
        nblk = 1
    tb = B // nblk
    nfeat = x.shape[1]

    in_specs = ([pl.BlockSpec((tb, nfeat), lambda i: (i, 0))]
                + [pl.BlockSpec(p.shape, lambda i: (0, 0)) for p in weights])
    out_specs = pl.BlockSpec((tb, 2 * QDIM), lambda i: (i, 0))

    out = pl.pallas_call(
        _kernel,
        out_shape=jax.ShapeDtypeStruct((B, 2 * QDIM), jnp.float32),
        grid=(nblk,),
        in_specs=in_specs,
        out_specs=out_specs,
        compiler_params=pltpu.CompilerParams(
            dimension_semantics=("parallel",)),
    )(x, *weights)
    return out[:, :QDIM], out[:, QDIM:]


def init_params(key):
    def mlp(key, dims):
        layers = []
        for i in range(len(dims) - 1):
            key, k1, k2 = jax.random.split(key, 3)
            W = jax.random.normal(k1, (dims[i], dims[i + 1]),
                                  jnp.float32) / jnp.sqrt(float(dims[i]))
            b = 0.01 * jax.random.normal(k2, (1, dims[i + 1]), jnp.float32)
            layers.append((W, b))
        return key, layers

    params = {}
    key, params["mm"] = mlp(key, _MM_DIMS)
    key, params["pot"] = mlp(key, _POT_DIMS)
    key, params["f"] = mlp(key, _F_DIMS)
    key, params["dyn"] = mlp(key, _DYN_DIMS)
    return params


# --------------------- pure-JAX reference (for self-check) ------------------
def _ref_forward(q, v, u, dt, params):
    def mlp(xi, layers):
        h = xi
        for W, b in layers[:-1]:
            h = jnp.tanh(h @ W + b)
        W, b = layers[-1]
        return h @ W + b

    def mass_matrix(qi):
        o = mlp(qi[None, :], params["mm"])[0]
        L = jnp.zeros((QDIM, QDIM), jnp.float32)
        diag = jax.nn.softplus(o[:QDIM]) + EPS
        L = L.at[jnp.arange(QDIM), jnp.arange(QDIM)].set(diag)
        for a, (i, j) in enumerate(_TRIL):
            L = L.at[i, j].set(o[QDIM + a])
        return L @ L.T

    def potential(qi):
        return mlp(qi[None, :], params["pot"])[0, 0]

    def single(qi, vi, ui, dti):
        M = mass_matrix(qi)
        dMv = jax.jacfwd(lambda qq: mass_matrix(qq) @ vi)(qi)
        Cv = dMv @ vi - jax.grad(lambda qq: 0.5 * vi @ (mass_matrix(qq) @ vi))(qi)
        G = jax.grad(potential)(qi)
        F = mlp(jnp.concatenate([qi, vi])[None, :], params["f"])[0]
        qddot_solve = jnp.linalg.solve(M, ui + F - Cv - G)
        dyn_in = jnp.concatenate([qi, vi, qddot_solve, ui, dti])[None, :]
        qddot = mlp(dyn_in, params["dyn"])[0] + qddot_solve
        return qddot, qddot_solve

    return jax.vmap(single)(q, v, u, dt)


if __name__ == "__main__":
    params = init_params(jax.random.PRNGKey(0))
    kq, kv, ku = jax.random.split(jax.random.PRNGKey(0), 3)
    q = jax.random.normal(kq, (BATCH, QDIM), jnp.float32)
    v = jax.random.normal(kv, (BATCH, QDIM), jnp.float32)
    u = jax.random.normal(ku, (BATCH, UDIM), jnp.float32)
    dt = 0.01 * jnp.ones((BATCH, 1), jnp.float32)

    qddot, qddot_solve = jax.jit(learned_rigid_body_forward)(q, v, u, dt, params)
    jax.block_until_ready((qddot, qddot_solve))
    assert qddot.shape == (BATCH, QDIM) and qddot_solve.shape == (BATCH, QDIM)
    assert bool(jnp.isfinite(qddot).all()) and bool(jnp.isfinite(qddot_solve).all())

    # self-check against a pure-JAX autodiff reference (scale-aware tolerance)
    r_qddot, r_qs = jax.jit(_ref_forward)(q, v, u, dt, params)
    jax.block_until_ready((r_qddot, r_qs))

    def max_rel_err(a, b):
        return float(jnp.max(jnp.abs(a - b)) / (jnp.max(jnp.abs(b)) + 1e-6))

    err = max(max_rel_err(qddot, r_qddot), max_rel_err(qddot_solve, r_qs))
    assert err < 1e-2, f"kernel mismatch vs reference: rel_err={err}"
    print("KERNEL_OK")
</pallas_src>

<mosaic_0001>
module attributes {stable_mosaic.version = 11 : i64} {
  func.func @_kernel(%arg0: i32, %arg1: memref<64x13xf32, #tpu.memory_space<vmem>>, %arg2: memref<184x64xf32, #tpu.memory_space<vmem>>, %arg3: memref<8x64xf32, #tpu.memory_space<vmem>>, %arg4: memref<104x32xf32, #tpu.memory_space<vmem>>, %arg5: memref<8x32xf32, #tpu.memory_space<vmem>>, %arg6: memref<184x64xf32, #tpu.memory_space<vmem>>, %arg7: memref<8x64xf32, #tpu.memory_space<vmem>>, %arg8: memref<200x64xf32, #tpu.memory_space<vmem>>, %arg9: memref<8x64xf32, #tpu.memory_space<vmem>>, %arg10: memref<64x8xf32, #tpu.memory_space<vmem>>) attributes {dimension_semantics = [#tpu.dimension_semantics<parallel>], iteration_bounds = array<i64: 1>, scalar_prefetch = 0 : i64, scratch_operands = 0 : i64, tpu.core_type = #tpu.core_type<tc>, window_params = [{transform_indices = @transform_0, window_bounds = array<i64: 64, 13>}, {pipeline_mode = #tpu.pipeline_mode<synchronous>, transform_indices = @transform_1, window_bounds = array<i64: 184, 64>}, {pipeline_mode = #tpu.pipeline_mode<synchronous>, transform_indices = @transform_2, window_bounds = array<i64: 8, 64>}, {pipeline_mode = #tpu.pipeline_mode<synchronous>, transform_indices = @transform_3, window_bounds = array<i64: 104, 32>}, {pipeline_mode = #tpu.pipeline_mode<synchronous>, transform_indices = @transform_4, window_bounds = array<i64: 8, 32>}, {pipeline_mode = #tpu.pipeline_mode<synchronous>, transform_indices = @transform_5, window_bounds = array<i64: 184, 64>}, {pipeline_mode = #tpu.pipeline_mode<synchronous>, transform_indices = @transform_6, window_bounds = array<i64: 8, 64>}, {pipeline_mode = #tpu.pipeline_mode<synchronous>, transform_indices = @transform_7, window_bounds = array<i64: 200, 64>}, {pipeline_mode = #tpu.pipeline_mode<synchronous>, transform_indices = @transform_8, window_bounds = array<i64: 8, 64>}, {transform_indices = @transform_9, window_bounds = array<i64: 64, 8>}]} {
    %c0 = arith.constant 0 : index
    %c0_0 = arith.constant 0 : index
    %0 = vector.load %arg1[%c0, %c0_0] : memref<64x13xf32, #tpu.memory_space<vmem>>, vector<64x13xf32>
    %1 = vector.extract_strided_slice %0 {offsets = [0, 0], sizes = [64, 4], strides = [1, 1]} : vector<64x13xf32> to vector<64x4xf32>
    %2 = vector.extract_strided_slice %0 {offsets = [0, 4], sizes = [64, 4], strides = [1, 1]} : vector<64x13xf32> to vector<64x4xf32>
    %3 = vector.extract_strided_slice %0 {offsets = [0, 0], sizes = [64, 8], strides = [1, 1]} : vector<64x13xf32> to vector<64x8xf32>
    %4 = vector.extract_strided_slice %0 {offsets = [0, 8], sizes = [64, 4], strides = [1, 1]} : vector<64x13xf32> to vector<64x4xf32>
    %5 = vector.extract_strided_slice %0 {offsets = [0, 8], sizes = [64, 5], strides = [1, 1]} : vector<64x13xf32> to vector<64x5xf32>
    %c0_1 = arith.constant 0 : index
    %c0_2 = arith.constant 0 : index
    %6 = vector.load %arg2[%c0_1, %c0_2] : memref<184x64xf32, #tpu.memory_space<vmem>>, vector<4x16xf32>
    %cst = arith.constant dense<0.000000e+00> : vector<64x16xf32>
    %7 = tpu.matmul %1, %6, %cst {dimension_numbers = #tpu.dot_dimension_numbers<[1], [0], [0], [1], [0, 0, 1, 1], [], []>} : vector<64x4xf32>, vector<4x16xf32>, vector<64x16xf32> -> vector<64x16xf32>
    %c0_3 = arith.constant 0 : index
    %c0_4 = arith.constant 0 : index
    %8 = vector.load %arg3[%c0_3, %c0_4] : memref<8x64xf32, #tpu.memory_space<vmem>>, vector<1x16xf32>
    %9 = vector.broadcast %8 : vector<1x16xf32> to vector<64x16xf32>
    %10 = arith.addf %7, %9 : vector<64x16xf32>
    %11 = math.tanh %10 : vector<64x16xf32>
    %12 = arith.mulf %11, %11 : vector<64x16xf32>
    %cst_5 = arith.constant 1.000000e+00 : f32
    %13 = vector.broadcast %cst_5 : f32 to vector<64x16xf32>
    %14 = arith.subf %13, %12 : vector<64x16xf32>
    %c8 = arith.constant 8 : index
    %c0_6 = arith.constant 0 : index
    %15 = vector.load %arg2[%c8, %c0_6] : memref<184x64xf32, #tpu.memory_space<vmem>>, vector<16x32xf32>
    %cst_7 = arith.constant dense<0.000000e+00> : vector<64x32xf32>
    %16 = tpu.matmul %11, %15, %cst_7 {dimension_numbers = #tpu.dot_dimension_numbers<[1], [0], [0], [1], [0, 0, 1, 1], [], []>} : vector<64x16xf32>, vector<16x32xf32>, vector<64x32xf32> -> vector<64x32xf32>
    %c1 = arith.constant 1 : index
    %c0_8 = arith.constant 0 : index
    %17 = vector.load %arg3[%c1, %c0_8] : memref<8x64xf32, #tpu.memory_space<vmem>>, vector<1x32xf32>
    %18 = vector.broadcast %17 : vector<1x32xf32> to vector<64x32xf32>
    %19 = arith.addf %16, %18 : vector<64x32xf32>
    %20 = math.tanh %19 : vector<64x32xf32>
    %21 = arith.mulf %20, %20 : vector<64x32xf32>
    %cst_9 = arith.constant 1.000000e+00 : f32
    %22 = vector.broadcast %cst_9 : f32 to vector<64x32xf32>
    %23 = arith.subf %22, %21 : vector<64x32xf32>
    %c24 = arith.constant 24 : index
    %c0_10 = arith.constant 0 : index
    %24 = vector.load %arg2[%c24, %c0_10] : memref<184x64xf32, #tpu.memory_space<vmem>>, vector<32x64xf32>
    %cst_11 = arith.constant dense<0.000000e+00> : vector<64x64xf32>
    %25 = tpu.matmul %20, %24, %cst_11 {dimension_numbers = #tpu.dot_dimension_numbers<[1], [0], [0], [1], [0, 0, 1, 1], [], []>} : vector<64x32xf32>, vector<32x64xf32>, vector<64x64xf32> -> vector<64x64xf32>
    %c2 = arith.constant 2 : index
    %c0_12 = arith.constant 0 : index
    %26 = vector.load %arg3[%c2, %c0_12] : memref<8x64xf32, #tpu.memory_space<vmem>>, vector<1x64xf32>
    %27 = vector.broadcast %26 : vector<1x64xf32> to vector<64x64xf32>
    %28 = arith.addf %25, %27 : vector<64x64xf32>
    %29 = math.tanh %28 : vector<64x64xf32>
    %30 = arith.mulf %29, %29 : vector<64x64xf32>
    %cst_13 = arith.constant 1.000000e+00 : f32
    %31 = vector.broadcast %cst_13 : f32 to vector<64x64xf32>
    %32 = arith.subf %31, %30 : vector<64x64xf32>
    %c56 = arith.constant 56 : index
    %c0_14 = arith.constant 0 : index
    %33 = vector.load %arg2[%c56, %c0_14] : memref<184x64xf32, #tpu.memory_space<vmem>>, vector<64x64xf32>
    %cst_15 = arith.constant dense<0.000000e+00> : vector<64x64xf32>
    %34 = tpu.matmul %29, %33, %cst_15 {dimension_numbers = #tpu.dot_dimension_numbers<[1], [0], [0], [1], [0, 0, 1, 1], [], []>} : vector<64x64xf32>, vector<64x64xf32>, vector<64x64xf32> -> vector<64x64xf32>
    %c3 = arith.constant 3 : index
    %c0_16 = arith.constant 0 : index
    %35 = vector.load %arg3[%c3, %c0_16] : memref<8x64xf32, #tpu.memory_space<vmem>>, vector<1x64xf32>
    %36 = vector.broadcast %35 : vector<1x64xf32> to vector<64x64xf32>
    %37 = arith.addf %34, %36 : vector<64x64xf32>
    %38 = math.tanh %37 : vector<64x64xf32>
    %39 = arith.mulf %38, %38 : vector<64x64xf32>
    %cst_17 = arith.constant 1.000000e+00 : f32
    %40 = vector.broadcast %cst_17 : f32 to vector<64x64xf32>
    %41 = arith.subf %40, %39 : vector<64x64xf32>
    %c120 = arith.constant 120 : index
    %c0_18 = arith.constant 0 : index
    %42 = vector.load %arg2[%c120, %c0_18] : memref<184x64xf32, #tpu.memory_space<vmem>>, vector<64x10xf32>
    %cst_19 = arith.constant dense<0.000000e+00> : vector<64x10xf32>
    %43 = tpu.matmul %38, %42, %cst_19 {dimension_numbers = #tpu.dot_dimension_numbers<[1], [0], [0], [1], [0, 0, 1, 1], [], []>} : vector<64x64xf32>, vector<64x10xf32>, vector<64x10xf32> -> vector<64x10xf32>
    %c4 = arith.constant 4 : index
    %c0_20 = arith.constant 0 : index
    %44 = vector.load %arg3[%c4, %c0_20] : memref<8x64xf32, #tpu.memory_space<vmem>>, vector<1x10xf32>
    %45 = vector.broadcast %44 : vector<1x10xf32> to vector<64x10xf32>
    %46 = arith.addf %43, %45 : vector<64x10xf32>
    %c0_21 = arith.constant 0 : index
    %c0_22 = arith.constant 0 : index
    %47 = vector.load %arg2[%c0_21, %c0_22] : memref<184x64xf32, #tpu.memory_space<vmem>>, vector<4x16xf32>
    %cst_23 = arith.constant dense<0.000000e+00> : vector<64x16xf32>
    %48 = tpu.matmul %2, %47, %cst_23 {dimension_numbers = #tpu.dot_dimension_numbers<[1], [0], [0], [1], [0, 0, 1, 1], [], []>} : vector<64x4xf32>, vector<4x16xf32>, vector<64x16xf32> -> vector<64x16xf32>
    %49 = arith.mulf %48, %14 : vector<64x16xf32>
    %c8_24 = arith.constant 8 : index
    %c0_25 = arith.constant 0 : index
    %50 = vector.load %arg2[%c8_24, %c0_25] : memref<184x64xf32, #tpu.memory_space<vmem>>, vector<16x32xf32>
    %cst_26 = arith.constant dense<0.000000e+00> : vector<64x32xf32>
    %51 = tpu.matmul %49, %50, %cst_26 {dimension_numbers = #tpu.dot_dimension_numbers<[1], [0], [0], [1], [0, 0, 1, 1], [], []>} : vector<64x16xf32>, vector<16x32xf32>, vector<64x32xf32> -> vector<64x32xf32>
    %52 = arith.mulf %51, %23 : vector<64x32xf32>
    %c24_27 = arith.constant 24 : index
    %c0_28 = arith.constant 0 : index
    %53 = vector.load %arg2[%c24_27, %c0_28] : memref<184x64xf32, #tpu.memory_space<vmem>>, vector<32x64xf32>
    %cst_29 = arith.constant dense<0.000000e+00> : vector<64x64xf32>
    %54 = tpu.matmul %52, %53, %cst_29 {dimension_numbers = #tpu.dot_dimension_numbers<[1], [0], [0], [1], [0, 0, 1, 1], [], []>} : vector<64x32xf32>, vector<32x64xf32>, vector<64x64xf32> -> vector<64x64xf32>
    %55 = arith.mulf %54, %32 : vector<64x64xf32>
    %c56_30 = arith.constant 56 : index
    %c0_31 = arith.constant 0 : index
    %56 = vector.load %arg2[%c56_30, %c0_31] : memref<184x64xf32, #tpu.memory_space<vmem>>, vector<64x64xf32>
    %cst_32 = arith.constant dense<0.000000e+00> : vector<64x64xf32>
    %57 = tpu.matmul %55, %56, %cst_32 {dimension_numbers = #tpu.dot_dimension_numbers<[1], [0], [0], [1], [0, 0, 1, 1], [], []>} : vector<64x64xf32>, vector<64x64xf32>, vector<64x64xf32> -> vector<64x64xf32>
    %58 = arith.mulf %57, %41 : vector<64x64xf32>
    %c120_33 = arith.constant 120 : index
    %c0_34 = arith.constant 0 : index
    %59 = vector.load %arg2[%c120_33, %c0_34] : memref<184x64xf32, #tpu.memory_space<vmem>>, vector<64x10xf32>
    %cst_35 = arith.constant dense<0.000000e+00> : vector<64x10xf32>
    %60 = tpu.matmul %58, %59, %cst_35 {dimension_numbers = #tpu.dot_dimension_numbers<[1], [0], [0], [1], [0, 0, 1, 1], [], []>} : vector<64x64xf32>, vector<64x10xf32>, vector<64x10xf32> -> vector<64x10xf32>
    %c0_36 = arith.constant 0 : index
    %c0_37 = arith.constant 0 : index
    %61 = vector.load %arg4[%c0_36, %c0_37] : memref<104x32xf32, #tpu.memory_space<vmem>>, vector<4x16xf32>
    %cst_38 = arith.constant dense<0.000000e+00> : vector<64x16xf32>
    %62 = tpu.matmul %1, %61, %cst_38 {dimension_numbers = #tpu.dot_dimension_numbers<[1], [0], [0], [1], [0, 0, 1, 1], [], []>} : vector<64x4xf32>, vector<4x16xf32>, vector<64x16xf32> -> vector<64x16xf32>
    %c0_39 = arith.constant 0 : index
    %c0_40 = arith.constant 0 : index
    %63 = vector.load %arg5[%c0_39, %c0_40] : memref<8x32xf32, #tpu.memory_space<vmem>>, vector<1x16xf32>
    %64 = vector.broadcast %63 : vector<1x16xf32> to vector<64x16xf32>
    %65 = arith.addf %62, %64 : vector<64x16xf32>
    %66 = math.tanh %65 : vector<64x16xf32>
    %67 = arith.mulf %66, %66 : vector<64x16xf32>
    %cst_41 = arith.constant 1.000000e+00 : f32
    %68 = vector.broadcast %cst_41 : f32 to vector<64x16xf32>
    %69 = arith.subf %68, %67 : vector<64x16xf32>
    %c8_42 = arith.constant 8 : index
    %c0_43 = arith.constant 0 : index
    %70 = vector.load %arg4[%c8_42, %c0_43] : memref<104x32xf32, #tpu.memory_space<vmem>>, vector<16x32xf32>
    %cst_44 = arith.constant dense<0.000000e+00> : vector<64x32xf32>
    %71 = tpu.matmul %66, %70, %cst_44 {dimension_numbers = #tpu.dot_dimension_numbers<[1], [0], [0], [1], [0, 0, 1, 1], [], []>} : vector<64x16xf32>, vector<16x32xf32>, vector<64x32xf32> -> vector<64x32xf32>
    %c1_45 = arith.constant 1 : index
    %c0_46 = arith.constant 0 : index
    %72 = vector.load %arg5[%c1_45, %c0_46] : memref<8x32xf32, #tpu.memory_space<vmem>>, vector<1x32xf32>
    %73 = vector.broadcast %72 : vector<1x32xf32> to vector<64x32xf32>
    %74 = arith.addf %71, %73 : vector<64x32xf32>
    %75 = math.tanh %74 : vector<64x32xf32>
    %76 = arith.mulf %75, %75 : vector<64x32xf32>
    %cst_47 = arith.constant 1.000000e+00 : f32
    %77 = vector.broadcast %cst_47 : f32 to vector<64x32xf32>
    %78 = arith.subf %77, %76 : vector<64x32xf32>
    %c24_48 = arith.constant 24 : index
    %c0_49 = arith.constant 0 : index
    %79 = vector.load %arg4[%c24_48, %c0_49] : memref<104x32xf32, #tpu.memory_space<vmem>>, vector<32x32xf32>
    %cst_50 = arith.constant dense<0.000000e+00> : vector<64x32xf32>
    %80 = tpu.matmul %75, %79, %cst_50 {dimension_numbers = #tpu.dot_dimension_numbers<[1], [0], [0], [1], [0, 0, 1, 1], [], []>} : vector<64x32xf32>, vector<32x32xf32>, vector<64x32xf32> -> vector<64x32xf32>
    %c2_51 = arith.constant 2 : index
    %c0_52 = arith.constant 0 : index
    %81 = vector.load %arg5[%c2_51, %c0_52] : memref<8x32xf32, #tpu.memory_space<vmem>>, vector<1x32xf32>
    %82 = vector.broadcast %81 : vector<1x32xf32> to vector<64x32xf32>
    %83 = arith.addf %80, %82 : vector<64x32xf32>
    %84 = math.tanh %83 : vector<64x32xf32>
    %85 = arith.mulf %84, %84 : vector<64x32xf32>
    %cst_53 = arith.constant 1.000000e+00 : f32
    %86 = vector.broadcast %cst_53 : f32 to vector<64x32xf32>
    %87 = arith.subf %86, %85 : vector<64x32xf32>
    %c56_54 = arith.constant 56 : index
    %c0_55 = arith.constant 0 : index
    %88 = vector.load %arg4[%c56_54, %c0_55] : memref<104x32xf32, #tpu.memory_space<vmem>>, vector<32x16xf32>
    %cst_56 = arith.constant dense<0.000000e+00> : vector<64x16xf32>
    %89 = tpu.matmul %84, %88, %cst_56 {dimension_numbers = #tpu.dot_dimension_numbers<[1], [0], [0], [1], [0, 0, 1, 1], [], []>} : vector<64x32xf32>, vector<32x16xf32>, vector<64x16xf32> -> vector<64x16xf32>
    %c3_57 = arith.constant 3 : index
    %c0_58 = arith.constant 0 : index
    %90 = vector.load %arg5[%c3_57, %c0_58] : memref<8x32xf32, #tpu.memory_space<vmem>>, vector<1x16xf32>
    %91 = vector.broadcast %90 : vector<1x16xf32> to vector<64x16xf32>
    %92 = arith.addf %89, %91 : vector<64x16xf32>
    %93 = math.tanh %92 : vector<64x16xf32>
    %94 = arith.mulf %93, %93 : vector<64x16xf32>
    %cst_59 = arith.constant 1.000000e+00 : f32
    %95 = vector.broadcast %cst_59 : f32 to vector<64x16xf32>
    %96 = arith.subf %95, %94 : vector<64x16xf32>
    %c5 = arith.constant 5 : index
    %c0_60 = arith.constant 0 : index
    %97 = vector.load %arg5[%c5, %c0_60] : memref<8x32xf32, #tpu.memory_space<vmem>>, vector<1x16xf32>
    %98 = vector.broadcast %97 : vector<1x16xf32> to vector<64x16xf32>
    %99 = arith.mulf %98, %96 : vector<64x16xf32>
    %c56_61 = arith.constant 56 : index
    %c0_62 = arith.constant 0 : index
    %100 = vector.load %arg4[%c56_61, %c0_62] : memref<104x32xf32, #tpu.memory_space<vmem>>, vector<32x16xf32>
    %cst_63 = arith.constant dense<0.000000e+00> : vector<64x32xf32>
    %101 = tpu.matmul %99, %100, %cst_63 {dimension_numbers = #tpu.dot_dimension_numbers<[1], [1], [0], [0], [0, 0, 1, 0], [], []>} : vector<64x16xf32>, vector<32x16xf32>, vector<64x32xf32> -> vector<64x32xf32>
    %102 = arith.mulf %101, %87 : vector<64x32xf32>
    %c24_64 = arith.constant 24 : index
    %c0_65 = arith.constant 0 : index
    %103 = vector.load %arg4[%c24_64, %c0_65] : memref<104x32xf32, #tpu.memory_space<vmem>>, vector<32x32xf32>
    %cst_66 = arith.constant dense<0.000000e+00> : vector<64x32xf32>
    %104 = tpu.matmul %102, %103, %cst_66 {dimension_numbers = #tpu.dot_dimension_numbers<[1], [1], [0], [0], [0, 0, 1, 0], [], []>} : vector<64x32xf32>, vector<32x32xf32>, vector<64x32xf32> -> vector<64x32xf32>
    %105 = arith.mulf %104, %78 : vector<64x32xf32>
    %c8_67 = arith.constant 8 : index
    %c0_68 = arith.constant 0 : index
    %106 = vector.load %arg4[%c8_67, %c0_68] : memref<104x32xf32, #tpu.memory_space<vmem>>, vector<16x32xf32>
    %cst_69 = arith.constant dense<0.000000e+00> : vector<64x16xf32>
    %107 = tpu.matmul %105, %106, %cst_69 {dimension_numbers = #tpu.dot_dimension_numbers<[1], [1], [0], [0], [0, 0, 1, 0], [], []>} : vector<64x32xf32>, vector<16x32xf32>, vector<64x16xf32> -> vector<64x16xf32>
    %108 = arith.mulf %107, %69 : vector<64x16xf32>
    %c0_70 = arith.constant 0 : index
    %c0_71 = arith.constant 0 : index
    %109 = vector.load %arg4[%c0_70, %c0_71] : memref<104x32xf32, #tpu.memory_space<vmem>>, vector<4x16xf32>
    %cst_72 = arith.constant dense<0.000000e+00> : vector<64x4xf32>
    %110 = tpu.matmul %108, %109, %cst_72 {dimension_numbers = #tpu.dot_dimension_numbers<[1], [1], [0], [0], [0, 0, 1, 0], [], []>} : vector<64x16xf32>, vector<4x16xf32>, vector<64x4xf32> -> vector<64x4xf32>
    %c0_73 = arith.constant 0 : index
    %c0_74 = arith.constant 0 : index
    %111 = vector.load %arg6[%c0_73, %c0_74] : memref<184x64xf32, #tpu.memory_space<vmem>>, vector<8x32xf32>
    %cst_75 = arith.constant dense<0.000000e+00> : vector<64x32xf32>
    %112 = tpu.matmul %3, %111, %cst_75 {dimension_numbers = #tpu.dot_dimension_numbers<[1], [0], [0], [1], [0, 0, 1, 1], [], []>} : vector<64x8xf32>, vector<8x32xf32>, vector<64x32xf32> -> vector<64x32xf32>
    %c0_76 = arith.constant 0 : index
    %c0_77 = arith.constant 0 : index
    %113 = vector.load %arg7[%c0_76, %c0_77] : memref<8x64xf32, #tpu.memory_space<vmem>>, vector<1x32xf32>
    %114 = vector.broadcast %113 : vector<1x32xf32> to vector<64x32xf32>
    %115 = arith.addf %112, %114 : vector<64x32xf32>
    %116 = math.tanh %115 : vector<64x32xf32>
    %c8_78 = arith.constant 8 : index
    %c0_79 = arith.constant 0 : index
    %117 = vector.load %arg6[%c8_78, %c0_79] : memref<184x64xf32, #tpu.memory_space<vmem>>, vector<32x64xf32>
    %cst_80 = arith.constant dense<0.000000e+00> : vector<64x64xf32>
    %118 = tpu.matmul %116, %117, %cst_80 {dimension_numbers = #tpu.dot_dimension_numbers<[1], [0], [0], [1], [0, 0, 1, 1], [], []>} : vector<64x32xf32>, vector<32x64xf32>, vector<64x64xf32> -> vector<64x64xf32>
    %c1_81 = arith.constant 1 : index
    %c0_82 = arith.constant 0 : index
    %119 = vector.load %arg7[%c1_81, %c0_82] : memref<8x64xf32, #tpu.memory_space<vmem>>, vector<1x64xf32>
    %120 = vector.broadcast %119 : vector<1x64xf32> to vector<64x64xf32>
    %121 = arith.addf %118, %120 : vector<64x64xf32>
    %122 = math.tanh %121 : vector<64x64xf32>
    %c40 = arith.constant 40 : index
    %c0_83 = arith.constant 0 : index
    %123 = vector.load %arg6[%c40, %c0_83] : memref<184x64xf32, #tpu.memory_space<vmem>>, vector<64x64xf32>
    %cst_84 = arith.constant dense<0.000000e+00> : vector<64x64xf32>
    %124 = tpu.matmul %122, %123, %cst_84 {dimension_numbers = #tpu.dot_dimension_numbers<[1], [0], [0], [1], [0, 0, 1, 1], [], []>} : vector<64x64xf32>, vector<64x64xf32>, vector<64x64xf32> -> vector<64x64xf32>
    %c2_85 = arith.constant 2 : index
    %c0_86 = arith.constant 0 : index
    %125 = vector.load %arg7[%c2_85, %c0_86] : memref<8x64xf32, #tpu.memory_space<vmem>>, vector<1x64xf32>
    %126 = vector.broadcast %125 : vector<1x64xf32> to vector<64x64xf32>
    %127 = arith.addf %124, %126 : vector<64x64xf32>
    %128 = math.tanh %127 : vector<64x64xf32>
    %c104 = arith.constant 104 : index
    %c0_87 = arith.constant 0 : index
    %129 = vector.load %arg6[%c104, %c0_87] : memref<184x64xf32, #tpu.memory_space<vmem>>, vector<64x16xf32>
    %cst_88 = arith.constant dense<0.000000e+00> : vector<64x16xf32>
    %130 = tpu.matmul %128, %129, %cst_88 {dimension_numbers = #tpu.dot_dimension_numbers<[1], [0], [0], [1], [0, 0, 1, 1], [], []>} : vector<64x64xf32>, vector<64x16xf32>, vector<64x16xf32> -> vector<64x16xf32>
    %c3_89 = arith.constant 3 : index
    %c0_90 = arith.constant 0 : index
    %131 = vector.load %arg7[%c3_89, %c0_90] : memref<8x64xf32, #tpu.memory_space<vmem>>, vector<1x16xf32>
    %132 = vector.broadcast %131 : vector<1x16xf32> to vector<64x16xf32>
    %133 = arith.addf %130, %132 : vector<64x16xf32>
    %134 = math.tanh %133 : vector<64x16xf32>
    %c168 = arith.constant 168 : index
    %c0_91 = arith.constant 0 : index
    %135 = vector.load %arg6[%c168, %c0_91] : memref<184x64xf32, #tpu.memory_space<vmem>>, vector<16x4xf32>
    %cst_92 = arith.constant dense<0.000000e+00> : vector<64x4xf32>
    %136 = tpu.matmul %134, %135, %cst_92 {dimension_numbers = #tpu.dot_dimension_numbers<[1], [0], [0], [1], [0, 0, 1, 1], [], []>} : vector<64x16xf32>, vector<16x4xf32>, vector<64x4xf32> -> vector<64x4xf32>
    %c4_93 = arith.constant 4 : index
    %c0_94 = arith.constant 0 : index
    %137 = vector.load %arg7[%c4_93, %c0_94] : memref<8x64xf32, #tpu.memory_space<vmem>>, vector<1x4xf32>
    %138 = vector.broadcast %137 : vector<1x4xf32> to vector<64x4xf32>
    %139 = arith.addf %136, %138 : vector<64x4xf32>
    %140 = tpu.transpose %46, [1, 0] : vector<64x10xf32> -> vector<10x64xf32>
    %141 = tpu.transpose %60, [1, 0] : vector<64x10xf32> -> vector<10x64xf32>
    %142 = tpu.transpose %2, [1, 0] : vector<64x4xf32> -> vector<4x64xf32>
    %143 = vector.extract_strided_slice %140 {offsets = [0, 0], sizes = [4, 64], strides = [1, 1]} : vector<10x64xf32> to vector<4x64xf32>
    %144 = math.absf %143 : vector<4x64xf32>
    %cst_95 = arith.constant 0.000000e+00 : f32
    %145 = vector.broadcast %cst_95 : f32 to vector<4x64xf32>
    %146 = arith.subf %145, %144 : vector<4x64xf32>
    %147 = math.exp %146 : vector<4x64xf32>
    %cst_96 = arith.constant 1.000000e+00 : f32
    %148 = vector.broadcast %cst_96 : f32 to vector<4x64xf32>
    %149 = arith.addf %148, %147 : vector<4x64xf32>
    %cst_97 = arith.constant 1.000000e+00 : f32
    %150 = vector.broadcast %cst_97 : f32 to vector<4x64xf32>
    %151 = arith.divf %150, %149 : vector<4x64xf32>
    %cst_98 = arith.constant 0.000000e+00 : f32
    %152 = vector.broadcast %cst_98 : f32 to vector<4x64xf32>
    %153 = arith.maximumf %143, %152 : vector<4x64xf32>
    %cst_99 = arith.constant 1.000000e+00 : f32
    %154 = vector.broadcast %cst_99 : f32 to vector<4x64xf32>
    %155 = arith.addf %154, %147 : vector<4x64xf32>
    %156 = math.log %155 : vector<4x64xf32>
    %157 = arith.addf %153, %156 : vector<4x64xf32>
    %cst_100 = arith.constant 9.99999974E-5 : f32
    %158 = vector.broadcast %cst_100 : f32 to vector<4x64xf32>
    %159 = arith.addf %157, %158 : vector<4x64xf32>
    %cst_101 = arith.constant 0.000000e+00 : f32
    %160 = vector.broadcast %cst_101 : f32 to vector<4x64xf32>
    %161 = arith.cmpf oge, %143, %160 : vector<4x64xf32>
    %162 = arith.mulf %147, %151 : vector<4x64xf32>
    %163 = arith.select %161, %151, %162 : vector<4x64xi1>, vector<4x64xf32>
    %164 = vector.extract_strided_slice %140 {offsets = [4, 0], sizes = [6, 64], strides = [1, 1]} : vector<10x64xf32> to vector<6x64xf32>
    %165 = vector.extract_strided_slice %141 {offsets = [0, 0], sizes = [4, 64], strides = [1, 1]} : vector<10x64xf32> to vector<4x64xf32>
    %166 = arith.mulf %163, %165 : vector<4x64xf32>
    %167 = vector.extract_strided_slice %141 {offsets = [4, 0], sizes = [6, 64], strides = [1, 1]} : vector<10x64xf32> to vector<6x64xf32>
    %168 = vector.extract_strided_slice %159 {offsets = [0, 0], sizes = [1, 64], strides = [1, 1]} : vector<4x64xf32> to vector<1x64xf32>
    %169 = vector.extract_strided_slice %166 {offsets = [0, 0], sizes = [1, 64], strides = [1, 1]} : vector<4x64xf32> to vector<1x64xf32>
    %170 = vector.extract_strided_slice %159 {offsets = [1, 0], sizes = [1, 64], strides = [1, 1]} : vector<4x64xf32> to vector<1x64xf32>
    %171 = vector.extract_strided_slice %166 {offsets = [1, 0], sizes = [1, 64], strides = [1, 1]} : vector<4x64xf32> to vector<1x64xf32>
    %172 = vector.extract_strided_slice %159 {offsets = [2, 0], sizes = [1, 64], strides = [1, 1]} : vector<4x64xf32> to vector<1x64xf32>
    %173 = vector.extract_strided_slice %166 {offsets = [2, 0], sizes = [1, 64], strides = [1, 1]} : vector<4x64xf32> to vector<1x64xf32>
    %174 = vector.extract_strided_slice %159 {offsets = [3, 0], sizes = [1, 64], strides = [1, 1]} : vector<4x64xf32> to vector<1x64xf32>
    %175 = vector.extract_strided_slice %166 {offsets = [3, 0], sizes = [1, 64], strides = [1, 1]} : vector<4x64xf32> to vector<1x64xf32>
    %176 = vector.extract_strided_slice %164 {offsets = [0, 0], sizes = [1, 64], strides = [1, 1]} : vector<6x64xf32> to vector<1x64xf32>
    %177 = vector.extract_strided_slice %167 {offsets = [0, 0], sizes = [1, 64], strides = [1, 1]} : vector<6x64xf32> to vector<1x64xf32>
    %178 = vector.extract_strided_slice %164 {offsets = [1, 0], sizes = [1, 64], strides = [1, 1]} : vector<6x64xf32> to vector<1x64xf32>
    %179 = vector.extract_strided_slice %167 {offsets = [1, 0], sizes = [1, 64], strides = [1, 1]} : vector<6x64xf32> to vector<1x64xf32>
    %180 = vector.extract_strided_slice %164 {offsets = [2, 0], sizes = [1, 64], strides = [1, 1]} : vector<6x64xf32> to vector<1x64xf32>
    %181 = vector.extract_strided_slice %167 {offsets = [2, 0], sizes = [1, 64], strides = [1, 1]} : vector<6x64xf32> to vector<1x64xf32>
    %182 = vector.extract_strided_slice %164 {offsets = [3, 0], sizes = [1, 64], strides = [1, 1]} : vector<6x64xf32> to vector<1x64xf32>
    %183 = vector.extract_strided_slice %167 {offsets = [3, 0], sizes = [1, 64], strides = [1, 1]} : vector<6x64xf32> to vector<1x64xf32>
    %184 = vector.extract_strided_slice %164 {offsets = [4, 0], sizes = [1, 64], strides = [1, 1]} : vector<6x64xf32> to vector<1x64xf32>
    %185 = vector.extract_strided_slice %167 {offsets = [4, 0], sizes = [1, 64], strides = [1, 1]} : vector<6x64xf32> to vector<1x64xf32>
    %186 = vector.extract_strided_slice %164 {offsets = [5, 0], sizes = [1, 64], strides = [1, 1]} : vector<6x64xf32> to vector<1x64xf32>
    %187 = vector.extract_strided_slice %167 {offsets = [5, 0], sizes = [1, 64], strides = [1, 1]} : vector<6x64xf32> to vector<1x64xf32>
    %188 = vector.extract_strided_slice %142 {offsets = [0, 0], sizes = [1, 64], strides = [1, 1]} : vector<4x64xf32> to vector<1x64xf32>
    %189 = vector.extract_strided_slice %142 {offsets = [1, 0], sizes = [1, 64], strides = [1, 1]} : vector<4x64xf32> to vector<1x64xf32>
    %190 = vector.extract_strided_slice %142 {offsets = [2, 0], sizes = [1, 64], strides = [1, 1]} : vector<4x64xf32> to vector<1x64xf32>
    %191 = vector.extract_strided_slice %142 {offsets = [3, 0], sizes = [1, 64], strides = [1, 1]} : vector<4x64xf32> to vector<1x64xf32>
    %192 = arith.mulf %168, %188 : vector<1x64xf32>
    %193 = arith.mulf %169, %188 : vector<1x64xf32>
    %194 = arith.mulf %176, %189 : vector<1x64xf32>
    %195 = arith.addf %192, %194 : vector<1x64xf32>
    %196 = arith.mulf %177, %189 : vector<1x64xf32>
    %197 = arith.addf %193, %196 : vector<1x64xf32>
    %198 = arith.mulf %178, %190 : vector<1x64xf32>
    %199 = arith.addf %195, %198 : vector<1x64xf32>
    %200 = arith.mulf %179, %190 : vector<1x64xf32>
    %201 = arith.addf %197, %200 : vector<1x64xf32>
    %202 = arith.mulf %182, %191 : vector<1x64xf32>
    %203 = arith.addf %199, %202 : vector<1x64xf32>
    %204 = arith.mulf %183, %191 : vector<1x64xf32>
    %205 = arith.addf %201, %204 : vector<1x64xf32>
    %206 = arith.mulf %170, %189 : vector<1x64xf32>
    %207 = arith.mulf %171, %189 : vector<1x64xf32>
    %208 = arith.mulf %180, %190 : vector<1x64xf32>
    %209 = arith.addf %206, %208 : vector<1x64xf32>
    %210 = arith.mulf %181, %190 : vector<1x64xf32>
    %211 = arith.addf %207, %210 : vector<1x64xf32>
    %212 = arith.mulf %184, %191 : vector<1x64xf32>
    %213 = arith.addf %209, %212 : vector<1x64xf32>
    %214 = arith.mulf %185, %191 : vector<1x64xf32>
    %215 = arith.addf %211, %214 : vector<1x64xf32>
    %216 = arith.mulf %172, %190 : vector<1x64xf32>
    %217 = arith.mulf %173, %190 : vector<1x64xf32>
    %218 = arith.mulf %186, %191 : vector<1x64xf32>
    %219 = arith.addf %216, %218 : vector<1x64xf32>
    %220 = arith.mulf %187, %191 : vector<1x64xf32>
    %221 = arith.addf %217, %220 : vector<1x64xf32>
    %222 = arith.mulf %174, %191 : vector<1x64xf32>
    %223 = arith.mulf %175, %191 : vector<1x64xf32>
    %224 = arith.mulf %169, %203 : vector<1x64xf32>
    %225 = arith.mulf %168, %205 : vector<1x64xf32>
    %226 = arith.addf %224, %225 : vector<1x64xf32>
    %227 = arith.mulf %177, %203 : vector<1x64xf32>
    %228 = arith.mulf %176, %205 : vector<1x64xf32>
    %229 = arith.addf %227, %228 : vector<1x64xf32>
    %230 = arith.mulf %171, %213 : vector<1x64xf32>
    %231 = arith.addf %229, %230 : vector<1x64xf32>
    %232 = arith.mulf %170, %215 : vector<1x64xf32>
    %233 = arith.addf %231, %232 : vector<1x64xf32>
    %234 = arith.mulf %179, %203 : vector<1x64xf32>
    %235 = arith.mulf %178, %205 : vector<1x64xf32>
    %236 = arith.addf %234, %235 : vector<1x64xf32>
    %237 = arith.mulf %181, %213 : vector<1x64xf32>
    %238 = arith.addf %236, %237 : vector<1x64xf32>
    %239 = arith.mulf %180, %215 : vector<1x64xf32>
    %240 = arith.addf %238, %239 : vector<1x64xf32>
    %241 = arith.mulf %173, %219 : vector<1x64xf32>
    %242 = arith.addf %240, %241 : vector<1x64xf32>
    %243 = arith.mulf %172, %221 : vector<1x64xf32>
    %244 = arith.addf %242, %243 : vector<1x64xf32>
    %245 = arith.mulf %183, %203 : vector<1x64xf32>
    %246 = arith.mulf %182, %205 : vector<1x64xf32>
    %247 = arith.addf %245, %246 : vector<1x64xf32>
    %248 = arith.mulf %185, %213 : vector<1x64xf32>
    %249 = arith.addf %247, %248 : vector<1x64xf32>
    %250 = arith.mulf %184, %215 : vector<1x64xf32>
    %251 = arith.addf %249, %250 : vector<1x64xf32>
    %252 = arith.mulf %187, %219 : vector<1x64xf32>
    %253 = arith.addf %251, %252 : vector<1x64xf32>
    %254 = arith.mulf %186, %221 : vector<1x64xf32>
    %255 = arith.addf %253, %254 : vector<1x64xf32>
    %256 = arith.mulf %175, %222 : vector<1x64xf32>
    %257 = arith.addf %255, %256 : vector<1x64xf32>
    %258 = arith.mulf %174, %223 : vector<1x64xf32>
    %259 = arith.addf %257, %258 : vector<1x64xf32>
    %cst_102 = arith.constant 2.000000e+00 : f32
    %260 = vector.broadcast %cst_102 : f32 to vector<1x64xf32>
    %261 = arith.mulf %260, %188 : vector<1x64xf32>
    %262 = arith.mulf %261, %203 : vector<1x64xf32>
    %263 = vector.extract_strided_slice %163 {offsets = [0, 0], sizes = [1, 64], strides = [1, 1]} : vector<4x64xf32> to vector<1x64xf32>
    %264 = arith.mulf %262, %263 : vector<1x64xf32>
    %cst_103 = arith.constant 2.000000e+00 : f32
    %265 = vector.broadcast %cst_103 : f32 to vector<1x64xf32>
    %266 = arith.mulf %265, %189 : vector<1x64xf32>
    %267 = arith.mulf %266, %213 : vector<1x64xf32>
    %268 = vector.extract_strided_slice %163 {offsets = [1, 0], sizes = [1, 64], strides = [1, 1]} : vector<4x64xf32> to vector<1x64xf32>
    %269 = arith.mulf %267, %268 : vector<1x64xf32>
    %cst_104 = arith.constant 2.000000e+00 : f32
    %270 = vector.broadcast %cst_104 : f32 to vector<1x64xf32>
    %271 = arith.mulf %270, %190 : vector<1x64xf32>
    %272 = arith.mulf %271, %219 : vector<1x64xf32>
    %273 = vector.extract_strided_slice %163 {offsets = [2, 0], sizes = [1, 64], strides = [1, 1]} : vector<4x64xf32> to vector<1x64xf32>
    %274 = arith.mulf %272, %273 : vector<1x64xf32>
    %cst_105 = arith.constant 2.000000e+00 : f32
    %275 = vector.broadcast %cst_105 : f32 to vector<1x64xf32>
    %276 = arith.mulf %275, %191 : vector<1x64xf32>
    %277 = arith.mulf %276, %222 : vector<1x64xf32>
    %278 = vector.extract_strided_slice %163 {offsets = [3, 0], sizes = [1, 64], strides = [1, 1]} : vector<4x64xf32> to vector<1x64xf32>
    %279 = arith.mulf %277, %278 : vector<1x64xf32>
    %cst_106 = arith.constant 2.000000e+00 : f32
    %280 = vector.broadcast %cst_106 : f32 to vector<1x64xf32>
    %281 = arith.mulf %280, %189 : vector<1x64xf32>
    %282 = arith.mulf %281, %203 : vector<1x64xf32>
    %cst_107 = arith.constant 2.000000e+00 : f32
    %283 = vector.broadcast %cst_107 : f32 to vector<1x64xf32>
    %284 = arith.mulf %283, %190 : vector<1x64xf32>
    %285 = arith.mulf %284, %203 : vector<1x64xf32>
    %cst_108 = arith.constant 2.000000e+00 : f32
    %286 = vector.broadcast %cst_108 : f32 to vector<1x64xf32>
    %287 = arith.mulf %286, %190 : vector<1x64xf32>
    %288 = arith.mulf %287, %213 : vector<1x64xf32>
    %cst_109 = arith.constant 2.000000e+00 : f32
    %289 = vector.broadcast %cst_109 : f32 to vector<1x64xf32>
    %290 = arith.mulf %289, %191 : vector<1x64xf32>
    %291 = arith.mulf %290, %203 : vector<1x64xf32>
    %cst_110 = arith.constant 2.000000e+00 : f32
    %292 = vector.broadcast %cst_110 : f32 to vector<1x64xf32>
    %293 = arith.mulf %292, %191 : vector<1x64xf32>
    %294 = arith.mulf %293, %213 : vector<1x64xf32>
    %cst_111 = arith.constant 2.000000e+00 : f32
    %295 = vector.broadcast %cst_111 : f32 to vector<1x64xf32>
    %296 = arith.mulf %295, %191 : vector<1x64xf32>
    %297 = arith.mulf %296, %219 : vector<1x64xf32>
    %298 = tpu.concatenate %264, %269, %274, %279, %282, %285, %288, %291, %294, %297 in 0 : vector<1x64xf32>, vector<1x64xf32>, vector<1x64xf32>, vector<1x64xf32>, vector<1x64xf32>, vector<1x64xf32>, vector<1x64xf32>, vector<1x64xf32>, vector<1x64xf32>, vector<1x64xf32> -> vector<10x64xf32>
    %299 = tpu.transpose %298, [1, 0] : vector<10x64xf32> -> vector<64x10xf32>
    %c120_112 = arith.constant 120 : index
    %c0_113 = arith.constant 0 : index
    %300 = vector.load %arg2[%c120_112, %c0_113] : memref<184x64xf32, #tpu.memory_space<vmem>>, vector<64x10xf32>
    %cst_114 = arith.constant dense<0.000000e+00> : vector<64x64xf32>
    %301 = tpu.matmul %299, %300, %cst_114 {dimension_numbers = #tpu.dot_dimension_numbers<[1], [1], [0], [0], [0, 0, 1, 0], [], []>} : vector<64x10xf32>, vector<64x10xf32>, vector<64x64xf32> -> vector<64x64xf32>
    %302 = arith.mulf %301, %41 : vector<64x64xf32>
    %c56_115 = arith.constant 56 : index
    %c0_116 = arith.constant 0 : index
    %303 = vector.load %arg2[%c56_115, %c0_116] : memref<184x64xf32, #tpu.memory_space<vmem>>, vector<64x64xf32>
    %cst_117 = arith.constant dense<0.000000e+00> : vector<64x64xf32>
    %304 = tpu.matmul %302, %303, %cst_117 {dimension_numbers = #tpu.dot_dimension_numbers<[1], [1], [0], [0], [0, 0, 1, 0], [], []>} : vector<64x64xf32>, vector<64x64xf32>, vector<64x64xf32> -> vector<64x64xf32>
    %305 = arith.mulf %304, %32 : vector<64x64xf32>
    %c24_118 = arith.constant 24 : index
    %c0_119 = arith.constant 0 : index
    %306 = vector.load %arg2[%c24_118, %c0_119] : memref<184x64xf32, #tpu.memory_space<vmem>>, vector<32x64xf32>
    %cst_120 = arith.constant dense<0.000000e+00> : vector<64x32xf32>
    %307 = tpu.matmul %305, %306, %cst_120 {dimension_numbers = #tpu.dot_dimension_numbers<[1], [1], [0], [0], [0, 0, 1, 0], [], []>} : vector<64x64xf32>, vector<32x64xf32>, vector<64x32xf32> -> vector<64x32xf32>
    %308 = arith.mulf %307, %23 : vector<64x32xf32>
    %c8_121 = arith.constant 8 : index
    %c0_122 = arith.constant 0 : index
    %309 = vector.load %arg2[%c8_121, %c0_122] : memref<184x64xf32, #tpu.memory_space<vmem>>, vector<16x32xf32>
    %cst_123 = arith.constant dense<0.000000e+00> : vector<64x16xf32>
    %310 = tpu.matmul %308, %309, %cst_123 {dimension_numbers = #tpu.dot_dimension_numbers<[1], [1], [0], [0], [0, 0, 1, 0], [], []>} : vector<64x32xf32>, vector<16x32xf32>, vector<64x16xf32> -> vector<64x16xf32>
    %311 = arith.mulf %310, %14 : vector<64x16xf32>
    %c0_124 = arith.constant 0 : index
    %c0_125 = arith.constant 0 : index
    %312 = vector.load %arg2[%c0_124, %c0_125] : memref<184x64xf32, #tpu.memory_space<vmem>>, vector<4x16xf32>
    %cst_126 = arith.constant dense<0.000000e+00> : vector<64x4xf32>
    %313 = tpu.matmul %311, %312, %cst_126 {dimension_numbers = #tpu.dot_dimension_numbers<[1], [1], [0], [0], [0, 0, 1, 0], [], []>} : vector<64x16xf32>, vector<4x16xf32>, vector<64x4xf32> -> vector<64x4xf32>
    %314 = arith.addf %4, %139 : vector<64x4xf32>
    %315 = arith.subf %314, %110 : vector<64x4xf32>
    %cst_127 = arith.constant 5.000000e-01 : f32
    %316 = vector.broadcast %cst_127 : f32 to vector<64x4xf32>
    %317 = arith.mulf %316, %313 : vector<64x4xf32>
    %318 = arith.addf %315, %317 : vector<64x4xf32>
    %319 = tpu.transpose %318, [1, 0] : vector<64x4xf32> -> vector<4x64xf32>
    %320 = vector.extract_strided_slice %319 {offsets = [0, 0], sizes = [1, 64], strides = [1, 1]} : vector<4x64xf32> to vector<1x64xf32>
    %321 = arith.subf %320, %226 : vector<1x64xf32>
    %322 = vector.extract_strided_slice %319 {offsets = [1, 0], sizes = [1, 64], strides = [1, 1]} : vector<4x64xf32> to vector<1x64xf32>
    %323 = arith.subf %322, %233 : vector<1x64xf32>
    %324 = vector.extract_strided_slice %319 {offsets = [2, 0], sizes = [1, 64], strides = [1, 1]} : vector<4x64xf32> to vector<1x64xf32>
    %325 = arith.subf %324, %244 : vector<1x64xf32>
    %326 = vector.extract_strided_slice %319 {offsets = [3, 0], sizes = [1, 64], strides = [1, 1]} : vector<4x64xf32> to vector<1x64xf32>
    %327 = arith.subf %326, %259 : vector<1x64xf32>
    %cst_128 = arith.constant 1.000000e+00 : f32
    %328 = vector.broadcast %cst_128 : f32 to vector<1x64xf32>
    %329 = arith.divf %328, %168 : vector<1x64xf32>
    %cst_129 = arith.constant 1.000000e+00 : f32
    %330 = vector.broadcast %cst_129 : f32 to vector<1x64xf32>
    %331 = arith.divf %330, %170 : vector<1x64xf32>
    %cst_130 = arith.constant 1.000000e+00 : f32
    %332 = vector.broadcast %cst_130 : f32 to vector<1x64xf32>
    %333 = arith.divf %332, %172 : vector<1x64xf32>
    %cst_131 = arith.constant 1.000000e+00 : f32
    %334 = vector.broadcast %cst_131 : f32 to vector<1x64xf32>
    %335 = arith.divf %334, %174 : vector<1x64xf32>
    %336 = arith.mulf %321, %329 : vector<1x64xf32>
    %337 = arith.mulf %176, %336 : vector<1x64xf32>
    %338 = arith.subf %323, %337 : vector<1x64xf32>
    %339 = arith.mulf %338, %331 : vector<1x64xf32>
    %340 = arith.mulf %178, %336 : vector<1x64xf32>
    %341 = arith.subf %325, %340 : vector<1x64xf32>
    %342 = arith.mulf %180, %339 : vector<1x64xf32>
    %343 = arith.subf %341, %342 : vector<1x64xf32>
    %344 = arith.mulf %343, %333 : vector<1x64xf32>
    %345 = arith.mulf %182, %336 : vector<1x64xf32>
    %346 = arith.subf %327, %345 : vector<1x64xf32>
    %347 = arith.mulf %184, %339 : vector<1x64xf32>
    %348 = arith.subf %346, %347 : vector<1x64xf32>
    %349 = arith.mulf %186, %344 : vector<1x64xf32>
    %350 = arith.subf %348, %349 : vector<1x64xf32>
    %351 = arith.mulf %350, %335 : vector<1x64xf32>
    %352 = arith.mulf %351, %335 : vector<1x64xf32>
    %353 = arith.mulf %186, %352 : vector<1x64xf32>
    %354 = arith.subf %344, %353 : vector<1x64xf32>
    %355 = arith.mulf %354, %333 : vector<1x64xf32>
    %356 = arith.mulf %180, %355 : vector<1x64xf32>
    %357 = arith.subf %339, %356 : vector<1x64xf32>
    %358 = arith.mulf %184, %352 : vector<1x64xf32>
    %359 = arith.subf %357, %358 : vector<1x64xf32>
    %360 = arith.mulf %359, %331 : vector<1x64xf32>
    %361 = arith.mulf %176, %360 : vector<1x64xf32>
    %362 = arith.subf %336, %361 : vector<1x64xf32>
    %363 = arith.mulf %178, %355 : vector<1x64xf32>
    %364 = arith.subf %362, %363 : vector<1x64xf32>
    %365 = arith.mulf %182, %352 : vector<1x64xf32>
    %366 = arith.subf %364, %365 : vector<1x64xf32>
    %367 = arith.mulf %366, %329 : vector<1x64xf32>
    %368 = tpu.concatenate %367, %360, %355, %352 in 0 : vector<1x64xf32>, vector<1x64xf32>, vector<1x64xf32>, vector<1x64xf32> -> vector<4x64xf32>
    %369 = tpu.transpose %368, [1, 0] : vector<4x64xf32> -> vector<64x4xf32>
    %c0_132 = arith.constant 0 : index
    %c0_133 = arith.constant 0 : index
    %370 = vector.load %arg8[%c0_132, %c0_133] : memref<200x64xf32, #tpu.memory_space<vmem>>, vector<8x64xf32>
    %c8_134 = arith.constant 8 : index
    %c0_135 = arith.constant 0 : index
    %371 = vector.load %arg8[%c8_134, %c0_135] : memref<200x64xf32, #tpu.memory_space<vmem>>, vector<4x64xf32>
    %c16 = arith.constant 16 : index
    %c0_136 = arith.constant 0 : index
    %372 = vector.load %arg8[%c16, %c0_136] : memref<200x64xf32, #tpu.memory_space<vmem>>, vector<5x64xf32>
    %cst_137 = arith.constant dense<0.000000e+00> : vector<64x64xf32>
    %373 = tpu.matmul %3, %370, %cst_137 {dimension_numbers = #tpu.dot_dimension_numbers<[1], [0], [0], [1], [0, 0, 1, 1], [], []>} : vector<64x8xf32>, vector<8x64xf32>, vector<64x64xf32> -> vector<64x64xf32>
    %cst_138 = arith.constant dense<0.000000e+00> : vector<64x64xf32>
    %374 = tpu.matmul %369, %371, %cst_138 {dimension_numbers = #tpu.dot_dimension_numbers<[1], [0], [0], [1], [0, 0, 1, 1], [], []>} : vector<64x4xf32>, vector<4x64xf32>, vector<64x64xf32> -> vector<64x64xf32>
    %375 = arith.addf %373, %374 : vector<64x64xf32>
    %cst_139 = arith.constant dense<0.000000e+00> : vector<64x64xf32>
    %376 = tpu.matmul %5, %372, %cst_139 {dimension_numbers = #tpu.dot_dimension_numbers<[1], [0], [0], [1], [0, 0, 1, 1], [], []>} : vector<64x5xf32>, vector<5x64xf32>, vector<64x64xf32> -> vector<64x64xf32>
    %377 = arith.addf %375, %376 : vector<64x64xf32>
    %c0_140 = arith.constant 0 : index
    %c0_141 = arith.constant 0 : index
    %378 = vector.load %arg9[%c0_140, %c0_141] : memref<8x64xf32, #tpu.memory_space<vmem>>, vector<1x64xf32>
    %379 = vector.broadcast %378 : vector<1x64xf32> to vector<64x64xf32>
    %380 = arith.addf %377, %379 : vector<64x64xf32>
    %381 = math.tanh %380 : vector<64x64xf32>
    %c24_142 = arith.constant 24 : index
    %c0_143 = arith.constant 0 : index
    %382 = vector.load %arg8[%c24_142, %c0_143] : memref<200x64xf32, #tpu.memory_space<vmem>>, vector<64x64xf32>
    %cst_144 = arith.constant dense<0.000000e+00> : vector<64x64xf32>
    %383 = tpu.matmul %381, %382, %cst_144 {dimension_numbers = #tpu.dot_dimension_numbers<[1], [0], [0], [1], [0, 0, 1, 1], [], []>} : vector<64x64xf32>, vector<64x64xf32>, vector<64x64xf32> -> vector<64x64xf32>
    %c1_145 = arith.constant 1 : index
    %c0_146 = arith.constant 0 : index
    %384 = vector.load %arg9[%c1_145, %c0_146] : memref<8x64xf32, #tpu.memory_space<vmem>>, vector<1x64xf32>
    %385 = vector.broadcast %384 : vector<1x64xf32> to vector<64x64xf32>
    %386 = arith.addf %383, %385 : vector<64x64xf32>
    %387 = math.tanh %386 : vector<64x64xf32>
    %c88 = arith.constant 88 : index
    %c0_147 = arith.constant 0 : index
    %388 = vector.load %arg8[%c88, %c0_147] : memref<200x64xf32, #tpu.memory_space<vmem>>, vector<64x32xf32>
    %cst_148 = arith.constant dense<0.000000e+00> : vector<64x32xf32>
    %389 = tpu.matmul %387, %388, %cst_148 {dimension_numbers = #tpu.dot_dimension_numbers<[1], [0], [0], [1], [0, 0, 1, 1], [], []>} : vector<64x64xf32>, vector<64x32xf32>, vector<64x32xf32> -> vector<64x32xf32>
    %c2_149 = arith.constant 2 : index
    %c0_150 = arith.constant 0 : index
    %390 = vector.load %arg9[%c2_149, %c0_150] : memref<8x64xf32, #tpu.memory_space<vmem>>, vector<1x32xf32>
    %391 = vector.broadcast %390 : vector<1x32xf32> to vector<64x32xf32>
    %392 = arith.addf %389, %391 : vector<64x32xf32>
    %393 = math.tanh %392 : vector<64x32xf32>
    %c152 = arith.constant 152 : index
    %c0_151 = arith.constant 0 : index
    %394 = vector.load %arg8[%c152, %c0_151] : memref<200x64xf32, #tpu.memory_space<vmem>>, vector<32x16xf32>
    %cst_152 = arith.constant dense<0.000000e+00> : vector<64x16xf32>
    %395 = tpu.matmul %393, %394, %cst_152 {dimension_numbers = #tpu.dot_dimension_numbers<[1], [0], [0], [1], [0, 0, 1, 1], [], []>} : vector<64x32xf32>, vector<32x16xf32>, vector<64x16xf32> -> vector<64x16xf32>
    %c3_153 = arith.constant 3 : index
    %c0_154 = arith.constant 0 : index
    %396 = vector.load %arg9[%c3_153, %c0_154] : memref<8x64xf32, #tpu.memory_space<vmem>>, vector<1x16xf32>
    %397 = vector.broadcast %396 : vector<1x16xf32> to vector<64x16xf32>
    %398 = arith.addf %395, %397 : vector<64x16xf32>
    %399 = math.tanh %398 : vector<64x16xf32>
    %c184 = arith.constant 184 : index
    %c0_155 = arith.constant 0 : index
    %400 = vector.load %arg8[%c184, %c0_155] : memref<200x64xf32, #tpu.memory_space<vmem>>, vector<16x4xf32>
    %cst_156 = arith.constant dense<0.000000e+00> : vector<64x4xf32>
    %401 = tpu.matmul %399, %400, %cst_156 {dimension_numbers = #tpu.dot_dimension_numbers<[1], [0], [0], [1], [0, 0, 1, 1], [], []>} : vector<64x16xf32>, vector<16x4xf32>, vector<64x4xf32> -> vector<64x4xf32>
    %c4_157 = arith.constant 4 : index
    %c0_158 = arith.constant 0 : index
    %402 = vector.load %arg9[%c4_157, %c0_158] : memref<8x64xf32, #tpu.memory_space<vmem>>, vector<1x4xf32>
    %403 = vector.broadcast %402 : vector<1x4xf32> to vector<64x4xf32>
    %404 = arith.addf %401, %403 : vector<64x4xf32>
    %405 = arith.addf %369, %404 : vector<64x4xf32>
    %406 = tpu.concatenate %405, %369 in 1 : vector<64x4xf32>, vector<64x4xf32> -> vector<64x8xf32>
    %c0_159 = arith.constant 0 : index
    %c0_160 = arith.constant 0 : index
    %407 = vector.load %arg10[%c0_159, %c0_160] : memref<64x8xf32, #tpu.memory_space<vmem>>, vector<64x8xf32>
    tpu.vector_store %arg10[%c0_159, %c0_160], %406 {strides = array<i32>} : memref<64x8xf32, #tpu.memory_space<vmem>>, vector<64x8xf32>,
    return
  }
  func.func @transform_0(%arg0: i32) -> (i32, i32) {
    %c0_i32 = arith.constant 0 : i32
    %c0_i32_0 = arith.constant 0 : i32
    return %arg0, %c0_i32 : i32, i32
  }
  func.func @transform_1(%arg0: i32) -> (i32, i32) {
    %c0_i32 = arith.constant 0 : i32
    %c0_i32_0 = arith.constant 0 : i32
    %c0_i32_1 = arith.constant 0 : i32
    return %c0_i32, %c0_i32_0 : i32, i32
  }
  func.func @transform_2(%arg0: i32) -> (i32, i32) {
    %c0_i32 = arith.constant 0 : i32
    %c0_i32_0 = arith.constant 0 : i32
    %c0_i32_1 = arith.constant 0 : i32
    return %c0_i32, %c0_i32_0 : i32, i32
  }
  func.func @transform_3(%arg0: i32) -> (i32, i32) {
    %c0_i32 = arith.constant 0 : i32
    %c0_i32_0 = arith.constant 0 : i32
    %c0_i32_1 = arith.constant 0 : i32
    return %c0_i32, %c0_i32_0 : i32, i32
  }
  func.func @transform_4(%arg0: i32) -> (i32, i32) {
    %c0_i32 = arith.constant 0 : i32
    %c0_i32_0 = arith.constant 0 : i32
    %c0_i32_1 = arith.constant 0 : i32
    return %c0_i32, %c0_i32_0 : i32, i32
  }
  func.func @transform_5(%arg0: i32) -> (i32, i32) {
    %c0_i32 = arith.constant 0 : i32
    %c0_i32_0 = arith.constant 0 : i32
    %c0_i32_1 = arith.constant 0 : i32
    return %c0_i32, %c0_i32_0 : i32, i32
  }
  func.func @transform_6(%arg0: i32) -> (i32, i32) {
    %c0_i32 = arith.constant 0 : i32
    %c0_i32_0 = arith.constant 0 : i32
    %c0_i32_1 = arith.constant 0 : i32
    return %c0_i32, %c0_i32_0 : i32, i32
  }
  func.func @transform_7(%arg0: i32) -> (i32, i32) {
    %c0_i32 = arith.constant 0 : i32
    %c0_i32_0 = arith.constant 0 : i32
    %c0_i32_1 = arith.constant 0 : i32
    return %c0_i32, %c0_i32_0 : i32, i32
  }
  func.func @transform_8(%arg0: i32) -> (i32, i32) {
    %c0_i32 = arith.constant 0 : i32
    %c0_i32_0 = arith.constant 0 : i32
    %c0_i32_1 = arith.constant 0 : i32
    return %c0_i32, %c0_i32_0 : i32, i32
  }
  func.func @transform_9(%arg0: i32) -> (i32, i32) {
    %c0_i32 = arith.constant 0 : i32
    %c0_i32_0 = arith.constant 0 : i32
    return %arg0, %c0_i32 : i32, i32
  }
}

</mosaic_0001>

<bundles_post_ra>
// kernel: learned_rigid_body_forward.1
= control target key start
LH: loop header
LB: loop body
LE: loop exit
PB: predicated region body
PF: predicated region fallthrough
CT: control target
= control target key end

     0   :  { %vm71_vm0 = vcmask 1043456   ;;  %vm46_vm1 = vcmask 31744   ;;  %vm211_vm2 = vcmask 130048   ;;  %s7719_s20 = smov 124   ;;  %vm374_vm3 = vcmask 261120   ;;  %s7721_s12 = smov 120   ;;  %s9631_s1 = inlined_call_operand.vmem [shape: f32[184,64], index: 1, kind: input, shape index: {}]   ;;  %s9632_s0 = inlined_call_operand.vmem [shape: f32[64,13], index: 0, kind: input, shape index: {}]   ;;  %s9633_s2 = inlined_call_operand.vmem [shape: f32[8,64], index: 2, kind: input, shape index: {}]   ;;  %s9634_s3 = inlined_call_operand.vmem [shape: f32[104,32], index: 3, kind: input, shape index: {}]   ;;  %s9635_s4 = inlined_call_operand.vmem [shape: f32[8,32], index: 4, kind: input, shape index: {}]   ;;  %s9636_s5 = inlined_call_operand.vmem [shape: f32[184,64], index: 5, kind: input, shape index: {}]   ;;  %s9637_s6 = inlined_call_operand.vmem [shape: f32[8,64], index: 6, kind: input, shape index: {}]   ;;  %s9638_s7 = inlined_call_operand.vmem [shape: f32[200,64], index: 7, kind: input, shape index: {}]   ;;  %s9639_s8 = inlined_call_operand.vmem [shape: f32[8,64], index: 8, kind: input, shape index: {}]   ;;  %s9640_s9 = inlined_call_operand.vmem [shape: f32[64,8], index: 9, kind: output, shape index: {}]  }
   0x1   :  { %v7776_v0 = vld [vmem:[%s9631_s1] sm:$0xf]  ;;  %v7786_v2 = vld [vmem:[%s9632_s0 + $0x8] sm:$0xff]  ;;  %v7795_v3 = vld [vmem:[%s9632_s0 + $0x10] sm:$0xff]  ;;  %vm541_vm4 = vcmask 523264   ;;  %vm2735_vm5 = vcmask 64512  }
   0x2   :  { %v7781_v1 = vld [vmem:[%s9632_s0] sm:$0xff]  ;;  %6711 = vmatprep.subr.msk.mxu0 %vm71_vm0, %v7776_v0  ;;  %7409 = vmatprep.subr.msk.mxu1 %vm71_vm0, %v7776_v0  ;;  %v7809_v5 = vld [vmem:[%s9632_s0 + $0x28] sm:$0xff]  ;;  %v7818_v6 = vld [vmem:[%s9632_s0 + $0x30] sm:$0xff]  ;;  %vm3777_vm7 = vcmask 1040384   ;;  %vm3779_vm8 = vcmask 1041408   ;;  %vm3781_vm9 = vcmask 1042432  }
   0x3   :  { %6713 = vmatprep.mubr.msk.f32.mxu0 %vm46_vm1, %v7781_v1  ;;  %v7800_v4 = vld [vmem:[%s9632_s0 + $0x20] sm:$0xff]  ;;  %6712 = vmatpush3.msk.msra.mxu0 %vm71_vm0, %v7776_v0  ;;  %9693 = vst [vmem:[#allocation2_spill] sm:$0xff] %v7809_v5  ;;  %9694 = vst [vmem:[#allocation3_spill] sm:$0xff] %v7818_v6  ;;  %v7825_v7 = vld [vmem:[%s9632_s0 + $0x18] sm:$0xff]  ;;  %vm3784_vm10 = vcmask 1044480   ;;  %vm3786_vm11 = vcmask 1045504  }
   0x4   :  { %6714 = vmatmul.mubr.msk.f32.vlgmr.msra.gmra.mxu0 %vm46_vm1, %v7786_v2  ;;  %7410 = vmatpush3.msk.msra.mxu1 %vm71_vm0, %v7776_v0  ;;  %v7836_v8 = vld [vmem:[%s9632_s0 + $0x38] sm:$0xff]  ;;  %v7845_v9 = vld [vmem:[%s9631_s1 + $0x10] sm:$0xff]  ;;  %v7851_v10 = vld [vmem:[%s9631_s1 + $0x8] sm:$0xff]  ;;  %vm3788_vm12 = vcmask 1046528   ;;  %vm3823_vm13 = vcmask 80896   ;;  %s7722_s23 = smov 4  }
   0x5   :  { %6716 = vmatprep.mubr.msk.f32.mxu0 %vm46_vm1, %v7795_v3  ;;  %6719 = vmatprep.mubr.msk.f32.mxu1 %vm46_vm1, %v7800_v4  ;;  %9695 = vst [vmem:[#allocation4_spill] sm:$0xff] %v7836_v8  ;;  %v5953_v11 = vld [vmem:[%s9633_s2] ss:$0 sm:$0xff]  ;;  %v7894_v36 = vld [vmem:[%s9631_s1 + $0x30] sm:$0xff]  ;;  %v7901_v37 = vld [vmem:[%s9631_s1 + $0x28] sm:$0xff]  ;;  %vm5165_vm14 = vcmask 39936  }
   0x6   :  { %6720 = vmatmul.mubr.msk.f32.vlgmr.msra.gmra.mxu1 %vm46_vm1, %v7809_v5  ;;  %6725 = vmatprep.subr.mxu1 %v7845_v9  ;;  %v7908_v38 = vld [vmem:[%s9631_s1 + $0x20] sm:$0xff]  ;;  %v7915_v39 = vld [vmem:[%s9631_s1 + $0x18] sm:$0xff] }
   0x7   :  { %6722 = vmatprep.mubr.msk.f32.mxu1 %vm46_vm1, %v7818_v6  ;;  %6726 = vmatpush3.msra.mxu1 %v7845_v9  ;;  %v5963_v40 = vld [vmem:[%s9633_s2 + $0x1] ss:$0 sm:$0xff] }
   0x8   :  { %6717 = vmatmul.mubr.msk.f32.gmra.mxu0 %vm46_vm1, %v7825_v7  ;;  %6727 = vmatprep.subr.mxu1 %v7851_v10 }
   0x9   :  { %6728 = vmatpush3.msra.mxu1 %v7851_v10  ;;  %6741 = vmatprep.subr.mxu0 %v7894_v36 }
   0xa   :  { %6723 = vmatmul.mubr.msk.f32.gmra.mxu1 %vm46_vm1, %v7836_v8  ;;  %6742 = vmatpush3.msra.mxu0 %v7894_v36 }
   0xb   :  { %6743 = vmatprep.subr.mxu0 %v7901_v37  ;;  %837 = vrot.lane.b32.xlu0 %v7781_v1, %s7719_s20 }
   0xc   :  { %6744 = vmatpush3.msra.mxu0 %v7901_v37  ;;  %841 = vrot.lane.b32.xlu1 %v7795_v3, %s7719_s20 }
   0xd   :  { %6745 = vmatprep.subr.mxu0 %v7908_v38 }
   0xe   :  { %6746 = vmatpush3.msra.mxu0 %v7908_v38 }
   0xf   :  { %6747 = vmatprep.subr.mxu0 %v7915_v39  ;;  %839 = vrot.lane.b32.xlu0 %v7786_v2, %s7719_s20 }
  0x10   :  { %6748 = vmatpush3.msra.mxu0 %v7915_v39  ;;  %843 = vrot.lane.b32.xlu1 %v7825_v7, %s7719_s20 }
  0x13   :  { %845 = vrot.lane.b32.xlu0 %v7800_v4, %s7719_s20 }
  0x14   :  { %847 = vrot.lane.b32.xlu1 %v7809_v5, %s7719_s20 }
  0x17   :  { %849 = vrot.lane.b32.xlu0 %v7818_v6, %s7719_s20 }
  0x18   :  { %851 = vrot.lane.b32.xlu1 %v7836_v8, %s7719_s20 }
  0xc4   :  { %v6715_v12 = vpop.f32.mrf.mxu0 }
  0xc5   :  { %v147_v13 = vadd.f32 %v6715_v12, %v5953_v11  ;;  %v7965_v12 = vld [vmem:[%s9631_s1 + $0x70] sm:$0xff] }
  0xc6   :  { %v141_v14 = vpop.f32.mrf.mxu0  ;;  %v6721_v15 = vpop.f32.mrf.mxu1  ;;  %6761 = vmatprep.subr.mxu1 %v7965_v12 }
  0xc7   :  { %v142_v16 = vadd.f32 %v5953_v11, %v141_v14  ;;  %v167_v26 = vadd.f32 %v6721_v15, %v5953_v11  ;;  %v7979_v14 = vld [vmem:[%s9631_s1 + $0x60] sm:$0xff]  ;;  %v7986_v15 = vld [vmem:[%s9631_s1 + $0x58] sm:$0xff] }
  0xc8   :  { %v6718_v17 = vpop.f32.mrf.mxu0  ;;  %v161_v18 = vpop.f32.mrf.mxu1 }
  0xc9   :  { %7416 = vtanh.f32 %v142_v16  ;;  %v162_v19 = vadd.f32 %v5953_v11, %v161_v18  ;;  %v157_v20 = vadd.f32 %v6718_v17, %v5953_v11  ;;  %v7993_v16 = vld [vmem:[%s9631_s1 + $0x50] sm:$0xff]  ;;  %v8000_v17 = vld [vmem:[%s9631_s1 + $0x48] sm:$0xff]  ;;  %v8007_v18 = vld [vmem:[%s9631_s1 + $0x40] sm:$0xff] }
  0xca   :  { %7418 = vtanh.f32 %v147_v13  ;;  %v151_v21 = vpop.f32.mrf.mxu0  ;;  %v6724_v22 = vpop.f32.mrf.mxu1  ;;  %v7972_v13 = vld [vmem:[%s9631_s1 + $0x68] sm:$0xff] }
  0xcb   :  { %v152_v23 = vadd.f32 %v5953_v11, %v151_v21  ;;  %7420 = vtanh.f32 %v162_v19  ;;  %v177_v27 = vadd.f32 %v6724_v22, %v5953_v11  ;;  %v8014_v19 = vld [vmem:[%s9631_s1 + $0x38] sm:$0xff]  ;;  %v842_v22 = vpop.permute.xlu1 %841 }
  0xcc   :  { %v171_v24 = vpop.f32.mrf.mxu1 }
  0xcd   :  { %7422 = vtanh.f32 %v152_v23  ;;  %v172_v25 = vadd.f32 %v5953_v11, %v171_v24 }
  0xce   :  { %7424 = vtanh.f32 %v157_v20  ;;  %v838_v20 = vpop.permute.xlu0 %837 }
  0xcf   :  { %7426 = vtanh.f32 %v172_v25  ;;  %3519 = vxpose.xlu1.b32.start [1/8] (short) (narrow) %v838_v20, 8  ;;  %v844_v23 = vpop.permute.xlu1 %843 }
  0xd0   :  { %7428 = vtanh.f32 %v167_v26 }
  0xd1   :  { %7430 = vtanh.f32 %v177_v27 }
  0xd2   :  { %v840_v21 = vpop.permute.xlu0 %839 }
  0xd3   :  { %3520 = vxpose.xlu1.b32.cont [2/8] (short) (narrow) %v840_v21, 8  ;;  %v848_v25 = vpop.permute.xlu1 %847 }
  0xd6   :  { %v7859_v28 = vpop.eup %7416  ;;  %v846_v24 = vpop.permute.xlu0 %845 }
  0xd7   :  { %v7861_v29 = vpop.eup %7418  ;;  %6729 = vmatprep.mubr.msk.f32.mxu1 %vm211_vm2, %v7859_v28  ;;  %3521 = vxpose.xlu1.b32.cont [3/8] (short) (narrow) %v842_v22, 8  ;;  %v852_v27 = vpop.permute.xlu1 %851 }
  0xd8   :  { %6730 = vmatmul.mubr.msk.f32.vlgmr.msra.gmra.mxu1 %vm211_vm2, %v7861_v29  ;;  %v7867_v30 = vpop.eup %7420 }
  0xd9   :  { %6762 = vmatpush3.msra.mxu1 %v7965_v12 }
  0xda   :  { %v7869_v31 = vpop.eup %7422  ;;  %6763 = vmatprep.subr.mxu1 %v7972_v13  ;;  %v850_v26 = vpop.permute.xlu0 %849 }
  0xdb   :  { %v7871_v32 = vpop.eup %7424  ;;  %6732 = vmatprep.mubr.msk.f32.mxu1 %vm211_vm2, %v7869_v31  ;;  %6764 = vmatpush3.msra.mxu1 %v7972_v13 }
  0xdc   :  { %6733 = vmatmul.mubr.msk.f32.gmra.mxu1 %vm211_vm2, %v7871_v32  ;;  %v7879_v33 = vpop.eup %7426  ;;  %6765 = vmatprep.subr.mxu1 %v7979_v14 }
  0xdd   :  { %6735 = vmatprep.mubr.msk.f32.mxu1 %vm211_vm2, %v7867_v30  ;;  %v7881_v34 = vpop.eup %7428  ;;  %6766 = vmatpush3.msra.mxu1 %v7979_v14 }
  0xde   :  { %v7887_v35 = vpop.eup %7430  ;;  %6767 = vmatprep.subr.mxu1 %v7986_v15  ;;  %3522 = vxpose.xlu1.b32.cont [4/8] (short) (narrow) %v844_v23, 8 }
  0xdf   :  { %6768 = vmatpush3.msra.mxu1 %v7986_v15 }
  0xe0   :  { %6736 = vmatmul.mubr.msk.f32.gmra.mxu1 %vm211_vm2, %v7881_v34  ;;  %6769 = vmatprep.subr.mxu1 %v7993_v16 }
  0xe1   :  { %6738 = vmatprep.mubr.msk.f32.mxu1 %vm211_vm2, %v7879_v33  ;;  %6770 = vmatpush3.msra.mxu1 %v7993_v16 }
  0xe2   :  { %6771 = vmatprep.subr.mxu1 %v8000_v17  ;;  %3523 = vxpose.xlu1.b32.cont [5/8] (short) (narrow) %v846_v24, 8 }
  0xe3   :  { %6772 = vmatpush3.msra.mxu1 %v8000_v17 }
  0xe4   :  { %6739 = vmatmul.mubr.msk.f32.gmra.mxu1 %vm211_vm2, %v7887_v35  ;;  %6773 = vmatprep.subr.mxu1 %v8007_v18 }
  0xe5   :  { %6774 = vmatpush3.msra.mxu1 %v8007_v18 }
  0xe6   :  { %6775 = vmatprep.subr.mxu1 %v8014_v19  ;;  %3524 = vxpose.xlu1.b32.cont [6/8] (short) (narrow) %v848_v25, 8 }
  0xe7   :  { %6776 = vmatpush3.msra.mxu1 %v8014_v19 }
  0xe8   :  { %6817 = vmatprep.subr.msk.mxu1 %vm71_vm0, %v7776_v0 }
  0xea   :  { %3525 = vxpose.xlu1.b32.cont [7/8] (short) (narrow) %v850_v26, 8 }
  0xee   :  { %3526 = vxpose.xlu1.b32.end [8/8] (short) (narrow) %v852_v27, 8 }
 0x198   :  { %v6731_v41 = vpop.f32.mrf.mxu1 }
 0x199   :  { %v308_v42 = vadd.f32 %v6731_v41, %v5963_v40 }
 0x19a   :  { %v302_v43 = vpop.f32.mrf.mxu1 }
 0x19b   :  { %v303_v44 = vadd.f32 %v5963_v40, %v302_v43 }
 0x19c   :  { %v6734_v45 = vpop.f32.mrf.mxu1 }
 0x19d   :  { %7432 = vtanh.f32 %v303_v44  ;;  %v318_v46 = vadd.f32 %v6734_v45, %v5963_v40 }
 0x19e   :  { %7434 = vtanh.f32 %v308_v42  ;;  %v312_v47 = vpop.f32.mrf.mxu1 }
 0x19f   :  { %v313_v48 = vadd.f32 %v5963_v40, %v312_v47 }
 0x1a0   :  { %v6737_v49 = vpop.f32.mrf.mxu1 }
 0x1a1   :  { %7436 = vtanh.f32 %v313_v48  ;;  %v328_v50 = vadd.f32 %v6737_v49, %v5963_v40 }
 0x1a2   :  { %7438 = vtanh.f32 %v318_v46  ;;  %v322_v51 = vpop.f32.mrf.mxu1 }
 0x1a3   :  { %v323_v52 = vadd.f32 %v5963_v40, %v322_v51 }
 0x1a4   :  { %v6740_v53 = vpop.f32.mrf.mxu1 }
 0x1a5   :  { %7440 = vtanh.f32 %v323_v52  ;;  %v338_v54 = vadd.f32 %v6740_v53, %v5963_v40 }
 0x1a6   :  { %7442 = vtanh.f32 %v328_v50  ;;  %v332_v55 = vpop.f32.mrf.mxu1 }
 0x1a7   :  { %v333_v56 = vadd.f32 %v5963_v40, %v332_v55  ;;  %v5972_v40 = vld [vmem:[%s9633_s2 + $0x2] ss:$0 sm:$0xff] }
 0x1a9   :  { %7444 = vtanh.f32 %v333_v56 }
 0x1aa   :  { %v7930_v57 = vpop.eup %7432  ;;  %7446 = vtanh.f32 %v338_v54 }
 0x1ab   :  { %v7932_v58 = vpop.eup %7434  ;;  %6749 = vmatprep.mubr.msk.f32.mxu0 %vm374_vm3, %v7930_v57 }
 0x1ac   :  { %6750 = vmatmul.mubr.msk.f32.vlgmr.msra.gmra.mxu0 %vm374_vm3, %v7932_v58 }
 0x1ae   :  { %v7938_v59 = vpop.eup %7436 }
 0x1af   :  { %v7940_v60 = vpop.eup %7438  ;;  %6752 = vmatprep.mubr.msk.f32.mxu0 %vm374_vm3, %v7938_v59 }
 0x1b0   :  { %6753 = vmatmul.mubr.msk.f32.gmra.mxu0 %vm374_vm3, %v7940_v60 }
 0x1b2   :  { %v7946_v61 = vpop.eup %7440 }
 0x1b3   :  { %v7948_v62 = vpop.eup %7442  ;;  %6755 = vmatprep.mubr.msk.f32.mxu0 %vm374_vm3, %v7946_v61 }
 0x1b4   :  { %6756 = vmatmul.mubr.msk.f32.gmra.mxu0 %vm374_vm3, %v7948_v62 }
 0x1b6   :  { %v7954_v63 = vpop.eup %7444 }
 0x1b7   :  { %v7956_v11 = vpop.eup %7446  ;;  %6758 = vmatprep.mubr.msk.f32.mxu0 %vm374_vm3, %v7954_v63 }
 0x1b8   :  { %6759 = vmatmul.mubr.msk.f32.gmra.mxu0 %vm374_vm3, %v7956_v11 }
 0x26c   :  { %v6751_v41 = vpop.f32.mrf.mxu0 }
 0x26d   :  { %v471_v42 = vadd.f32 %v6751_v41, %v5972_v40 }
 0x26e   :  { %v465_v43 = vpop.f32.mrf.mxu0 }
 0x26f   :  { %v466_v44 = vadd.f32 %v5972_v40, %v465_v43 }
 0x270   :  { %v6754_v45 = vpop.f32.mrf.mxu0 }
 0x271   :  { %7448 = vtanh.f32 %v466_v44  ;;  %v481_v46 = vadd.f32 %v6754_v45, %v5972_v40 }
 0x272   :  { %7450 = vtanh.f32 %v471_v42  ;;  %v475_v47 = vpop.f32.mrf.mxu0 }
 0x273   :  { %v476_v48 = vadd.f32 %v5972_v40, %v475_v47 }
 0x274   :  { %v6757_v49 = vpop.f32.mrf.mxu0 }
 0x275   :  { %7452 = vtanh.f32 %v476_v48  ;;  %v491_v50 = vadd.f32 %v6757_v49, %v5972_v40 }
 0x276   :  { %7454 = vtanh.f32 %v481_v46  ;;  %v485_v51 = vpop.f32.mrf.mxu0 }
 0x277   :  { %v486_v52 = vadd.f32 %v5972_v40, %v485_v51 }
 0x278   :  { %v6760_v53 = vpop.f32.mrf.mxu0 }
 0x279   :  { %7456 = vtanh.f32 %v486_v52  ;;  %v501_v54 = vadd.f32 %v6760_v53, %v5972_v40 }
 0x27a   :  { %7458 = vtanh.f32 %v491_v50  ;;  %v495_v55 = vpop.f32.mrf.mxu0 }
 0x27b   :  { %v496_v56 = vadd.f32 %v5972_v40, %v495_v55 }
 0x27d   :  { %7460 = vtanh.f32 %v496_v56 }
 0x27e   :  { %v8023_v41 = vpop.eup %7448  ;;  %7462 = vtanh.f32 %v501_v54 }
 0x27f   :  { %v8025_v42 = vpop.eup %7450  ;;  %6777 = vmatprep.mubr.msk.f32.mxu1 %vm541_vm4, %v8023_v41 }
 0x280   :  { %6778 = vmatmul.mubr.msk.f32.vlgmr.msra.gmra.mxu1 %vm541_vm4, %v8025_v42 }
 0x281   :  { %6818 = vmatpush3.msk.msra.mxu1 %vm71_vm0, %v7776_v0 }
 0x282   :  { %v8033_v43 = vpop.eup %7452  ;;  %6847 = vmatprep.subr.mxu1 %v7894_v36 }
 0x283   :  { %v8036_v40 = vpop.eup %7454  ;;  %6780 = vmatprep.mubr.msk.f32.mxu1 %vm541_vm4, %v8033_v43 }
 0x284   :  { %6781 = vmatmul.mubr.msk.f32.gmra.mxu1 %vm541_vm4, %v8036_v40 }
 0x286   :  { %v8042_v44 = vpop.eup %7456 }
 0x287   :  { %v8044_v45 = vpop.eup %7458  ;;  %6783 = vmatprep.mubr.msk.f32.mxu1 %vm541_vm4, %v8042_v44 }
 0x288   :  { %6784 = vmatmul.mubr.msk.f32.gmra.mxu1 %vm541_vm4, %v8044_v45 }
 0x28a   :  { %v8050_v0 = vpop.eup %7460 }
 0x28b   :  { %v8052_v46 = vpop.eup %7462  ;;  %6786 = vmatprep.mubr.msk.f32.mxu1 %vm541_vm4, %v8050_v0 }
 0x28c   :  { %6787 = vmatmul.mubr.msk.f32.gmra.mxu1 %vm541_vm4, %v8052_v46 }
 0x28d   :  { %6819 = vmatprep.mubr.msk.f32.mxu1 %vm46_vm1, %v838_v20  ;;  %v8105_v20 = vld [vmem:[%s9631_s1 + $0x90] sm:$0xff] }
 0x290   :  { %6820 = vmatmul.mubr.msk.f32.vlgmr.msra.gmra.mxu1 %vm46_vm1, %v840_v21  ;;  %v8112_v21 = vld [vmem:[%s9631_s1 + $0x88] sm:$0xff] }
 0x291   :  { %6822 = vmatprep.mubr.msk.f32.mxu1 %vm46_vm1, %v842_v22  ;;  %6848 = vmatpush3.msra.mxu1 %v7894_v36  ;;  %v8076_v36 = vld [vmem:[%s9631_s1 + $0xb0] sm:$0xff]  ;;  %v8119_v22 = vld [vmem:[%s9631_s1 + $0x80] sm:$0xff] }
 0x292   :  { %6849 = vmatprep.subr.mxu1 %v7901_v37  ;;  %6789 = vmatprep.subr.mxu0 %v8076_v36 }
 0x293   :  { %6850 = vmatpush3.msra.mxu1 %v7901_v37  ;;  %6790 = vmatpush3.msra.mxu0 %v8076_v36  ;;  %v8084_v37 = vld [vmem:[%s9631_s1 + $0xa8] sm:$0xff] }
 0x294   :  { %6823 = vmatmul.mubr.msk.f32.gmra.mxu1 %vm46_vm1, %v844_v23  ;;  %6851 = vmatprep.subr.mxu1 %v7908_v38  ;;  %v8126_v23 = vld [vmem:[%s9631_s1 + $0x78] sm:$0xff] }
 0x295   :  { %6825 = vmatprep.mubr.msk.f32.mxu1 %vm46_vm1, %v846_v24  ;;  %6852 = vmatpush3.msra.mxu1 %v7908_v38  ;;  %v8091_v38 = vld [vmem:[%s9631_s1 + $0xa0] sm:$0xff] }
 0x296   :  { %6853 = vmatprep.subr.mxu1 %v7915_v39  ;;  %6791 = vmatprep.subr.mxu0 %v8084_v37  ;;  %v5981_v24 = vld [vmem:[%s9633_s2 + $0x3] ss:$0 sm:$0xff] }
 0x297   :  { %6854 = vmatpush3.msra.mxu1 %v7915_v39  ;;  %6792 = vmatpush3.msra.mxu0 %v8084_v37  ;;  %v8098_v39 = vld [vmem:[%s9631_s1 + $0x98] sm:$0xff] }
 0x298   :  { %6826 = vmatmul.mubr.msk.f32.gmra.mxu1 %vm46_vm1, %v848_v25  ;;  %6895 = vmatprep.subr.mxu1 %v8076_v36 }
 0x299   :  { %6828 = vmatprep.mubr.msk.f32.mxu1 %vm46_vm1, %v850_v26  ;;  %6793 = vmatprep.subr.mxu0 %v8091_v38 }
 0x29a   :  { %6794 = vmatpush3.msra.mxu0 %v8091_v38 }
 0x29b   :  { %6795 = vmatprep.subr.mxu0 %v8098_v39 }
 0x29c   :  { %6829 = vmatmul.mubr.msk.f32.gmra.mxu1 %vm46_vm1, %v852_v27  ;;  %6796 = vmatpush3.msra.mxu0 %v8098_v39 }
 0x29d   :  { %6797 = vmatprep.subr.mxu0 %v8105_v20 }
 0x29e   :  { %6798 = vmatpush3.msra.mxu0 %v8105_v20 }
 0x29f   :  { %6799 = vmatprep.subr.mxu0 %v8112_v21 }
 0x2a0   :  { %6800 = vmatpush3.msra.mxu0 %v8112_v21 }
 0x2a1   :  { %6801 = vmatprep.subr.mxu0 %v8119_v22 }
 0x2a2   :  { %6802 = vmatpush3.msra.mxu0 %v8119_v22 }
 0x2a3   :  { %6803 = vmatprep.subr.mxu0 %v8126_v23 }
 0x2a4   :  { %6804 = vmatpush3.msra.mxu0 %v8126_v23 }
 0x2a5   :  { %6831 = vmatprep.subr.mxu0 %v7845_v9 }
 0x340   :  { %v6779_v25 = vpop.f32.mrf.mxu1 }
 0x341   :  { %v638_v26 = vadd.f32 %v6779_v25, %v5981_v24 }
 0x342   :  { %v632_v27 = vpop.f32.mrf.mxu1 }
 0x343   :  { %v633_v47 = vadd.f32 %v5981_v24, %v632_v27 }
 0x344   :  { %v6782_v48 = vpop.f32.mrf.mxu1 }
 0x345   :  { %7464 = vtanh.f32 %v633_v47  ;;  %v648_v49 = vadd.f32 %v6782_v48, %v5981_v24 }
 0x346   :  { %7466 = vtanh.f32 %v638_v26  ;;  %v642_v50 = vpop.f32.mrf.mxu1 }
 0x347   :  { %v643_v51 = vadd.f32 %v5981_v24, %v642_v50 }
 0x348   :  { %v6785_v52 = vpop.f32.mrf.mxu1 }
 0x349   :  { %7468 = vtanh.f32 %v643_v51  ;;  %v658_v53 = vadd.f32 %v6785_v52, %v5981_v24 }
 0x34a   :  { %7470 = vtanh.f32 %v648_v49  ;;  %v652_v54 = vpop.f32.mrf.mxu1 }
 0x34b   :  { %v653_v55 = vadd.f32 %v5981_v24, %v652_v54 }
 0x34c   :  { %v6788_v56 = vpop.f32.mrf.mxu1 }
 0x34d   :  { %7472 = vtanh.f32 %v653_v55  ;;  %v668_v8 = vadd.f32 %v6788_v56, %v5981_v24  ;;  %v8186_v56 = vmul.f32 %v7871_v32, %v7871_v32 }
 0x34e   :  { %7474 = vtanh.f32 %v658_v53  ;;  %v662_v6 = vpop.f32.mrf.mxu1 }
 0x34f   :  { %v663_v25 = vadd.f32 %v5981_v24, %v662_v6  ;;  %9701 = vst [vmem:[#allocation10_spill] sm:$0xff] %v8186_v56  ;;  %v9652_v32 = vsub.f32 1.0, %v8186_v56 }
 0x350   :  { %v6821_v5 = vpop.f32.mrf.mxu1 }
 0x351   :  { %7476 = vtanh.f32 %v663_v25 }
 0x352   :  { %v8134_v27 = vpop.eup %7464  ;;  %7478 = vtanh.f32 %v668_v8  ;;  %v935_v26 = vpop.f32.mrf.mxu1 }
 0x353   :  { %v8136_v47 = vpop.eup %7466  ;;  %6805 = vmatprep.mubr.msk.f32.mxu0 %vm541_vm4, %v8134_v27 }
 0x354   :  { %6806 = vmatmul.mubr.msk.f32.vlgmr.msra.gmra.mxu0 %vm541_vm4, %v8136_v47  ;;  %v6824_v48 = vpop.f32.mrf.mxu1 }
 0x355   :  { %6832 = vmatpush3.msra.mxu0 %v7845_v9  ;;  %v8156_v9 = vmul.f32 %v7859_v28, %v7859_v28  ;;  %v8173_v28 = vmul.f32 %v7869_v31, %v7869_v31 }
 0x356   :  { %v8143_v49 = vpop.eup %7468  ;;  %6833 = vmatprep.subr.mxu0 %v7851_v10  ;;  %v945_v8 = vpop.f32.mrf.mxu1 }
 0x357   :  { %v8146_v6 = vpop.eup %7470  ;;  %6808 = vmatprep.mubr.msk.f32.mxu0 %vm541_vm4, %v8143_v49  ;;  %6834 = vmatpush3.msra.mxu0 %v7851_v10  ;;  %9696 = vst [vmem:[#allocation5_spill] sm:$0xff] %v8156_v9  ;;  %v8166_v10 = vmul.f32 %v7861_v29, %v7861_v29  ;;  %v9645_v52 = vsub.f32 1.0, %v8156_v9  ;;  %9699 = vst [vmem:[#allocation8_spill] sm:$0xff] %v8173_v28  ;;  %v9653_v31 = vsub.f32 1.0, %v8173_v28 }
 0x358   :  { %6809 = vmatmul.mubr.msk.f32.gmra.mxu0 %vm541_vm4, %v8146_v6  ;;  %6867 = vmatprep.subr.mxu0 %v7965_v12  ;;  %v6827_v51 = vpop.f32.mrf.mxu1  ;;  %v8203_v9 = vmul.f32 %v7881_v34, %v7881_v34 }
 0x359   :  { %9698 = vst [vmem:[#allocation7_spill] sm:$0xff] %v8166_v10  ;;  %v974_v55 = vmul.f32 %v935_v26, %v9645_v52  ;;  %v9654_v29 = vsub.f32 1.0, %v8166_v10  ;;  %v976_v52 = vmul.f32 %v945_v8, %v9653_v31 }
 0x35a   :  { %v8158_v24 = vpop.eup %7472  ;;  %v955_v25 = vpop.f32.mrf.mxu1  ;;  %9703 = vst [vmem:[#allocation12_spill] sm:$0xff] %v8203_v9  ;;  %v9650_v8 = vsub.f32 1.0, %v8203_v9 }
 0x35b   :  { %v8160_v50 = vpop.eup %7474  ;;  %6811 = vmatprep.mubr.msk.f32.mxu0 %vm541_vm4, %v8158_v24  ;;  %v975_v26 = vmul.f32 %v6821_v5, %v9654_v29  ;;  %v977_v5 = vmul.f32 %v6824_v48, %v9652_v32 }
 0x35c   :  { %9697 = vst [vmem:[#allocation6_spill] sm:$0xff] %v8160_v50  ;;  %6812 = vmatmul.mubr.msk.f32.gmra.mxu0 %vm541_vm4, %v8160_v50  ;;  %v8193_v50 = vmul.f32 %v7867_v30, %v7867_v30 }
 0x35e   :  { %v8175_v53 = vpop.eup %7476  ;;  %9702 = vst [vmem:[#allocation11_spill] sm:$0xff] %v8193_v50  ;;  %v9651_v30 = vsub.f32 1.0, %v8193_v50 }
 0x35f   :  { %v8177_v54 = vpop.eup %7478  ;;  %6814 = vmatprep.mubr.msk.f32.mxu0 %vm541_vm4, %v8175_v53 }
 0x360   :  { %9700 = vst [vmem:[#allocation9_spill] sm:$0xff] %v8177_v54  ;;  %6815 = vmatmul.mubr.msk.f32.gmra.mxu0 %vm541_vm4, %v8177_v54  ;;  %v6830_v54 = vpop.f32.mrf.mxu1  ;;  %v978_v34 = vmul.f32 %v955_v25, %v9651_v30 }
 0x361   :  { %6835 = vmatprep.mubr.msk.f32.mxu0 %vm211_vm2, %v974_v55  ;;  %v8209_v55 = vmul.f32 %v7879_v33, %v7879_v33  ;;  %v8222_v33 = vmul.f32 %v7887_v35, %v7887_v35 }
 0x363   :  { %9704 = vst [vmem:[#allocation13_spill] sm:$0xff] %v8209_v55  ;;  %9705 = vst [vmem:[#allocation14_spill] sm:$0xff] %v8222_v33  ;;  %v9648_v48 = vsub.f32 1.0, %v8222_v33 }
 0x364   :  { %6836 = vmatmul.mubr.msk.f32.vlgmr.msra.gmra.mxu0 %vm211_vm2, %v975_v26  ;;  %v965_v26 = vpop.f32.mrf.mxu1 }
 0x365   :  { %6838 = vmatprep.mubr.msk.f32.mxu0 %vm211_vm2, %v976_v52  ;;  %6868 = vmatpush3.msra.mxu0 %v7965_v12  ;;  %v9649_v12 = vsub.f32 1.0, %v8209_v55 }
 0x366   :  { %6869 = vmatprep.subr.mxu0 %v7972_v13 }
 0x367   :  { %6870 = vmatpush3.msra.mxu0 %v7972_v13  ;;  %v979_v13 = vmul.f32 %v6827_v51, %v9650_v8  ;;  %v980_v35 = vmul.f32 %v965_v26, %v9649_v12  ;;  %v9715_v32 = vld [vmem:[#allocation9_spill] sm:$0xff] }
 0x368   :  { %6839 = vmatmul.mubr.msk.f32.gmra.mxu0 %vm211_vm2, %v977_v5  ;;  %6871 = vmatprep.subr.mxu0 %v7979_v14 }
 0x369   :  { %6841 = vmatprep.mubr.msk.f32.mxu0 %vm211_vm2, %v978_v34  ;;  %6872 = vmatpush3.msra.mxu0 %v7979_v14  ;;  %v981_v14 = vmul.f32 %v6830_v54, %v9648_v48  ;;  %v8278_v48 = vmul.f32 %v7946_v61, %v7946_v61 }
 0x36a   :  { %6873 = vmatprep.subr.mxu0 %v7986_v15 }
 0x36b   :  { %6874 = vmatpush3.msra.mxu0 %v7986_v15  ;;  %9707 = vst [vmem:[#allocation16_spill] sm:$0xff] %v8278_v48 }
 0x36c   :  { %6842 = vmatmul.mubr.msk.f32.gmra.mxu0 %vm211_vm2, %v979_v13  ;;  %6875 = vmatprep.subr.mxu0 %v7993_v16 }
 0x36d   :  { %6844 = vmatprep.mubr.msk.f32.mxu0 %vm211_vm2, %v980_v35  ;;  %6876 = vmatpush3.msra.mxu0 %v7993_v16  ;;  %v5990_v16 = vld [vmem:[%s9633_s2 + $0x4] ss:$0 sm:$0xff]  ;;  %v8258_v35 = vmul.f32 %v7932_v58, %v7932_v58 }
 0x36e   :  { %6877 = vmatprep.subr.mxu0 %v8000_v17 }
 0x36f   :  { %6878 = vmatpush3.msra.mxu0 %v8000_v17 }
 0x370   :  { %6845 = vmatmul.mubr.msk.f32.gmra.mxu0 %vm211_vm2, %v981_v14  ;;  %6879 = vmatprep.subr.mxu0 %v8007_v18 }
 0x371   :  { %6880 = vmatpush3.msra.mxu0 %v8007_v18 }
 0x372   :  { %6881 = vmatprep.subr.mxu0 %v8014_v19 }
 0x373   :  { %6882 = vmatpush3.msra.mxu0 %v8014_v19  ;;  %v8254_v19 = vmul.f32 %v7930_v57, %v7930_v57  ;;  %v8268_v57 = vmul.f32 %v7940_v60, %v7940_v60 }
 0x375   :  { %9706 = vst [vmem:[#allocation15_spill] sm:$0xff] %v8268_v57  ;;  %v9659_v60 = vsub.f32 1.0, %v8268_v57 }
 0x414   :  { %v6807_v15 = vpop.f32.mrf.mxu0 }
 0x415   :  { %v804_v25 = vadd.f32 %v6807_v15, %v5990_v16  ;;  %v9662_v15 = vsub.f32 1.0, %v8254_v19 }
 0x416   :  { %v798_v51 = vpop.f32.mrf.mxu0 }
 0x417   :  { %v799_v52 = vadd.f32 %v5990_v16, %v798_v51 }
 0x418   :  { %v6810_v54 = vpop.f32.mrf.mxu0 }
 0x419   :  { %3447 = vxpose.xlu0.b32.start [1/8] (short) (narrow) %v799_v52, 16  ;;  %v814_v14 = vadd.f32 %v6810_v54, %v5990_v16  ;;  %v8263_v52 = vmul.f32 %v7938_v59, %v7938_v59 }
 0x41a   :  { %v808_v17 = vpop.f32.mrf.mxu0 }
 0x41b   :  { %v809_v26 = vadd.f32 %v5990_v16, %v808_v17  ;;  %v9661_v17 = vsub.f32 1.0, %v8258_v35  ;;  %v9660_v59 = vsub.f32 1.0, %v8263_v52 }
 0x41c   :  { %v6813_v5 = vpop.f32.mrf.mxu0 }
 0x41d   :  { %3448 = vxpose.xlu0.b32.cont [2/8] (short) (narrow) %v804_v25, 16 }
 0x41e   :  { %v818_v34 = vpop.f32.mrf.mxu0 }
 0x420   :  { %v6816_v18 = vpop.f32.mrf.mxu0 }
 0x421   :  { %3449 = vxpose.xlu0.b32.cont [3/8] (short) (narrow) %v809_v26, 16  ;;  %v819_v26 = vadd.f32 %v5990_v16, %v818_v34  ;;  %v8284_v34 = vmul.f32 %v7948_v62, %v7948_v62  ;;  %v8296_v62 = vmul.f32 %v7954_v63, %v7954_v63 }
 0x422   :  { %v828_v13 = vpop.f32.mrf.mxu0 }
 0x423   :  { %9708 = vst [vmem:[#allocation17_spill] sm:$0xff] %v8284_v34  ;;  %9709 = vst [vmem:[#allocation18_spill] sm:$0xff] %v8296_v62 }
 0x424   :  { %v6837_v51 = vpop.f32.mrf.mxu0 }
 0x425   :  { %3450 = vxpose.xlu0.b32.cont [4/8] (short) (narrow) %v814_v14, 16  ;;  %v1112_v54 = vmul.f32 %v6837_v51, %v9661_v17  ;;  %v824_v51 = vadd.f32 %v6813_v5, %v5990_v16  ;;  %v9657_v5 = vsub.f32 1.0, %v8284_v34 }
 0x426   :  { %v1072_v25 = vpop.f32.mrf.mxu0 }
 0x427   :  { %v1111_v58 = vmul.f32 %v1072_v25, %v9662_v15 }
 0x428   :  { %v6840_v14 = vpop.f32.mrf.mxu0 }
 0x429   :  { %3451 = vxpose.xlu0.b32.cont [5/8] (short) (narrow) %v819_v26, 16  ;;  %6855 = vmatprep.mubr.msk.f32.mxu1 %vm374_vm3, %v1111_v58  ;;  %v1114_v26 = vmul.f32 %v6840_v14, %v9659_v60  ;;  %v9658_v58 = vsub.f32 1.0, %v8278_v48 }
 0x42a   :  { %v1082_v12 = vpop.f32.mrf.mxu0  ;;  %6856 = vmatmul.mubr.msk.f32.vlgmr.msra.gmra.mxu1 %vm374_vm3, %v1112_v54  ;;  %v829_v54 = vadd.f32 %v5990_v16, %v828_v13  ;;  %v834_v13 = vadd.f32 %v6816_v18, %v5990_v16 }
 0x42b   :  { %v1113_v25 = vmul.f32 %v1082_v12, %v9660_v59  ;;  %6896 = vmatpush3.msra.mxu1 %v8076_v36  ;;  %v8302_v36 = vmul.f32 %v7956_v11, %v7956_v11 }
 0x42c   :  { %v6843_v61 = vpop.f32.mrf.mxu0  ;;  %6897 = vmatprep.subr.mxu1 %v8084_v37 }
 0x42d   :  { %3452 = vxpose.xlu0.b32.cont [6/8] (short) (narrow) %v824_v51, 16  ;;  %6858 = vmatprep.mubr.msk.f32.mxu1 %vm374_vm3, %v1113_v25  ;;  %9710 = vst [vmem:[#allocation19_spill] sm:$0xff] %v8302_v36  ;;  %v1116_v51 = vmul.f32 %v6843_v61, %v9657_v5  ;;  %v9656_v25 = vsub.f32 1.0, %v8296_v62  ;;  %v9655_v11 = vsub.f32 1.0, %v8302_v36 }
 0x42e   :  { %v1092_v12 = vpop.f32.mrf.mxu0  ;;  %6859 = vmatmul.mubr.msk.f32.gmra.mxu1 %vm374_vm3, %v1114_v26 }
 0x42f   :  { %v1115_v14 = vmul.f32 %v1092_v12, %v9658_v58  ;;  %6898 = vmatpush3.msra.mxu1 %v8084_v37  ;;  %v8354_v12 = vmul.f32 %v8036_v40, %v8036_v40  ;;  %v8370_v40 = vmul.f32 %v8044_v45, %v8044_v45 }
 0x430   :  { %v6846_v63 = vpop.f32.mrf.mxu0  ;;  %6899 = vmatprep.subr.mxu1 %v8091_v38 }
 0x431   :  { %3453 = vxpose.xlu0.b32.cont [7/8] (short) (narrow) %v829_v54, 16  ;;  %6861 = vmatprep.mubr.msk.f32.mxu1 %vm374_vm3, %v1115_v14  ;;  %v1118_v61 = vmul.f32 %v6846_v63, %v9655_v11  ;;  %v9665_v45 = vsub.f32 1.0, %v8370_v40 }
 0x432   :  { %v1102_v26 = vpop.f32.mrf.mxu0  ;;  %6862 = vmatmul.mubr.msk.f32.gmra.mxu1 %vm374_vm3, %v1116_v51  ;;  %v9667_v51 = vsub.f32 1.0, %v8354_v12 }
 0x433   :  { %v1117_v37 = vmul.f32 %v1102_v26, %v9656_v25  ;;  %6900 = vmatpush3.msra.mxu1 %v8091_v38  ;;  %v8334_v38 = vld [vmem:[%s9634_s3] sm:$0xf] }
 0x434   :  { %6901 = vmatprep.subr.mxu1 %v8098_v39  ;;  %6923 = vmatprep.subr.msk.mxu0 %vm71_vm0, %v8334_v38 }
 0x435   :  { %3454 = vxpose.xlu0.b32.end [8/8] (short) (narrow) %v834_v13, 16  ;;  %6864 = vmatprep.mubr.msk.f32.mxu1 %vm374_vm3, %v1117_v37 }
 0x436   :  { %6865 = vmatmul.mubr.msk.f32.gmra.mxu1 %vm374_vm3, %v1118_v61  ;;  %v8382_v61 = vmul.f32 %v8050_v0, %v8050_v0 }
 0x437   :  { %6902 = vmatpush3.msra.mxu1 %v8098_v39  ;;  %v8340_v39 = vmul.f32 %v8023_v41, %v8023_v41 }
 0x438   :  { %6903 = vmatprep.subr.mxu1 %v8105_v20  ;;  %v9664_v0 = vsub.f32 1.0, %v8382_v61 }
 0x439   :  { %6904 = vmatpush3.msra.mxu1 %v8105_v20  ;;  %v8344_v20 = vmul.f32 %v8025_v42, %v8025_v42 }
 0x43a   :  { %6905 = vmatprep.subr.mxu1 %v8112_v21 }
 0x43b   :  { %6906 = vmatpush3.msra.mxu1 %v8112_v21  ;;  %v9669_v16 = vsub.f32 1.0, %v8344_v20 }
 0x43c   :  { %6907 = vmatprep.subr.mxu1 %v8119_v22 }
 0x43d   :  { %6908 = vmatpush3.msra.mxu1 %v8119_v22  ;;  %v9670_v22 = vsub.f32 1.0, %v8340_v39 }
 0x43e   :  { %6909 = vmatprep.subr.mxu1 %v8126_v23 }
 0x43f   :  { %6910 = vmatpush3.msra.mxu1 %v8126_v23  ;;  %v8349_v23 = vmul.f32 %v8033_v43, %v8033_v43  ;;  %v8364_v43 = vmul.f32 %v8042_v44, %v8042_v44 }
 0x441   :  { %v9668_v14 = vsub.f32 1.0, %v8349_v23  ;;  %v9666_v37 = vsub.f32 1.0, %v8364_v43 }
 0x4ea   :  { %v6857_v21 = vpop.f32.mrf.mxu1 }
 0x4eb   :  { %v1249_v42 = vmul.f32 %v6857_v21, %v9669_v16  ;;  %v6050_v16 = vld [vmem:[%s9635_s4 + $0x1] ss:$0 sm:$0xff] }
 0x4ec   :  { %v1209_v18 = vpop.f32.mrf.mxu1 }
 0x4ed   :  { %v1248_v41 = vmul.f32 %v1209_v18, %v9670_v22  ;;  %v8388_v18 = vmul.f32 %v8052_v46, %v8052_v46 }
 0x4ee   :  { %v6860_v54 = vpop.f32.mrf.mxu1 }
 0x4ef   :  { %6883 = vmatprep.mubr.msk.f32.mxu0 %vm541_vm4, %v1248_v41  ;;  %v1251_v13 = vmul.f32 %v6860_v54, %v9667_v51 }
 0x4f0   :  { %v1219_v63 = vpop.f32.mrf.mxu1  ;;  %6884 = vmatmul.mubr.msk.f32.vlgmr.msra.gmra.mxu0 %vm541_vm4, %v1249_v42 }
 0x4f1   :  { %v1250_v26 = vmul.f32 %v1219_v63, %v9668_v14  ;;  %6924 = vmatpush3.msk.msra.mxu0 %vm71_vm0, %v8334_v38  ;;  %v9663_v63 = vsub.f32 1.0, %v8388_v18 }
 0x4f2   :  { %v6863_v44 = vpop.f32.mrf.mxu1 }
 0x4f3   :  { %6886 = vmatprep.mubr.msk.f32.mxu0 %vm541_vm4, %v1250_v26  ;;  %v1253_v42 = vmul.f32 %v6863_v44, %v9665_v45  ;;  %v9711_v44 = vld [vmem:[#allocation2_spill] sm:$0xff] }
 0x4f4   :  { %v1229_v21 = vpop.f32.mrf.mxu1  ;;  %6887 = vmatmul.mubr.msk.f32.gmra.mxu0 %vm541_vm4, %v1251_v13 }
 0x4f5   :  { %v1252_v41 = vmul.f32 %v1229_v21, %v9666_v37  ;;  %v9712_v21 = vld [vmem:[#allocation3_spill] sm:$0xff] }
 0x4f6   :  { %v6866_v54 = vpop.f32.mrf.mxu1 }
 0x4f7   :  { %6889 = vmatprep.mubr.msk.f32.mxu0 %vm541_vm4, %v1252_v41  ;;  %v1255_v13 = vmul.f32 %v6866_v54, %v9663_v63  ;;  %v9713_v41 = vld [vmem:[#allocation4_spill] sm:$0xff] }
 0x4f8   :  { %v1239_v26 = vpop.f32.mrf.mxu1  ;;  %6890 = vmatmul.mubr.msk.f32.gmra.mxu0 %vm541_vm4, %v1253_v42  ;;  %v8437_v42 = vmul.f32 %v8143_v49, %v8143_v49  ;;  %v8452_v49 = vmul.f32 %v8158_v24, %v8158_v24 }
 0x4f9   :  { %v1254_v46 = vmul.f32 %v1239_v26, %v9664_v0 }
 0x4fa   :  { %v9674_v30 = vsub.f32 1.0, %v8452_v49 }
 0x4fb   :  { %6892 = vmatprep.mubr.msk.f32.mxu0 %vm541_vm4, %v1254_v46  ;;  %v8442_v46 = vmul.f32 %v8146_v6, %v8146_v6  ;;  %v8457_v6 = vld [vmem:[%s9634_s3 + $0x8] sm:$0xff] }
 0x4fc   :  { %6893 = vmatmul.mubr.msk.f32.gmra.mxu0 %vm541_vm4, %v1255_v13 }
 0x4fd   :  { %6925 = vmatprep.mubr.msk.f32.mxu0 %vm46_vm1, %v7781_v1  ;;  %v8423_v1 = vld [vmem:[%s9634_s3 + $0x10] sm:$0xff] }
 0x4fe   :  { %6937 = vmatprep.subr.mxu1 %v8423_v1 }
 0x500   :  { %6926 = vmatmul.mubr.msk.f32.vlgmr.msra.gmra.mxu0 %vm46_vm1, %v7786_v2  ;;  %v8428_v2 = vmul.f32 %v8134_v27, %v8134_v27 }
 0x501   :  { %6928 = vmatprep.mubr.msk.f32.mxu0 %vm46_vm1, %v7795_v3  ;;  %v8432_v3 = vmul.f32 %v8136_v47, %v8136_v47 }
 0x503   :  { %v9677_v54 = vsub.f32 1.0, %v8432_v3 }
 0x504   :  { %6929 = vmatmul.mubr.msk.f32.gmra.mxu0 %vm46_vm1, %v7825_v7  ;;  %v9678_v7 = vsub.f32 1.0, %v8428_v2 }
 0x505   :  { %6931 = vmatprep.mubr.msk.f32.mxu0 %vm46_vm1, %v7800_v4 }
 0x508   :  { %6932 = vmatmul.mubr.msk.f32.gmra.mxu0 %vm46_vm1, %v9711_v44  ;;  %v9676_v44 = vsub.f32 1.0, %v8437_v42 }
 0x509   :  { %6934 = vmatprep.mubr.msk.f32.mxu0 %vm46_vm1, %v9712_v21  ;;  %v9675_v21 = vsub.f32 1.0, %v8442_v46 }
 0x50c   :  { %6935 = vmatmul.mubr.msk.f32.gmra.mxu0 %vm46_vm1, %v9713_v41 }
 0x5b0   :  { %v6885_v4 = vpop.f32.mrf.mxu0 }
 0x5b1   :  { %v1386_v47 = vmul.f32 %v6885_v4, %v9677_v54  ;;  %v9714_v4 = vld [vmem:[#allocation6_spill] sm:$0xff] }
 0x5b2   :  { %v1346_v26 = vpop.f32.mrf.mxu0 }
 0x5b3   :  { %v1385_v27 = vmul.f32 %v1346_v26, %v9678_v7  ;;  %v8463_v26 = vmul.f32 %v9714_v4, %v9714_v4 }
 0x5b4   :  { %v6888_v13 = vpop.f32.mrf.mxu0 }
 0x5b5   :  { %6911 = vmatprep.mubr.msk.f32.mxu1 %vm541_vm4, %v1385_v27  ;;  %v1388_v24 = vmul.f32 %v6888_v13, %v9675_v21  ;;  %v8482_v13 = vmul.f32 %v9715_v32, %v9715_v32 }
 0x5b6   :  { %v1356_v41 = vpop.f32.mrf.mxu0  ;;  %6912 = vmatmul.mubr.msk.f32.vlgmr.msra.gmra.mxu1 %vm541_vm4, %v1386_v47  ;;  %v8475_v47 = vmul.f32 %v8175_v53, %v8175_v53 }
 0x5b7   :  { %v1387_v27 = vmul.f32 %v1356_v41, %v9676_v44  ;;  %6938 = vmatpush3.msra.mxu1 %v8423_v1  ;;  %v9673_v41 = vsub.f32 1.0, %v8463_v26  ;;  %v9671_v11 = vsub.f32 1.0, %v8482_v13 }
 0x5b8   :  { %v6891_v8 = vpop.f32.mrf.mxu0  ;;  %6939 = vmatprep.subr.mxu1 %v8457_v6  ;;  %v9672_v53 = vsub.f32 1.0, %v8475_v47 }
 0x5b9   :  { %6914 = vmatprep.mubr.msk.f32.mxu1 %vm541_vm4, %v1387_v27  ;;  %6940 = vmatpush3.msra.mxu1 %v8457_v6  ;;  %v1390_v31 = vmul.f32 %v6891_v8, %v9673_v41 }
 0x5ba   :  { %v1366_v4 = vpop.f32.mrf.mxu0  ;;  %6915 = vmatmul.mubr.msk.f32.gmra.mxu1 %vm541_vm4, %v1388_v24  ;;  %v6040_v24 = vld [vmem:[%s9635_s4] ss:$0 sm:$0xff] }
 0x5bb   :  { %v1389_v27 = vmul.f32 %v1366_v4, %v9674_v30 }
 0x5bc   :  { %v6894_v29 = vpop.f32.mrf.mxu0 }
 0x5bd   :  { %6917 = vmatprep.mubr.msk.f32.mxu1 %vm541_vm4, %v1389_v27  ;;  %v1392_v8 = vmul.f32 %v6894_v29, %v9671_v11 }
 0x5be   :  { %v1376_v25 = vpop.f32.mrf.mxu0  ;;  %6918 = vmatmul.mubr.msk.f32.gmra.mxu1 %vm541_vm4, %v1390_v31 }
 0x5bf   :  { %v1391_v32 = vmul.f32 %v1376_v25, %v9672_v53 }
 0x5c0   :  { %v6927_v4 = vpop.f32.mrf.mxu0 }
 0x5c1   :  { %6920 = vmatprep.mubr.msk.f32.mxu1 %vm541_vm4, %v1391_v32  ;;  %v1603_v27 = vadd.f32 %v6927_v4, %v6040_v24 }
 0x5c2   :  { %6921 = vmatmul.mubr.msk.f32.gmra.mxu1 %vm541_vm4, %v1392_v8  ;;  %v1597_v5 = vpop.f32.mrf.mxu0 }
 0x5c3   :  { %v1598_v58 = vadd.f32 %v6040_v24, %v1597_v5 }
 0x5c4   :  { %v6930_v60 = vpop.f32.mrf.mxu0 }
 0x5c5   :  { %7480 = vtanh.f32 %v1598_v58  ;;  %v1613_v31 = vadd.f32 %v6930_v60, %v6040_v24 }
 0x5c6   :  { %7482 = vtanh.f32 %v1603_v27  ;;  %v1607_v25 = vpop.f32.mrf.mxu0  ;;  %v8543_v27 = vld [vmem:[%s9634_s3 + $0x28] sm:$0xff] }
 0x5c7   :  { %v1608_v59 = vadd.f32 %v6040_v24, %v1607_v25  ;;  %v8557_v25 = vld [vmem:[%s9634_s3 + $0x18] sm:$0xff] }
 0x5c8   :  { %v6933_v17 = vpop.f32.mrf.mxu0 }
 0x5c9   :  { %7484 = vtanh.f32 %v1608_v59  ;;  %v1623_v15 = vadd.f32 %v6933_v17, %v6040_v24 }
 0x5ca   :  { %7486 = vtanh.f32 %v1613_v31  ;;  %v1617_v63 = vpop.f32.mrf.mxu0  ;;  %v8550_v31 = vld [vmem:[%s9634_s3 + $0x20] sm:$0xff] }
 0x5cb   :  { %v1618_v29 = vadd.f32 %v6040_v24, %v1617_v63 }
 0x5cc   :  { %v6936_v0 = vpop.f32.mrf.mxu0 }
 0x5cd   :  { %7488 = vtanh.f32 %v1618_v29  ;;  %v1633_v32 = vadd.f32 %v6936_v0, %v6040_v24 }
 0x5ce   :  { %7490 = vtanh.f32 %v1623_v15  ;;  %v1627_v4 = vpop.f32.mrf.mxu0 }
 0x5cf   :  { %v1628_v8 = vadd.f32 %v6040_v24, %v1627_v4  ;;  %v8536_v24 = vld [vmem:[%s9634_s3 + $0x30] sm:$0xff] }
 0x5d0   :  { %6953 = vmatprep.subr.mxu0 %v8536_v24 }
 0x5d1   :  { %7492 = vtanh.f32 %v1628_v8  ;;  %6954 = vmatpush3.msra.mxu0 %v8536_v24 }
 0x5d2   :  { %v8501_v5 = vpop.eup %7480  ;;  %7494 = vtanh.f32 %v1633_v32  ;;  %6955 = vmatprep.subr.mxu0 %v8543_v27 }
 0x5d3   :  { %v8503_v58 = vpop.eup %7482  ;;  %6941 = vmatprep.mubr.msk.f32.mxu1 %vm211_vm2, %v8501_v5  ;;  %6956 = vmatpush3.msra.mxu0 %v8543_v27 }
 0x5d4   :  { %6942 = vmatmul.mubr.msk.f32.vlgmr.msra.gmra.mxu1 %vm211_vm2, %v8503_v58  ;;  %6957 = vmatprep.subr.mxu0 %v8550_v31 }
 0x5d5   :  { %6958 = vmatpush3.msra.mxu0 %v8550_v31 }
 0x5d6   :  { %v8509_v17 = vpop.eup %7484  ;;  %6959 = vmatprep.subr.mxu0 %v8557_v25 }
 0x5d7   :  { %v8511_v59 = vpop.eup %7486  ;;  %6944 = vmatprep.mubr.msk.f32.mxu1 %vm211_vm2, %v8509_v17  ;;  %6960 = vmatpush3.msra.mxu0 %v8557_v25 }
 0x5d8   :  { %6945 = vmatmul.mubr.msk.f32.gmra.mxu1 %vm211_vm2, %v8511_v59 }
 0x5da   :  { %v8517_v15 = vpop.eup %7488 }
 0x5db   :  { %v8519_v60 = vpop.eup %7490  ;;  %6947 = vmatprep.mubr.msk.f32.mxu1 %vm211_vm2, %v8517_v15 }
 0x5dc   :  { %6948 = vmatmul.mubr.msk.f32.gmra.mxu1 %vm211_vm2, %v8519_v60 }
 0x5de   :  { %v8525_v0 = vpop.eup %7492 }
 0x5df   :  { %v8527_v63 = vpop.eup %7494  ;;  %6950 = vmatprep.mubr.msk.f32.mxu1 %vm211_vm2, %v8525_v0 }
 0x5e0   :  { %6951 = vmatmul.mubr.msk.f32.gmra.mxu1 %vm211_vm2, %v8527_v63 }
 0x676   :  { %v8561_v29 = vpop.f32.mrf.mxu1 }
 0x677   :  { %9716 = vst [vmem:[#allocation2_spill] sm:$0xff] %v8561_v29 }
 0x678   :  { %v8563_v32 = vpop.f32.mrf.mxu1 }
 0x679   :  { %9717 = vst [vmem:[#allocation3_spill] sm:$0xff] %v8563_v32 }
 0x67a   :  { %v8565_v4 = vpop.f32.mrf.mxu1 }
 0x67b   :  { %9718 = vst [vmem:[#allocation4_spill] sm:$0xff] %v8565_v4 }
 0x67c   :  { %v8567_v8 = vpop.f32.mrf.mxu1 }
 0x67d   :  { %9719 = vst [vmem:[#allocation6_spill] sm:$0xff] %v8567_v8 }
 0x67e   :  { %v8569_v45 = vpop.f32.mrf.mxu1 }
 0x67f   :  { %9720 = vst [vmem:[#allocation9_spill] sm:$0xff] %v8569_v45 }
 0x680   :  { %v8571_v37 = vpop.f32.mrf.mxu1 }
 0x681   :  { %9721 = vst [vmem:[#allocation20_spill] sm:$0xff] %v8571_v37 }
 0x682   :  { %v8573_v51 = vpop.f32.mrf.mxu1 }
 0x683   :  { %9722 = vst [vmem:[#allocation21_spill] sm:$0xff] %v8573_v51 }
 0x684   :  { %v8575_v14 = vpop.f32.mrf.mxu1 }
 0x685   :  { %9723 = vst [vmem:[#allocation22_spill] sm:$0xff] %v8575_v14 }
 0x694   :  { %v6943_v22 = vpop.f32.mrf.mxu1 }
 0x695   :  { %v1763_v11 = vadd.f32 %v6943_v22, %v6050_v16 }
 0x696   :  { %v1757_v53 = vpop.f32.mrf.mxu1 }
 0x697   :  { %v1758_v41 = vadd.f32 %v6050_v16, %v1757_v53 }
 0x698   :  { %v6946_v30 = vpop.f32.mrf.mxu1 }
 0x699   :  { %7496 = vtanh.f32 %v1758_v41  ;;  %v1773_v21 = vadd.f32 %v6946_v30, %v6050_v16  ;;  %v6059_v41 = vld [vmem:[%s9635_s4 + $0x2] ss:$0 sm:$0xff] }
 0x69a   :  { %7498 = vtanh.f32 %v1763_v11  ;;  %v1767_v44 = vpop.f32.mrf.mxu1 }
 0x69b   :  { %v1768_v54 = vadd.f32 %v6050_v16, %v1767_v44  ;;  %v1983_v44 = vld [vmem:[%s9634_s3 + $0x40] sm:$0xff] }
 0x69c   :  { %v6949_v7 = vpop.f32.mrf.mxu1 }
 0x69d   :  { %7500 = vtanh.f32 %v1768_v54  ;;  %v1783_v51 = vadd.f32 %v6949_v7, %v6050_v16  ;;  %v1985_v7 = vld [vmem:[%s9634_s3 + $0x50] sm:$0xff]  ;;  %v1984_v54 = vld [vmem:[%s9634_s3 + $0x48] sm:$0xff] }
 0x69e   :  { %7502 = vtanh.f32 %v1773_v21  ;;  %v1777_v45 = vpop.f32.mrf.mxu1  ;;  %6973 = vmatprep.subr.mxu1 %v1985_v7  ;;  %6993 = vmatprep.subr.msk.mxu0 %vm211_vm2, %v1985_v7  ;;  %v1982_v21 = vld [vmem:[%s9634_s3 + $0x38] sm:$0xff]  ;;  %s7720_s3 = smov 8  }
 0x69f   :  { %v1778_v14 = vadd.f32 %v6050_v16, %v1777_v45  ;;  %6974 = vmatpush3.msra.mxu1 %v1985_v7 }
 0x6a0   :  { %v6952_v37 = vpop.f32.mrf.mxu1  ;;  %6975 = vmatprep.subr.mxu1 %v1984_v54 }
 0x6a1   :  { %7504 = vtanh.f32 %v1778_v14  ;;  %v1793_v4 = vadd.f32 %v6952_v37, %v6050_v16  ;;  %6976 = vmatpush3.msra.mxu1 %v1984_v54 }
 0x6a2   :  { %7506 = vtanh.f32 %v1783_v51  ;;  %v1787_v8 = vpop.f32.mrf.mxu1  ;;  %6977 = vmatprep.subr.mxu1 %v1983_v44 }
 0x6a3   :  { %v1788_v22 = vadd.f32 %v6050_v16, %v1787_v8  ;;  %6978 = vmatpush3.msra.mxu1 %v1983_v44 }
 0x6a4   :  { %6979 = vmatprep.subr.mxu1 %v1982_v21 }
 0x6a5   :  { %7508 = vtanh.f32 %v1788_v22  ;;  %6980 = vmatpush3.msra.mxu1 %v1982_v21 }
 0x6a6   :  { %v8580_v53 = vpop.eup %7496  ;;  %7510 = vtanh.f32 %v1793_v4  ;;  %7013 = vmatprep.subr.msk.mxu1 %vm374_vm3, %v8536_v24 }
 0x6a7   :  { %v8582_v11 = vpop.eup %7498  ;;  %6961 = vmatprep.mubr.msk.f32.mxu0 %vm374_vm3, %v8580_v53 }
 0x6a8   :  { %6962 = vmatmul.mubr.msk.f32.vlgmr.msra.gmra.mxu0 %vm374_vm3, %v8582_v11 }
 0x6a9   :  { %6994 = vmatpush3.xpose.msk.msra.mxu0 %vm211_vm2, %v1985_v7 }
 0x6aa   :  { %v8588_v30 = vpop.eup %7500  ;;  %6995 = vmatprep.subr.msk.mxu0 %vm211_vm2, %v1984_v54 }
 0x6ab   :  { %v8590_v45 = vpop.eup %7502  ;;  %6964 = vmatprep.mubr.msk.f32.mxu0 %vm374_vm3, %v8588_v30 }
 0x6ac   :  { %6965 = vmatmul.mubr.msk.f32.gmra.mxu0 %vm374_vm3, %v8590_v45 }
 0x6ad   :  { %6996 = vmatpush3.xpose.msk.msra.mxu0 %vm211_vm2, %v1984_v54 }
 0x6ae   :  { %v8596_v16 = vpop.eup %7504  ;;  %6997 = vmatprep.subr.msk.mxu0 %vm211_vm2, %v1983_v44 }
 0x6af   :  { %v8598_v14 = vpop.eup %7506  ;;  %6967 = vmatprep.mubr.msk.f32.mxu0 %vm374_vm3, %v8596_v16 }
 0x6b0   :  { %6968 = vmatmul.mubr.msk.f32.gmra.mxu0 %vm374_vm3, %v8598_v14 }
 0x6b1   :  { %6998 = vmatpush3.xpose.msk.msra.mxu0 %vm211_vm2, %v1983_v44 }
 0x6b2   :  { %v8604_v51 = vpop.eup %7508  ;;  %6999 = vmatprep.subr.msk.mxu0 %vm211_vm2, %v1982_v21 }
 0x6b3   :  { %v8606_v37 = vpop.eup %7510  ;;  %6970 = vmatprep.mubr.msk.f32.mxu0 %vm374_vm3, %v8604_v51 }
 0x6b4   :  { %6971 = vmatmul.mubr.msk.f32.gmra.mxu0 %vm374_vm3, %v8606_v37 }
 0x6b5   :  { %7000 = vmatpush3.xpose.msk.msra.mxu0 %vm211_vm2, %v1982_v21 }
 0x6b6   :  { %7033 = vmatprep.subr.msk.mxu0 %vm374_vm3, %v8423_v1 }
 0x768   :  { %v6963_v4 = vpop.f32.mrf.mxu0 }
 0x769   :  { %v1925_v8 = vadd.f32 %v6963_v4, %v6059_v41 }
 0x76a   :  { %v1919_v22 = vpop.f32.mrf.mxu0 }
 0x76b   :  { %v1920_v7 = vadd.f32 %v6059_v41, %v1919_v22 }
 0x76c   :  { %v6966_v54 = vpop.f32.mrf.mxu0 }
 0x76d   :  { %7512 = vtanh.f32 %v1920_v7  ;;  %v1935_v44 = vadd.f32 %v6966_v54, %v6059_v41 }
 0x76e   :  { %7514 = vtanh.f32 %v1925_v8  ;;  %v1929_v29 = vpop.f32.mrf.mxu0 }
 0x76f   :  { %v1930_v21 = vadd.f32 %v6059_v41, %v1929_v29 }
 0x770   :  { %v6969_v32 = vpop.f32.mrf.mxu0 }
 0x771   :  { %7516 = vtanh.f32 %v1930_v21  ;;  %v1945_v33 = vadd.f32 %v6969_v32, %v6059_v41 }
 0x772   :  { %7518 = vtanh.f32 %v1935_v44  ;;  %v1939_v55 = vpop.f32.mrf.mxu0 }
 0x773   :  { %v1940_v9 = vadd.f32 %v6059_v41, %v1939_v55 }
 0x774   :  { %v6972_v50 = vpop.f32.mrf.mxu0 }
 0x775   :  { %7520 = vtanh.f32 %v1940_v9  ;;  %v1955_v56 = vadd.f32 %v6972_v50, %v6059_v41 }
 0x776   :  { %7522 = vtanh.f32 %v1945_v33  ;;  %v1949_v28 = vpop.f32.mrf.mxu0 }
 0x777   :  { %v1950_v4 = vadd.f32 %v6059_v41, %v1949_v28 }
 0x779   :  { %7524 = vtanh.f32 %v1950_v4 }
 0x77a   :  { %v8639_v22 = vpop.eup %7512  ;;  %7526 = vtanh.f32 %v1955_v56 }
 0x77b   :  { %v8641_v8 = vpop.eup %7514  ;;  %6981 = vmatprep.mubr.msk.f32.mxu1 %vm374_vm3, %v8639_v22 }
 0x77c   :  { %6982 = vmatmul.mubr.msk.f32.vlgmr.msra.gmra.mxu1 %vm374_vm3, %v8641_v8 }
 0x77d   :  { %7014 = vmatpush3.xpose.msk.msra.mxu1 %vm374_vm3, %v8536_v24  ;;  %v6068_v24 = vld [vmem:[%s9635_s4 + $0x3] ss:$0 sm:$0xff] }
 0x77e   :  { %v8649_v9 = vpop.eup %7516  ;;  %7015 = vmatprep.subr.msk.mxu1 %vm374_vm3, %v8543_v27 }
 0x77f   :  { %v8653_v50 = vpop.eup %7518  ;;  %6984 = vmatprep.mubr.msk.f32.mxu1 %vm374_vm3, %v8649_v9 }
 0x780   :  { %6985 = vmatmul.mubr.msk.f32.gmra.mxu1 %vm374_vm3, %v8653_v50 }
 0x781   :  { %7016 = vmatpush3.xpose.msk.msra.mxu1 %vm374_vm3, %v8543_v27 }
 0x782   :  { %v8661_v28 = vpop.eup %7520  ;;  %7017 = vmatprep.subr.msk.mxu1 %vm374_vm3, %v8550_v31 }
 0x783   :  { %v8665_v56 = vpop.eup %7522  ;;  %6987 = vmatprep.mubr.msk.f32.mxu1 %vm374_vm3, %v8661_v28 }
 0x784   :  { %6988 = vmatmul.mubr.msk.f32.gmra.mxu1 %vm374_vm3, %v8665_v56 }
 0x785   :  { %7018 = vmatpush3.xpose.msk.msra.mxu1 %vm374_vm3, %v8550_v31 }
 0x786   :  { %v8673_v55 = vpop.eup %7524  ;;  %7019 = vmatprep.subr.msk.mxu1 %vm374_vm3, %v8557_v25 }
 0x787   :  { %v8677_v33 = vpop.eup %7526  ;;  %6990 = vmatprep.mubr.msk.f32.mxu1 %vm374_vm3, %v8673_v55 }
 0x788   :  { %6991 = vmatmul.mubr.msk.f32.gmra.mxu1 %vm374_vm3, %v8677_v33 }
 0x789   :  { %7020 = vmatpush3.xpose.msk.msra.mxu1 %vm374_vm3, %v8557_v25 }
 0x78a   :  { %7049 = vmatprep.subr.msk.mxu1 %vm211_vm2, %v8334_v38 }
 0x83c   :  { %v6983_v27 = vpop.f32.mrf.mxu1 }
 0x83d   :  { %v2087_v31 = vadd.f32 %v6983_v27, %v6068_v24 }
 0x83e   :  { %v2081_v29 = vpop.f32.mrf.mxu1 }
 0x83f   :  { %7528 = vtanh.f32 %v2087_v31  ;;  %v2082_v32 = vadd.f32 %v6068_v24, %v2081_v29 }
 0x840   :  { %v6986_v41 = vpop.f32.mrf.mxu1 }
 0x841   :  { %7530 = vtanh.f32 %v2082_v32  ;;  %v2097_v7 = vadd.f32 %v6986_v41, %v6068_v24 }
 0x842   :  { %v2091_v54 = vpop.f32.mrf.mxu1 }
 0x843   :  { %7532 = vtanh.f32 %v2097_v7  ;;  %v2092_v44 = vadd.f32 %v6068_v24, %v2091_v54  ;;  %v6077_v54 = vld [vmem:[%s9635_s4 + $0x5] ss:$0 sm:$0xff] }
 0x844   :  { %v6989_v21 = vpop.f32.mrf.mxu1 }
 0x845   :  { %7534 = vtanh.f32 %v2092_v44  ;;  %v2107_v25 = vadd.f32 %v6989_v21, %v6068_v24 }
 0x846   :  { %v2101_v4 = vpop.f32.mrf.mxu1 }
 0x847   :  { %7536 = vtanh.f32 %v2107_v25  ;;  %v2102_v10 = vadd.f32 %v6068_v24, %v2101_v4 }
 0x848   :  { %v6992_v36 = vpop.f32.mrf.mxu1 }
 0x849   :  { %7538 = vtanh.f32 %v2102_v10  ;;  %v2117_v62 = vadd.f32 %v6992_v36, %v6068_v24 }
 0x84a   :  { %v2111_v34 = vpop.f32.mrf.mxu1 }
 0x84b   :  { %7540 = vtanh.f32 %v2117_v62  ;;  %v2112_v27 = vadd.f32 %v6068_v24, %v2111_v34 }
 0x84c   :  { %v7529_v31 = vpop.eup %7528 }
 0x84d   :  { %v2129_v29 = vmul.f32 %v7529_v31, %v7529_v31  ;;  %7542 = vtanh.f32 %v2112_v27 }
 0x84e   :  { %v7531_v32 = vpop.eup %7530 }
 0x84f   :  { %v2128_v41 = vmul.f32 %v7531_v32, %v7531_v32  ;;  %v2137_v7 = vsub.f32 1.0, %v2129_v29 }
 0x850   :  { %v7533_v48 = vpop.eup %7532 }
 0x851   :  { %v2136_v44 = vsub.f32 1.0, %v2128_v41  ;;  %v2131_v21 = vmul.f32 %v7533_v48, %v7533_v48  ;;  %v2150_v57 = vmul.f32 %v6077_v54, %v2137_v7 }
 0x852   :  { %v7535_v25 = vpop.eup %7534 }
 0x853   :  { %v2149_v4 = vmul.f32 %v6077_v54, %v2136_v44  ;;  %v2130_v10 = vmul.f32 %v7535_v25, %v7535_v25  ;;  %v2139_v62 = vsub.f32 1.0, %v2131_v21 }
 0x854   :  { %v7537_v36 = vpop.eup %7536 }
 0x855   :  { %v2138_v34 = vsub.f32 1.0, %v2130_v10  ;;  %v2133_v24 = vmul.f32 %v7537_v36, %v7537_v36  ;;  %7001 = vmatprep.mubr.msk.f32.mxu0 %vm211_vm2, %v2149_v4  ;;  %v2152_v48 = vmul.f32 %v6077_v54, %v2139_v62 }
 0x856   :  { %v7539_v27 = vpop.eup %7538  ;;  %7002 = vmatmul.mubr.msk.f32.vlgmr.msra.gmra.mxu0 %vm211_vm2, %v2150_v57 }
 0x857   :  { %v2151_v31 = vmul.f32 %v6077_v54, %v2138_v34  ;;  %v2132_v29 = vmul.f32 %v7539_v27, %v7539_v27  ;;  %7034 = vmatpush3.xpose.msk.msra.mxu0 %vm374_vm3, %v8423_v1  ;;  %v2141_v41 = vsub.f32 1.0, %v2133_v24  ;;  %v1966_v34 = vmul.f32 %v8639_v22, %v8639_v22 }
 0x858   :  { %v7541_v32 = vpop.eup %7540  ;;  %7035 = vmatprep.subr.msk.mxu0 %vm374_vm3, %v8457_v6  ;;  %v1967_v24 = vmul.f32 %v8641_v8, %v8641_v8  ;;  %v1970_v22 = vmul.f32 %v8661_v28, %v8661_v28 }
 0x859   :  { %v2140_v7 = vsub.f32 1.0, %v2132_v29  ;;  %v2135_v44 = vmul.f32 %v7541_v32, %v7541_v32  ;;  %7004 = vmatprep.mubr.msk.f32.mxu0 %vm211_vm2, %v2151_v31  ;;  %v2154_v4 = vmul.f32 %v6077_v54, %v2141_v41  ;;  %v1974_v27 = vsub.f32 1.0, %v1966_v34 }
 0x85a   :  { %v7543_v21 = vpop.eup %7542  ;;  %7005 = vmatmul.mubr.msk.f32.gmra.mxu0 %vm211_vm2, %v2152_v48  ;;  %v1968_v31 = vmul.f32 %v8649_v9, %v8649_v9  ;;  %v1975_v29 = vsub.f32 1.0, %v1967_v24  ;;  %v1971_v9 = vmul.f32 %v8665_v56, %v8665_v56 }
 0x85b   :  { %v2153_v25 = vmul.f32 %v6077_v54, %v2140_v7  ;;  %v2134_v57 = vmul.f32 %v7543_v21, %v7543_v21  ;;  %7036 = vmatpush3.xpose.msk.msra.mxu0 %vm374_vm3, %v8457_v6  ;;  %v2143_v1 = vsub.f32 1.0, %v2135_v44 }
 0x85c   :  { %v1976_v44 = vsub.f32 1.0, %v1968_v31  ;;  %v1979_v28 = vsub.f32 1.0, %v1971_v9 }
 0x85d   :  { %v2142_v10 = vsub.f32 1.0, %v2134_v57  ;;  %7007 = vmatprep.mubr.msk.f32.mxu0 %vm211_vm2, %v2153_v25  ;;  %v2156_v62 = vmul.f32 %v6077_v54, %v2143_v1  ;;  %v1972_v1 = vmul.f32 %v8673_v55, %v8673_v55  ;;  %v2729_v55 = vld [vmem:[%s9636_s5] sm:$0xff] }
 0x85e   :  { %7008 = vmatmul.mubr.msk.f32.gmra.mxu0 %vm211_vm2, %v2154_v4  ;;  %v1978_v4 = vsub.f32 1.0, %v1970_v22  ;;  %7063 = vmatprep.subr.mxu0 %v2729_v55 }
 0x85f   :  { %v2155_v36 = vmul.f32 %v6077_v54, %v2142_v10  ;;  %v1969_v54 = vmul.f32 %v8653_v50, %v8653_v50 }
 0x861   :  { %7010 = vmatprep.mubr.msk.f32.mxu0 %vm211_vm2, %v2155_v36  ;;  %v1977_v8 = vsub.f32 1.0, %v1969_v54  ;;  %v1973_v36 = vmul.f32 %v8677_v33, %v8677_v33  ;;  %v1804_v33 = vmul.f32 %v8580_v53, %v8580_v53  ;;  %v1808_v53 = vmul.f32 %v8596_v16, %v8596_v16 }
 0x862   :  { %7011 = vmatmul.mubr.msk.f32.gmra.mxu0 %vm211_vm2, %v2156_v62  ;;  %v1811_v16 = vmul.f32 %v8606_v37, %v8606_v37  ;;  %v7681_v37 = vld [vmem:[%s9632_s0 + $0x8] sm:$0xff] }
 0x863   :  { %v1981_v24 = vsub.f32 1.0, %v1973_v36  ;;  %v1812_v54 = vsub.f32 1.0, %v1804_v33  ;;  %v7685_v33 = vld [vmem:[%s9632_s0 + $0x28] sm:$0xff] }
 0x916   :  { %v7003_v6 = vpop.f32.mrf.mxu0 }
 0x917   :  { %v2299_v41 = vmul.f32 %v7003_v6, %v1975_v29  ;;  %v1805_v29 = vmul.f32 %v8582_v11, %v8582_v11 }
 0x918   :  { %v2259_v32 = vpop.f32.mrf.mxu0 }
 0x919   :  { %v2298_v48 = vmul.f32 %v2259_v32, %v1974_v27 }
 0x91a   :  { %v7006_v7 = vpop.f32.mrf.mxu0 }
 0x91b   :  { %7021 = vmatprep.mubr.msk.f32.mxu1 %vm374_vm3, %v2298_v48  ;;  %v2301_v50 = vmul.f32 %v7006_v7, %v1977_v8  ;;  %v1806_v48 = vmul.f32 %v8588_v30, %v8588_v30  ;;  %v1809_v30 = vmul.f32 %v8598_v14, %v8598_v14 }
 0x91c   :  { %v2269_v21 = vpop.f32.mrf.mxu0  ;;  %7022 = vmatmul.mubr.msk.f32.vlgmr.msra.gmra.mxu1 %vm374_vm3, %v2299_v41  ;;  %v1813_v41 = vsub.f32 1.0, %v1805_v29  ;;  %v7686_v29 = vld [vmem:[%s9632_s0 + $0x30] sm:$0xff] }
 0x91d   :  { %v2300_v25 = vmul.f32 %v2269_v21, %v1976_v44  ;;  %7050 = vmatpush3.xpose.msk.msra.mxu1 %vm211_vm2, %v8334_v38  ;;  %v1980_v38 = vsub.f32 1.0, %v1972_v1  ;;  %v1807_v44 = vmul.f32 %v8590_v45, %v8590_v45  ;;  %v1814_v9 = vsub.f32 1.0, %v1806_v48  ;;  %v8798_v48 = vpop.trf.xlu0 }
 0x91e   :  { %v7009_v57 = vpop.f32.mrf.mxu0  ;;  %v1810_v1 = vmul.f32 %v8604_v51, %v8604_v51  ;;  %v7680_v51 = vld [vmem:[%s9632_s0] sm:$0xff]  ;;  %vm3563_vm6 = vcmp.ge.f32.partialorder %v8798_v48, 0.0 }
 0x91f   :  { %7024 = vmatprep.mubr.msk.f32.mxu1 %vm374_vm3, %v2300_v25  ;;  %v2303_v62 = vmul.f32 %v7009_v57, %v1979_v28  ;;  %v1815_v11 = vsub.f32 1.0, %v1807_v44  ;;  %v1817_v28 = vsub.f32 1.0, %v1809_v30  ;;  %v3558_v30 = vmax.f32 %v8798_v48, 0.0 }
 0x920   :  { %v2279_v10 = vpop.f32.mrf.mxu0  ;;  %7025 = vmatmul.mubr.msk.f32.gmra.mxu1 %vm374_vm3, %v2301_v50 }
 0x921   :  { %v2302_v56 = vmul.f32 %v2279_v10, %v1978_v4  ;;  %v1816_v4 = vsub.f32 1.0, %v1808_v53 }
 0x922   :  { %v7012_v34 = vpop.f32.mrf.mxu0 }
 0x923   :  { %7027 = vmatprep.mubr.msk.f32.mxu1 %vm374_vm3, %v2302_v56  ;;  %v2305_v31 = vmul.f32 %v7012_v34, %v1981_v24  ;;  %v1819_v34 = vsub.f32 1.0, %v1811_v16 }
 0x924   :  { %v2289_v6 = vpop.f32.mrf.mxu0  ;;  %7028 = vmatmul.mubr.msk.f32.gmra.mxu1 %vm374_vm3, %v2303_v62  ;;  %v1818_v62 = vsub.f32 1.0, %v1810_v1 }
 0x925   :  { %v2304_v27 = vmul.f32 %v2289_v6, %v1980_v38 }
 0x927   :  { %7030 = vmatprep.mubr.msk.f32.mxu1 %vm374_vm3, %v2304_v27  ;;  %v7682_v27 = vld [vmem:[%s9632_s0 + $0x10] sm:$0xff] }
 0x928   :  { %7031 = vmatmul.mubr.msk.f32.gmra.mxu1 %vm374_vm3, %v2305_v31  ;;  %v7683_v31 = vld [vmem:[%s9632_s0 + $0x18] sm:$0xff] }
 0x9dc   :  { %v7023_v32 = vpop.f32.mrf.mxu1 }
 0x9dd   :  { %v2448_v8 = vmul.f32 %v7023_v32, %v1813_v41  ;;  %v7687_v32 = vld [vmem:[%s9632_s0 + $0x38] sm:$0xff]  ;;  %v3551_v41 = vand.u32 2147483647, %v8798_v48 }
 0x9de   :  { %v2408_v7 = vpop.f32.mrf.mxu1 }
 0x9df   :  { %v2447_v22 = vmul.f32 %v2408_v7, %v1812_v54  ;;  %v8795_v54 = vld [vmem:[%s9636_s5 + $0x20] sm:$0xff]  ;;  %v3552_v7 = vsub.f32 0.0, %v3551_v41 }
 0x9e0   :  { %v7026_v21 = vpop.f32.mrf.mxu1  ;;  %7077 = vmatprep.subr.mxu1 %v8795_v54 }
 0x9e1   :  { %7037 = vmatprep.mubr.msk.f32.mxu0 %vm374_vm3, %v2447_v22  ;;  %v2450_v57 = vmul.f32 %v7026_v21, %v1815_v11  ;;  %v3553_v44 = vmul.f32 1.442695, %v3552_v7  ;;  %v8801_v21 = vpop.trf.xlu1 }
 0x9e2   :  { %v2418_v25 = vpop.f32.mrf.mxu1  ;;  %7038 = vmatmul.mubr.msk.f32.vlgmr.msra.gmra.mxu0 %vm374_vm3, %v2448_v8  ;;  %v3588_v53 = vrot.slane %v8801_v21, 4  ;;  %v9691_v11 = vrot.slane %v8801_v21, 2 }
 0x9e3   :  { %v2449_v50 = vmul.f32 %v2418_v25, %v1814_v9  ;;  %7064 = vmatpush3.msra.mxu0 %v2729_v55  ;;  %v7684_v55 = vld [vmem:[%s9632_s0 + $0x20] sm:$0xff]  ;;  %7544 = vpow2.f32 %v3553_v44  ;;  %v3570_v9 = vrot.slane %v8801_v21, 5  ;;  %v8806_v25 = vpop.trf.xlu0 }
 0x9e4   :  { %v7029_v45 = vpop.f32.mrf.mxu1  ;;  %v3590_v1 = vmul.f32 %v3588_v53, %v8798_v48 }
 0x9e5   :  { %7040 = vmatprep.mubr.msk.f32.mxu0 %vm374_vm3, %v2449_v50  ;;  %v2452_v56 = vmul.f32 %v7029_v45, %v1817_v28  ;;  %v9692_v50 = vrot.slane %v8801_v21, 3  ;;  %v3620_v28 = vmul.f32 %v9691_v11, %v8806_v25 }
 0x9e6   :  { %v2428_v10 = vpop.f32.mrf.mxu1  ;;  %7041 = vmatmul.mubr.msk.f32.gmra.mxu0 %vm374_vm3, %v2450_v57 }
 0x9e7   :  { %v2451_v36 = vmul.f32 %v2428_v10, %v1816_v4  ;;  %v3572_v4 = vmul.f32 %v3570_v9, %v8798_v48  ;;  %v3608_v16 = vmul.f32 %v9692_v50, %v8806_v25 }
 0x9e8   :  { %v7032_v14 = vpop.f32.mrf.mxu1 }
 0x9e9   :  { %7043 = vmatprep.mubr.msk.f32.mxu0 %vm374_vm3, %v2451_v36  ;;  %v2454_v6 = vmul.f32 %v7032_v14, %v1819_v34  ;;  %v3574_v14 = vrot.slane %v3572_v4, 4  ;;  %v3622_v34 = vrot.slane %v3620_v28, 7 }
 0x9ea   :  { %v2438_v38 = vpop.f32.mrf.mxu1  ;;  %7044 = vmatmul.mubr.msk.f32.gmra.mxu0 %vm374_vm3, %v2452_v56 }
 0x9eb   :  { %v2453_v24 = vmul.f32 %v2438_v38, %v1818_v62  ;;  %v3600_v62 = vrot.slane %v3590_v1, 5 }
 0x9ed   :  { %7046 = vmatprep.mubr.msk.f32.mxu0 %vm374_vm3, %v2453_v24  ;;  %v3582_v24 = vrot.slane %v3572_v4, 5 }
 0x9ee   :  { %7047 = vmatmul.mubr.msk.f32.gmra.mxu0 %vm374_vm3, %v2454_v6  ;;  %v3610_v6 = vrot.slane %v3608_v16, 7 }
 0x9ef   :  { %7065 = vmatprep.mubr.msk.f32.mxu0 %vm2735_vm5, %v7680_v51  ;;  %v3732_v51 = vmul.f32 2.0, %v8801_v21 }
 0x9f0   :  { %v7545_v22 = vpop.eup %7544 }
 0x9f1   :  { %v3555_v8 = vadd.f32 1.0, %v7545_v22 }
 0x9f2   :  { %7066 = vmatmul.mubr.msk.f32.vlgmr.msra.gmra.mxu0 %vm2735_vm5, %v7681_v37 }
 0x9f3   :  { %7068 = vmatprep.mubr.msk.f32.mxu0 %vm2735_vm5, %v7682_v27  ;;  %7546 = vlog2.f32 %v3555_v8 }
 0x9f4   :  { %7548 = vrcp.f32 %v3555_v8 }
 0x9f6   :  { %7069 = vmatmul.mubr.msk.f32.gmra.mxu0 %vm2735_vm5, %v7683_v31  ;;  %v3592_v31 = vrot.slane %v3590_v1, 7 }
 0x9f7   :  { %7071 = vmatprep.mubr.msk.f32.mxu0 %vm2735_vm5, %v7684_v55 }
 0x9fa   :  { %7072 = vmatmul.mubr.msk.f32.gmra.mxu0 %vm2735_vm5, %v7685_v33 }
 0x9fb   :  { %7074 = vmatprep.mubr.msk.f32.mxu0 %vm2735_vm5, %v7686_v29 }
 0x9fe   :  { %7075 = vmatmul.mubr.msk.f32.gmra.mxu0 %vm2735_vm5, %v7687_v32 }
 0xa00   :  { %v7547_v57 = vpop.eup %7546 }
 0xa01   :  { %v3560_v45 = vmul.f32 0.6931472, %v7547_v57  ;;  %v7549_v36 = vpop.eup %7548 }
 0xa02   :  { %v3564_v37 = vmul.f32 %v7549_v36, %v7545_v22 }
 0xa03   :  { %v3561_v10 = vadd.f32 %v3560_v45, %v3558_v30 }
 0xa04   :  { %v8837_v41 = vsel %vm3563_vm6, %v7549_v36, %v3564_v37 }
 0xa05   :  { %v8822_v56 = vadd.f32 0.0001, %v3561_v10 }
 0xa07   :  { %v8826_v38 = vmul.f32 %v8822_v56, %v8801_v21 }
 0xa09   :  { %v3576_v27 = vadd.f32 %v3574_v14, %v8826_v38  ;;  %v3602_v55 = vadd.f32 %v3600_v62, %v8826_v38  ;;  %v8833_v33 = vadd.f32 %v3622_v34, %v8826_v38  ;;  %v3739_v22 = vmul.f32 %v3732_v51, %v8826_v38 }
 0xa0b   :  { %v3584_v29 = vadd.f32 %v3582_v24, %v3576_v27  ;;  %v8835_v32 = vadd.f32 %v3610_v6, %v3602_v55  ;;  %v3737_v7 = vmul.f32 %v3732_v51, %v8833_v33  ;;  %v3756_v45 = vrot.slane %v8833_v33, 7 }
 0xa0c   :  { %v3740_v34 = vmul.f32 %v3739_v22, %v8837_v41 }
 0xa0d   :  { %v8840_v44 = vadd.f32 %v3592_v31, %v3584_v29  ;;  %v3735_v8 = vmul.f32 %v3732_v51, %v8835_v32  ;;  %v3747_v30 = vrot.slane %v8835_v32, 7  ;;  %v3753_v57 = vrot.slane %v8835_v32, 6 }
 0xa0e   :  { %v3738_v16 = vmul.f32 %v3737_v7, %v8837_v41  ;;  %v3758_v27 = vmul.f32 %v3756_v45, %v3732_v51 }
 0xa0f   :  { %v3733_v4 = vmul.f32 %v3732_v51, %v8840_v44  ;;  %v3736_v1 = vmul.f32 %v3735_v8, %v8837_v41  ;;  %v3741_v28 = vrot.slane %v8840_v44, 7  ;;  %v3744_v10 = vrot.slane %v8840_v44, 6 }
 0xa10   :  { %v3749_v36 = vmul.f32 %v3747_v30, %v3732_v51  ;;  %v3750_v14 = vrot.slane %v8840_v44, 5  ;;  %v3755_v8 = vmul.f32 %v3753_v57, %v3732_v51  ;;  %v3775_v45 = vrot.slane %v3758_v27, 2 }
 0xa11   :  { %v3734_v62 = vmul.f32 %v3733_v4, %v8837_v41  ;;  %v3743_v24 = vmul.f32 %v3741_v28, %v3732_v51  ;;  %v3746_v6 = vmul.f32 %v3744_v10, %v3732_v51  ;;  %v1644_v57 = vmul.f32 %v8501_v5, %v8501_v5 }
 0xa12   :  { %v3752_v37 = vmul.f32 %v3750_v14, %v3732_v51  ;;  %v3766_v11 = vrot.slane %v3749_v36, 4  ;;  %v3772_v28 = vrot.slane %v3755_v8, 3  ;;  %v1648_v5 = vmul.f32 %v8517_v15, %v8517_v15 }
 0xa13   :  { %v3760_v31 = vrot.slane %v3743_v24, 5  ;;  %v3763_v55 = vrot.slane %v3746_v6, 5  ;;  %v3778_v29 = vsel %vm3777_vm7, %v3734_v62, %v3736_v1  ;;  %v1645_v1 = vmul.f32 %v8503_v58, %v8503_v58  ;;  %v2867_v58 = vld [vmem:[%s9636_s5 + $0x18] sm:$0xff] }
 0xa14   :  { %v3780_v7 = vsel %vm3779_vm8, %v3778_v29, %v3738_v16  ;;  %v3769_v30 = vrot.slane %v3752_v37, 4  ;;  %v3790_v51 = vsel %vm3777_vm7, %v3772_v28, %v3775_v45  ;;  %v1652_v36 = vsub.f32 1.0, %v1644_v57  ;;  %v2866_v29 = vld [vmem:[%s9636_s5 + $0x10] sm:$0xff] }
 0xa15   :  { %v3782_v50 = vsel %vm3781_vm9, %v3780_v7, %v3740_v34  ;;  %v1653_v62 = vsub.f32 1.0, %v1645_v1  ;;  %v1656_v7 = vsub.f32 1.0, %v1648_v5  ;;  %v6121_v1 = vld [vmem:[%s9637_s6] ss:$0 sm:$0xff] }
 0xa16   :  { %v3783_v22 = vsel %vm71_vm0, %v3782_v50, %v3760_v31  ;;  %v1646_v50 = vmul.f32 %v8509_v17, %v8509_v17 }
 0xa17   :  { %v3785_v4 = vsel %vm3784_vm10, %v3783_v22, %v3763_v55 }
 0xa18   :  { %v3787_v10 = vsel %vm3786_vm11, %v3785_v4, %v3766_v11  ;;  %v1647_v11 = vmul.f32 %v8511_v59, %v8511_v59  ;;  %v1654_v27 = vsub.f32 1.0, %v1646_v50  ;;  %v1649_v59 = vmul.f32 %v8519_v60, %v8519_v60  ;;  %v2865_v60 = vld [vmem:[%s9636_s5 + $0x8] sm:$0xff] }
 0xa19   :  { %v3789_v14 = vsel %vm3788_vm12, %v3787_v10, %v3769_v30  ;;  %v1650_v30 = vmul.f32 %v8525_v0, %v8525_v0  ;;  %v1651_v4 = vmul.f32 %v8527_v63, %v8527_v63 }
 0xa1a   :  { %3791 = vxpose.xlu0.b32.start [1/2] (short) (narrow) %v3789_v14, 64  ;;  %v1655_v31 = vsub.f32 1.0, %v1647_v11  ;;  %v1657_v22 = vsub.f32 1.0, %v1649_v59 }
 0xa1b   :  { %v1658_v0 = vsub.f32 1.0, %v1650_v30  ;;  %v1659_v14 = vsub.f32 1.0, %v1651_v4  ;;  %v3018_v4 = vld [vmem:[%s9636_s5 + $0x60] sm:$0xff] }
 0xa1c   :  { %7097 = vmatprep.subr.mxu0 %v3018_v4 }
 0xa1d   :  { %7098 = vmatpush3.msra.mxu0 %v3018_v4 }
 0xa1e   :  { %3792 = vxpose.xlu0.b32.end [2/2] (short) (narrow) %v3790_v51, 64 }
 0xaa2   :  { %v7039_v16 = vpop.f32.mrf.mxu0 }
 0xaa3   :  { %v2591_v6 = vmul.f32 %v7039_v16, %v1653_v62 }
 0xaa4   :  { %v2551_v34 = vpop.f32.mrf.mxu0 }
 0xaa5   :  { %v2590_v24 = vmul.f32 %v2551_v34, %v1652_v36 }
 0xaa6   :  { %v7042_v37 = vpop.f32.mrf.mxu0 }
 0xaa7   :  { %7051 = vmatprep.mubr.msk.f32.mxu1 %vm211_vm2, %v2590_v24  ;;  %v2593_v8 = vmul.f32 %v7042_v37, %v1655_v31 }
 0xaa8   :  { %v2561_v17 = vpop.f32.mrf.mxu0  ;;  %7052 = vmatmul.mubr.msk.f32.vlgmr.msra.gmra.mxu1 %vm211_vm2, %v2591_v6 }
 0xaa9   :  { %v2592_v55 = vmul.f32 %v2561_v17, %v1654_v27  ;;  %7078 = vmatpush3.msra.mxu1 %v8795_v54 }
 0xaaa   :  { %v7045_v15 = vpop.f32.mrf.mxu0  ;;  %7079 = vmatprep.subr.mxu1 %v2867_v58 }
 0xaab   :  { %7054 = vmatprep.mubr.msk.f32.mxu1 %vm211_vm2, %v2592_v55  ;;  %7080 = vmatpush3.msra.mxu1 %v2867_v58  ;;  %v2595_v45 = vmul.f32 %v7045_v15, %v1657_v22 }
 0xaac   :  { %v2571_v54 = vpop.f32.mrf.mxu0  ;;  %7055 = vmatmul.mubr.msk.f32.gmra.mxu1 %vm211_vm2, %v2593_v8  ;;  %7081 = vmatprep.subr.mxu1 %v2866_v29 }
 0xaad   :  { %v2594_v28 = vmul.f32 %v2571_v54, %v1656_v7  ;;  %7082 = vmatpush3.msra.mxu1 %v2866_v29 }
 0xaae   :  { %v7048_v10 = vpop.f32.mrf.mxu0  ;;  %7083 = vmatprep.subr.mxu1 %v2865_v60 }
 0xaaf   :  { %7057 = vmatprep.mubr.msk.f32.mxu1 %vm211_vm2, %v2594_v28  ;;  %7084 = vmatpush3.msra.mxu1 %v2865_v60  ;;  %v2597_v63 = vmul.f32 %v7048_v10, %v1659_v14  ;;  %v3017_v28 = vld [vmem:[%s9636_s5 + $0x58] sm:$0xff]  ;;  %v3015_v10 = vld [vmem:[%s9636_s5 + $0x48] sm:$0xff] }
 0xab0   :  { %v2581_v51 = vpop.f32.mrf.mxu0  ;;  %7058 = vmatmul.mubr.msk.f32.gmra.mxu1 %vm211_vm2, %v2595_v45  ;;  %7099 = vmatprep.subr.mxu0 %v3017_v28  ;;  %v3016_v45 = vld [vmem:[%s9636_s5 + $0x50] sm:$0xff]  ;;  %v3013_v14 = vld [vmem:[%s9636_s5 + $0x38] sm:$0xff] }
 0xab1   :  { %v2596_v57 = vmul.f32 %v2581_v51, %v1658_v0  ;;  %7100 = vmatpush3.msra.mxu0 %v3017_v28  ;;  %v3014_v0 = vld [vmem:[%s9636_s5 + $0x40] sm:$0xff]  ;;  %v3012_v51 = vld [vmem:[%s9636_s5 + $0x30] sm:$0xff] }
 0xab2   :  { %v7067_v16 = vpop.f32.mrf.mxu0  ;;  %7101 = vmatprep.subr.mxu0 %v3016_v45 }
 0xab3   :  { %7060 = vmatprep.mubr.msk.f32.mxu1 %vm211_vm2, %v2596_v57  ;;  %v2824_v36 = vadd.f32 %v7067_v16, %v6121_v1  ;;  %7102 = vmatpush3.msra.mxu0 %v3016_v45  ;;  %v3011_v57 = vld [vmem:[%s9636_s5 + $0x28] sm:$0xff] }
 0xab4   :  { %7061 = vmatmul.mubr.msk.f32.gmra.mxu1 %vm211_vm2, %v2597_v63  ;;  %v2818_v50 = vpop.f32.mrf.mxu0  ;;  %7103 = vmatprep.subr.mxu0 %v3015_v10 }
 0xab5   :  { %v2819_v62 = vadd.f32 %v6121_v1, %v2818_v50  ;;  %7104 = vmatpush3.msra.mxu0 %v3015_v10 }
 0xab6   :  { %v7070_v34 = vpop.f32.mrf.mxu0  ;;  %7105 = vmatprep.subr.mxu0 %v3014_v0 }
 0xab7   :  { %7550 = vtanh.f32 %v2819_v62  ;;  %v2834_v11 = vadd.f32 %v7070_v34, %v6121_v1  ;;  %7106 = vmatpush3.msra.mxu0 %v3014_v0 }
 0xab8   :  { %7552 = vtanh.f32 %v2824_v36  ;;  %v2828_v24 = vpop.f32.mrf.mxu0  ;;  %7107 = vmatprep.subr.mxu0 %v3013_v14 }
 0xab9   :  { %v2829_v6 = vadd.f32 %v6121_v1, %v2828_v24  ;;  %7554 = vtanh.f32 %v2834_v11  ;;  %7108 = vmatpush3.msra.mxu0 %v3013_v14  ;;  %v6130_v24 = vld [vmem:[%s9637_s6 + $0x1] ss:$0 sm:$0xff] }
 0xaba   :  { %v7073_v37 = vpop.f32.mrf.mxu0  ;;  %7109 = vmatprep.subr.mxu0 %v3012_v51 }
 0xabb   :  { %7556 = vtanh.f32 %v2829_v6  ;;  %v2844_v27 = vadd.f32 %v7073_v37, %v6121_v1  ;;  %7110 = vmatpush3.msra.mxu0 %v3012_v51 }
 0xabc   :  { %v2838_v5 = vpop.f32.mrf.mxu0  ;;  %7111 = vmatprep.subr.mxu0 %v3011_v57 }
 0xabd   :  { %v2839_v58 = vadd.f32 %v6121_v1, %v2838_v5  ;;  %7558 = vtanh.f32 %v2844_v27  ;;  %7112 = vmatpush3.msra.mxu0 %v3011_v57  ;;  %v3168_v57 = vld [vmem:[%s9636_s5 + $0xa0] sm:$0xff] }
 0xabe   :  { %v7076_v31 = vpop.f32.mrf.mxu0  ;;  %7125 = vmatprep.subr.mxu1 %v3168_v57 }
 0xabf   :  { %7560 = vtanh.f32 %v2839_v58  ;;  %v2854_v17 = vadd.f32 %v7076_v31, %v6121_v1 }
 0xac0   :  { %v2848_v59 = vpop.f32.mrf.mxu0 }
 0xac1   :  { %v2849_v55 = vadd.f32 %v6121_v1, %v2848_v59  ;;  %7562 = vtanh.f32 %v2854_v17 }
 0xac3   :  { %7564 = vtanh.f32 %v2849_v55 }
 0xac4   :  { %v7551_v29 = vpop.eup %7550 }
 0xac5   :  { %v7553_v8 = vpop.eup %7552  ;;  %7085 = vmatprep.mubr.msk.f32.mxu1 %vm374_vm3, %v7551_v29 }
 0xac6   :  { %7086 = vmatmul.mubr.msk.f32.vlgmr.msra.gmra.mxu1 %vm374_vm3, %v7553_v8  ;;  %v7555_v15 = vpop.eup %7554 }
 0xac7   :  { %7126 = vmatpush3.msra.mxu1 %v3168_v57 }
 0xac8   :  { %v7557_v7 = vpop.eup %7556 }
 0xac9   :  { %7088 = vmatprep.mubr.msk.f32.mxu1 %vm374_vm3, %v7557_v7 }
 0xaca   :  { %7089 = vmatmul.mubr.msk.f32.gmra.mxu1 %vm374_vm3, %v7555_v15  ;;  %v7559_v30 = vpop.eup %7558 }
 0xacc   :  { %v7561_v60 = vpop.eup %7560 }
 0xacd   :  { %7091 = vmatprep.mubr.msk.f32.mxu1 %vm374_vm3, %v7561_v60 }
 0xace   :  { %7092 = vmatmul.mubr.msk.f32.gmra.mxu1 %vm374_vm3, %v7559_v30  ;;  %v7563_v22 = vpop.eup %7562 }
 0xad0   :  { %v7565_v54 = vpop.eup %7564 }
 0xad1   :  { %7094 = vmatprep.mubr.msk.f32.mxu1 %vm374_vm3, %v7565_v54 }
 0xad2   :  { %7095 = vmatmul.mubr.msk.f32.gmra.mxu1 %vm374_vm3, %v7563_v22 }
 0xb68   :  { %v7053_v1 = vpop.f32.mrf.mxu1 }
 0xb69   :  { %4619 = vrot.lane.b32.xlu1 %v7053_v1, %s7720_s3  ;;  %v3167_v1 = vld [vmem:[%s9636_s5 + $0x98] sm:$0xff] }
 0xb6a   :  { %v2690_v63 = vpop.f32.mrf.mxu1  ;;  %7127 = vmatprep.subr.mxu1 %v3167_v1 }
 0xb6b   :  { %7128 = vmatpush3.msra.mxu1 %v3167_v1  ;;  %v7690_v1 = vld [vmem:[%s9631_s1 + $0xa0] sm:$0xff] }
 0xb6c   :  { %v7056_v16 = vpop.f32.mrf.mxu1 }
 0xb6d   :  { %4617 = vrot.lane.b32.xlu1 %v2690_v63, %s7720_s3  ;;  %4623 = vrot.lane.b32.xlu0 %v7056_v16, %s7720_s3  ;;  %v3166_v63 = vld [vmem:[%s9636_s5 + $0x90] sm:$0xff]  ;;  %v3165_v16 = vld [vmem:[%s9636_s5 + $0x88] sm:$0xff] }
 0xb6e   :  { %v2700_v36 = vpop.f32.mrf.mxu1  ;;  %7129 = vmatprep.subr.mxu1 %v3166_v63 }
 0xb6f   :  { %7130 = vmatpush3.msra.mxu1 %v3166_v63 }
 0xb70   :  { %v7059_v50 = vpop.f32.mrf.mxu1  ;;  %7131 = vmatprep.subr.mxu1 %v3165_v16 }
 0xb71   :  { %4621 = vrot.lane.b32.xlu1 %v2700_v36, %s7720_s3  ;;  %4627 = vrot.lane.b32.xlu0 %v7059_v50, %s7720_s3  ;;  %v3164_v36 = vld [vmem:[%s9636_s5 + $0x80] sm:$0xff]  ;;  %v3163_v50 = vld [vmem:[%s9636_s5 + $0x78] sm:$0xff] }
 0xb72   :  { %v2710_v62 = vpop.f32.mrf.mxu1  ;;  %7132 = vmatpush3.msra.mxu1 %v3165_v16 }
 0xb73   :  { %7133 = vmatprep.subr.mxu1 %v3164_v36 }
 0xb74   :  { %v8935_v34 = vpop.f32.mrf.mxu1  ;;  %7134 = vmatpush3.msra.mxu1 %v3164_v36 }
 0xb75   :  { %4625 = vrot.lane.b32.xlu1 %v2710_v62, %s7720_s3  ;;  %7135 = vmatprep.subr.mxu1 %v3163_v50  ;;  %v3162_v62 = vld [vmem:[%s9636_s5 + $0x70] sm:$0xff] }
 0xb76   :  { %v2720_v11 = vpop.f32.mrf.mxu1  ;;  %7136 = vmatpush3.msra.mxu1 %v3163_v50  ;;  %v7691_v50 = vld [vmem:[%s9631_s1 + $0x98] sm:$0xff] }
 0xb77   :  { %7137 = vmatprep.subr.mxu1 %v3162_v62 }
 0xb78   :  { %7138 = vmatpush3.msra.mxu1 %v3162_v62 }
 0xb79   :  { %4629 = vrot.lane.b32.xlu1 %v2720_v11, %s7720_s3  ;;  %v3161_v11 = vld [vmem:[%s9636_s5 + $0x68] sm:$0xff] }
 0xb7a   :  { %7139 = vmatprep.subr.mxu1 %v3161_v11 }
 0xb7b   :  { %7140 = vmatpush3.msra.mxu1 %v3161_v11  ;;  %v7692_v11 = vld [vmem:[%s9631_s1 + $0x90] sm:$0xff] }
 0xb86   :  { %v7087_v6 = vpop.f32.mrf.mxu1 }
 0xb87   :  { %v2970_v37 = vadd.f32 %v7087_v6, %v6130_v24  ;;  %v6139_v6 = vld [vmem:[%s9637_s6 + $0x2] ss:$0 sm:$0xff] }
 0xb88   :  { %v2964_v27 = vpop.f32.mrf.mxu1 }
 0xb89   :  { %v2965_v5 = vadd.f32 %v6130_v24, %v2964_v27 }
 0xb8a   :  { %v7090_v58 = vpop.f32.mrf.mxu1 }
 0xb8b   :  { %7566 = vtanh.f32 %v2965_v5  ;;  %v2980_v31 = vadd.f32 %v7090_v58, %v6130_v24 }
 0xb8c   :  { %7568 = vtanh.f32 %v2970_v37  ;;  %v2974_v17 = vpop.f32.mrf.mxu1 }
 0xb8d   :  { %v2975_v59 = vadd.f32 %v6130_v24, %v2974_v17  ;;  %7570 = vtanh.f32 %v2980_v31 }
 0xb8e   :  { %v7093_v55 = vpop.f32.mrf.mxu1 }
 0xb8f   :  { %7572 = vtanh.f32 %v2975_v59  ;;  %v2990_v29 = vadd.f32 %v7093_v55, %v6130_v24 }
 0xb90   :  { %v2984_v8 = vpop.f32.mrf.mxu1 }
 0xb91   :  { %v2985_v15 = vadd.f32 %v6130_v24, %v2984_v8  ;;  %7574 = vtanh.f32 %v2990_v29 }
 0xb92   :  { %v7096_v7 = vpop.f32.mrf.mxu1 }
 0xb93   :  { %7576 = vtanh.f32 %v2985_v15  ;;  %v3000_v30 = vadd.f32 %v7096_v7, %v6130_v24 }
 0xb94   :  { %v2994_v60 = vpop.f32.mrf.mxu1 }
 0xb95   :  { %v2995_v22 = vadd.f32 %v6130_v24, %v2994_v60  ;;  %7578 = vtanh.f32 %v3000_v30  ;;  %v7688_v24 = vld [vmem:[%s9631_s1 + $0xb0] sm:$0xff] }
 0xb96   :  { %7169 = vmatprep.subr.msk.mxu1 %vm3823_vm13, %v7688_v24 }
 0xb97   :  { %7580 = vtanh.f32 %v2995_v22 }
 0xb98   :  { %v7567_v54 = vpop.eup %7566 }
 0xb99   :  { %v7569_v4 = vpop.eup %7568  ;;  %7113 = vmatprep.mubr.msk.f32.mxu0 %vm541_vm4, %v7567_v54 }
 0xb9a   :  { %7114 = vmatmul.mubr.msk.f32.vlgmr.msra.gmra.mxu0 %vm541_vm4, %v7569_v4  ;;  %v7571_v28 = vpop.eup %7570 }
 0xb9c   :  { %v7573_v45 = vpop.eup %7572 }
 0xb9d   :  { %7116 = vmatprep.mubr.msk.f32.mxu0 %vm541_vm4, %v7573_v45 }
 0xb9e   :  { %7117 = vmatmul.mubr.msk.f32.gmra.mxu0 %vm541_vm4, %v7571_v28  ;;  %v7575_v10 = vpop.eup %7574 }
 0xba0   :  { %v7577_v0 = vpop.eup %7576 }
 0xba1   :  { %7119 = vmatprep.mubr.msk.f32.mxu0 %vm541_vm4, %v7577_v0 }
 0xba2   :  { %7120 = vmatmul.mubr.msk.f32.gmra.mxu0 %vm541_vm4, %v7575_v10  ;;  %v7579_v14 = vpop.eup %7578  ;;  %v3807_v10 = vpop.trf.xlu0 }
 0xba4   :  { %v7581_v51 = vpop.eup %7580 }
 0xba5   :  { %7122 = vmatprep.mubr.msk.f32.mxu0 %vm541_vm4, %v7581_v51 }
 0xba6   :  { %7123 = vmatmul.mubr.msk.f32.gmra.mxu0 %vm541_vm4, %v7579_v14  ;;  %v7689_v14 = vld [vmem:[%s9631_s1 + $0xa8] sm:$0xff]  ;;  %v3808_v63 = vpop.trf.xlu0 }
 0xbaa   :  { %v3809_v62 = vpop.trf.xlu0 }
 0xc5a   :  { %v7115_v37 = vpop.f32.mrf.mxu0 }
 0xc5b   :  { %v3120_v27 = vadd.f32 %v7115_v37, %v6139_v6  ;;  %v7694_v37 = vld [vmem:[%s9631_s1 + $0x80] sm:$0xff] }
 0xc5c   :  { %v3114_v5 = vpop.f32.mrf.mxu0 }
 0xc5d   :  { %v3115_v58 = vadd.f32 %v6139_v6, %v3114_v5  ;;  %v7695_v5 = vld [vmem:[%s9631_s1 + $0x78] sm:$0xff] }
 0xc5e   :  { %v7118_v31 = vpop.f32.mrf.mxu0 }
 0xc5f   :  { %7582 = vtanh.f32 %v3115_v58  ;;  %v3130_v17 = vadd.f32 %v7118_v31, %v6139_v6  ;;  %v7696_v58 = vld [vmem:[%s9631_s1 + $0x30] sm:$0xff] }
 0xc60   :  { %7584 = vtanh.f32 %v3120_v27  ;;  %v3124_v59 = vpop.f32.mrf.mxu0 }
 0xc61   :  { %v3125_v55 = vadd.f32 %v6139_v6, %v3124_v59  ;;  %7586 = vtanh.f32 %v3130_v17  ;;  %v7697_v17 = vld [vmem:[%s9631_s1 + $0x28] sm:$0xff] }
 0xc62   :  { %v7121_v29 = vpop.f32.mrf.mxu0 }
 0xc63   :  { %7588 = vtanh.f32 %v3125_v55  ;;  %v3140_v8 = vadd.f32 %v7121_v29, %v6139_v6  ;;  %v7698_v55 = vld [vmem:[%s9631_s1 + $0x20] sm:$0xff]  ;;  %v7699_v29 = vld [vmem:[%s9631_s1 + $0x18] sm:$0xff] }
 0xc64   :  { %v3134_v15 = vpop.f32.mrf.mxu0 }
 0xc65   :  { %v3135_v7 = vadd.f32 %v6139_v6, %v3134_v15  ;;  %7590 = vtanh.f32 %v3140_v8  ;;  %v9056_v15 = vld [vmem:[%s9631_s1] sm:$0xf] }
 0xc66   :  { %v7124_v30 = vpop.f32.mrf.mxu0 }
 0xc67   :  { %7592 = vtanh.f32 %v3135_v7  ;;  %v3150_v60 = vadd.f32 %v7124_v30, %v6139_v6  ;;  %v3312_v7 = vld [vmem:[%s9636_s5 + $0xb0] sm:$0xff]  ;;  %v3311_v30 = vld [vmem:[%s9636_s5 + $0xa8] sm:$0xff] }
 0xc68   :  { %v3144_v22 = vpop.f32.mrf.mxu0  ;;  %7153 = vmatprep.subr.mxu0 %v3312_v7 }
 0xc69   :  { %v3145_v54 = vadd.f32 %v6139_v6, %v3144_v22  ;;  %7594 = vtanh.f32 %v3150_v60  ;;  %v3810_v6 = vpop.trf.xlu0  ;;  %7154 = vmatpush3.msra.mxu0 %v3312_v7  ;;  %v7701_v60 = vld [vmem:[%s9631_s1 + $0x70] sm:$0xff]  ;;  %v6148_v22 = vld [vmem:[%s9637_s6 + $0x3] ss:$0 sm:$0xff] }
 0xc6a   :  { %7155 = vmatprep.subr.mxu0 %v3311_v30 }
 0xc6b   :  { %7596 = vtanh.f32 %v3145_v54  ;;  %7156 = vmatpush3.msra.mxu0 %v3311_v30  ;;  %v7705_v30 = vld [vmem:[%s9631_s1 + $0x50] sm:$0xff] }
 0xc6c   :  { %v7583_v4 = vpop.eup %7582  ;;  %7197 = vmatprep.subr.msk.mxu0 %vm541_vm4, %v7701_v60 }
 0xc6d   :  { %v7585_v28 = vpop.eup %7584  ;;  %7141 = vmatprep.mubr.msk.f32.mxu1 %vm541_vm4, %v7583_v4  ;;  %v3811_v27 = vpop.trf.xlu0 }
 0xc6e   :  { %7142 = vmatmul.mubr.msk.f32.vlgmr.msra.gmra.mxu1 %vm541_vm4, %v7585_v28  ;;  %v7587_v45 = vpop.eup %7586 }
 0xc6f   :  { %7170 = vmatpush3.xpose.msk.msra.mxu1 %vm3823_vm13, %v7688_v24  ;;  %v7693_v24 = vld [vmem:[%s9631_s1 + $0x88] sm:$0xff] }
 0xc70   :  { %v7589_v0 = vpop.eup %7588  ;;  %7171 = vmatprep.subr.msk.mxu1 %vm3823_vm13, %v7689_v14 }
 0xc71   :  { %7144 = vmatprep.mubr.msk.f32.mxu1 %vm541_vm4, %v7589_v0  ;;  %v3812_v31 = vpop.trf.xlu0 }
 0xc72   :  { %7145 = vmatmul.mubr.msk.f32.gmra.mxu1 %vm541_vm4, %v7587_v45  ;;  %v7591_v51 = vpop.eup %7590 }
 0xc73   :  { %7172 = vmatpush3.xpose.msk.msra.mxu1 %vm3823_vm13, %v7689_v14 }
 0xc74   :  { %v7593_v57 = vpop.eup %7592  ;;  %7173 = vmatprep.subr.msk.mxu1 %vm3823_vm13, %v7690_v1 }
 0xc75   :  { %7147 = vmatprep.mubr.msk.f32.mxu1 %vm541_vm4, %v7593_v57  ;;  %v3813_v59 = vpop.trf.xlu0 }
 0xc76   :  { %7148 = vmatmul.mubr.msk.f32.gmra.mxu1 %vm541_vm4, %v7591_v51  ;;  %v7595_v16 = vpop.eup %7594 }
 0xc77   :  { %7174 = vmatpush3.xpose.msk.msra.mxu1 %vm3823_vm13, %v7690_v1 }
 0xc78   :  { %v7597_v36 = vpop.eup %7596  ;;  %7175 = vmatprep.subr.msk.mxu1 %vm3823_vm13, %v7691_v50 }
 0xc79   :  { %7150 = vmatprep.mubr.msk.f32.mxu1 %vm541_vm4, %v7597_v36  ;;  %v3814_v8 = vpop.trf.xlu0 }
 0xc7a   :  { %7151 = vmatmul.mubr.msk.f32.gmra.mxu1 %vm541_vm4, %v7595_v16 }
 0xc7b   :  { %7176 = vmatpush3.xpose.msk.msra.mxu1 %vm3823_vm13, %v7691_v50  ;;  %7185 = vmatprep.mubr.msk.f32.mxu1 %vm3823_vm13, %v3807_v10 }
 0xc7c   :  { %7177 = vmatprep.subr.msk.mxu1 %vm3823_vm13, %v7692_v11 }
 0xc7f   :  { %7178 = vmatpush3.xpose.msk.msra.mxu1 %vm3823_vm13, %v7692_v11 }
 0xc80   :  { %7179 = vmatprep.subr.msk.mxu1 %vm3823_vm13, %v7693_v24 }
 0xc83   :  { %7180 = vmatpush3.xpose.msk.msra.mxu1 %vm3823_vm13, %v7693_v24 }
 0xc84   :  { %7181 = vmatprep.subr.msk.mxu1 %vm3823_vm13, %v7694_v37 }
 0xc87   :  { %7182 = vmatpush3.xpose.msk.msra.mxu1 %vm3823_vm13, %v7694_v37 }
 0xc88   :  { %7183 = vmatprep.subr.msk.mxu1 %vm3823_vm13, %v7695_v5 }
 0xc8b   :  { %7184 = vmatpush3.xpose.msk.msra.mxu1 %vm3823_vm13, %v7695_v5  ;;  %v7702_v5 = vld [vmem:[%s9631_s1 + $0x68] sm:$0xff] }
 0xc8c   :  { %7225 = vmatprep.subr.msk.mxu1 %vm541_vm4, %v7696_v58 }
 0xc8e   :  { %7186 = vmatmul.mubr.msk.f32.vlgmr.msra.gmra.mxu1 %vm3823_vm13, %v3808_v63 }
 0xc8f   :  { %7188 = vmatprep.mubr.msk.f32.mxu1 %vm3823_vm13, %v3809_v62  ;;  %7226 = vmatpush3.xpose.msk.msra.mxu1 %vm541_vm4, %v7696_v58 }
 0xc90   :  { %7227 = vmatprep.subr.msk.mxu1 %vm541_vm4, %v7697_v17 }
 0xc92   :  { %7189 = vmatmul.mubr.msk.f32.gmra.mxu1 %vm3823_vm13, %v3810_v6 }
 0xc93   :  { %7191 = vmatprep.mubr.msk.f32.mxu1 %vm3823_vm13, %v3811_v27  ;;  %7228 = vmatpush3.xpose.msk.msra.mxu1 %vm541_vm4, %v7697_v17  ;;  %v7703_v17 = vld [vmem:[%s9631_s1 + $0x60] sm:$0xff] }
 0xc94   :  { %7229 = vmatprep.subr.msk.mxu1 %vm541_vm4, %v7698_v55 }
 0xc96   :  { %7192 = vmatmul.mubr.msk.f32.gmra.mxu1 %vm3823_vm13, %v3812_v31 }
 0xc97   :  { %7194 = vmatprep.mubr.msk.f32.mxu1 %vm3823_vm13, %v3813_v59  ;;  %7230 = vmatpush3.xpose.msk.msra.mxu1 %vm541_vm4, %v7698_v55 }
 0xc98   :  { %7231 = vmatprep.subr.msk.mxu1 %vm541_vm4, %v7699_v29 }
 0xc9a   :  { %7195 = vmatmul.mubr.msk.f32.gmra.mxu1 %vm3823_vm13, %v3814_v8 }
 0xc9b   :  { %7232 = vmatpush3.xpose.msk.msra.mxu1 %vm541_vm4, %v7699_v29  ;;  %v7704_v29 = vld [vmem:[%s9631_s1 + $0x58] sm:$0xff] }
 0xc9c   :  { %7261 = vmatprep.subr.msk.mxu1 %vm211_vm2, %v9056_v15 }
 0xd2e   :  { %v7143_v54 = vpop.f32.mrf.mxu1 }
 0xd2f   :  { %v3270_v4 = vadd.f32 %v7143_v54, %v6148_v22 }
 0xd30   :  { %v3264_v28 = vpop.f32.mrf.mxu1 }
 0xd31   :  { %v3265_v45 = vadd.f32 %v6148_v22, %v3264_v28 }
 0xd32   :  { %v7146_v10 = vpop.f32.mrf.mxu1 }
 0xd33   :  { %7598 = vtanh.f32 %v3265_v45  ;;  %v3280_v0 = vadd.f32 %v7146_v10, %v6148_v22  ;;  %v7707_v45 = vld [vmem:[%s9631_s1 + $0x40] sm:$0xff]  ;;  %v7708_v10 = vld [vmem:[%s9631_s1 + $0x38] sm:$0xff] }
 0xd34   :  { %7600 = vtanh.f32 %v3270_v4  ;;  %v3274_v14 = vpop.f32.mrf.mxu1  ;;  %v7706_v4 = vld [vmem:[%s9631_s1 + $0x48] sm:$0xff] }
 0xd35   :  { %v3275_v51 = vadd.f32 %v6148_v22, %v3274_v14  ;;  %7602 = vtanh.f32 %v3280_v0  ;;  %v9725_v14 = vsub.f32 1.0, %v8432_v3 }
 0xd36   :  { %v7149_v57 = vpop.f32.mrf.mxu1 }
 0xd37   :  { %7604 = vtanh.f32 %v3275_v51  ;;  %v3290_v1 = vadd.f32 %v7149_v57, %v6148_v22  ;;  %v7709_v57 = vld [vmem:[%s9631_s1 + $0x10] sm:$0xff] }
 0xd38   :  { %v3284_v63 = vpop.f32.mrf.mxu1 }
 0xd39   :  { %v3285_v16 = vadd.f32 %v6148_v22, %v3284_v63  ;;  %7606 = vtanh.f32 %v3290_v1  ;;  %v9726_v1 = vsub.f32 1.0, %v8437_v42 }
 0xd3a   :  { %v7152_v36 = vpop.f32.mrf.mxu1 }
 0xd3b   :  { %7608 = vtanh.f32 %v3285_v16  ;;  %v3300_v50 = vadd.f32 %v7152_v36, %v6148_v22  ;;  %v9727_v36 = vsub.f32 1.0, %v8442_v46 }
 0xd3c   :  { %v3294_v62 = vpop.f32.mrf.mxu1 }
 0xd3d   :  { %v3295_v11 = vadd.f32 %v6148_v22, %v3294_v62  ;;  %7610 = vtanh.f32 %v3300_v50  ;;  %v7710_v50 = vld [vmem:[%s9631_s1 + $0x8] sm:$0xff]  ;;  %v9728_v62 = vsub.f32 1.0, %v8452_v49  ;;  %v9731_v49 = vsub.f32 1.0, %v8482_v13 }
 0xd3f   :  { %7612 = vtanh.f32 %v3295_v11 }
 0xd40   :  { %v7599_v24 = vpop.eup %7598  ;;  %7614 = vrcp.f32 %v8822_v56 }
 0xd41   :  { %v7601_v6 = vpop.eup %7600  ;;  %7157 = vmatprep.mubr.msk.f32.mxu0 %vm211_vm2, %v7599_v24  ;;  %v9729_v24 = vsub.f32 1.0, %v8463_v26 }
 0xd42   :  { %7158 = vmatmul.mubr.msk.f32.vlgmr.msra.gmra.mxu0 %vm211_vm2, %v7601_v6  ;;  %v7603_v37 = vpop.eup %7602  ;;  %v9730_v6 = vsub.f32 1.0, %v8475_v47 }
 0xd43   :  { %7198 = vmatpush3.xpose.msk.msra.mxu0 %vm541_vm4, %v7701_v60  ;;  %v9724_v60 = vsub.f32 1.0, %v8428_v2 }
 0xd44   :  { %v7605_v27 = vpop.eup %7604  ;;  %7199 = vmatprep.subr.msk.mxu0 %vm541_vm4, %v7702_v5 }
 0xd45   :  { %7160 = vmatprep.mubr.msk.f32.mxu0 %vm211_vm2, %v7605_v27 }
 0xd46   :  { %7161 = vmatmul.mubr.msk.f32.gmra.mxu0 %vm211_vm2, %v7603_v37  ;;  %v7607_v58 = vpop.eup %7606 }
 0xd47   :  { %7200 = vmatpush3.xpose.msk.msra.mxu0 %vm541_vm4, %v7702_v5  ;;  %v6157_v5 = vld [vmem:[%s9637_s6 + $0x4] ss:$0 sm:$0xff] }
 0xd48   :  { %v7609_v31 = vpop.eup %7608  ;;  %7201 = vmatprep.subr.msk.mxu0 %vm541_vm4, %v7703_v17 }
 0xd49   :  { %7163 = vmatprep.mubr.msk.f32.mxu0 %vm211_vm2, %v7609_v31 }
 0xd4a   :  { %7164 = vmatmul.mubr.msk.f32.gmra.mxu0 %vm211_vm2, %v7607_v58  ;;  %v7611_v59 = vpop.eup %7610 }
 0xd4b   :  { %7202 = vmatpush3.xpose.msk.msra.mxu0 %vm541_vm4, %v7703_v17 }
 0xd4c   :  { %v7613_v55 = vpop.eup %7612  ;;  %7203 = vmatprep.subr.msk.mxu0 %vm541_vm4, %v7704_v29 }
 0xd4d   :  { %7166 = vmatprep.mubr.msk.f32.mxu0 %vm211_vm2, %v7613_v55 }
 0xd4e   :  { %v7187_v8 = vpop.f32.mrf.mxu1  ;;  %7167 = vmatmul.mubr.msk.f32.gmra.mxu0 %vm211_vm2, %v7611_v59 }
 0xd4f   :  { %7204 = vmatpush3.xpose.msk.msra.mxu0 %vm541_vm4, %v7704_v29  ;;  %v3978_v51 = vmul.f32 %v7187_v8, %v9725_v14 }
 0xd50   :  { %v3938_v7 = vpop.f32.mrf.mxu1  ;;  %7205 = vmatprep.subr.msk.mxu0 %vm541_vm4, %v7705_v30 }
 0xd51   :  { %v3977_v22 = vmul.f32 %v3938_v7, %v9724_v60 }
 0xd52   :  { %v7190_v54 = vpop.f32.mrf.mxu1 }
 0xd53   :  { %7206 = vmatpush3.xpose.msk.msra.mxu0 %vm541_vm4, %v7705_v30  ;;  %7213 = vmatprep.mubr.msk.f32.mxu0 %vm541_vm4, %v3977_v22  ;;  %v3980_v3 = vmul.f32 %v7190_v54, %v9727_v36 }
 0xd54   :  { %7207 = vmatprep.subr.msk.mxu0 %vm541_vm4, %v7706_v4  ;;  %v3948_v28 = vpop.f32.mrf.mxu1 }
 0xd55   :  { %v3979_v63 = vmul.f32 %v3948_v28, %v9726_v1  ;;  %v9734_v1 = vsub.f32 1.0, %v8349_v23 }
 0xd56   :  { %v7193_v2 = vpop.f32.mrf.mxu1 }
 0xd57   :  { %7208 = vmatpush3.xpose.msk.msra.mxu0 %vm541_vm4, %v7706_v4  ;;  %v3982_v46 = vmul.f32 %v7193_v2, %v9729_v24  ;;  %v9732_v2 = vsub.f32 1.0, %v8340_v39  ;;  %v9739_v24 = vsub.f32 1.0, %v8388_v18  ;;  %v9742_v18 = vsub.f32 1.0, %v8263_v52 }
 0xd58   :  { %7209 = vmatprep.subr.msk.mxu0 %vm541_vm4, %v7707_v45  ;;  %v3958_v0 = vpop.f32.mrf.mxu1 }
 0xd59   :  { %v3981_v42 = vmul.f32 %v3958_v0, %v9728_v62  ;;  %v9733_v0 = vsub.f32 1.0, %v8344_v20  ;;  %v9737_v62 = vsub.f32 1.0, %v8370_v40  ;;  %v9740_v40 = vsub.f32 1.0, %v8254_v19 }
 0xd5a   :  { %v7196_v16 = vpop.f32.mrf.mxu1 }
 0xd5b   :  { %7210 = vmatpush3.xpose.msk.msra.mxu0 %vm541_vm4, %v7707_v45  ;;  %v3984_v27 = vmul.f32 %v7196_v16, %v9731_v49  ;;  %v9735_v16 = vsub.f32 1.0, %v8354_v12  ;;  %v9738_v12 = vsub.f32 1.0, %v8382_v61  ;;  %v9741_v49 = vsub.f32 1.0, %v8258_v35  ;;  %v9745_v35 = vld [vmem:[#allocation16_spill] sm:$0xff] }
 0xd5c   :  { %7211 = vmatprep.subr.msk.mxu0 %vm541_vm4, %v7708_v10  ;;  %v3968_v11 = vpop.f32.mrf.mxu1 }
 0xd5d   :  { %v3983_v37 = vmul.f32 %v3968_v11, %v9730_v6 }
 0xd5f   :  { %7212 = vmatpush3.xpose.msk.msra.mxu0 %vm541_vm4, %v7708_v10 }
 0xd60   :  { %7245 = vmatprep.subr.msk.mxu0 %vm374_vm3, %v7709_v57 }
 0xd62   :  { %7214 = vmatmul.mubr.msk.f32.vlgmr.msra.gmra.mxu0 %vm541_vm4, %v3978_v51 }
 0xd63   :  { %7216 = vmatprep.mubr.msk.f32.mxu0 %vm541_vm4, %v3979_v63  ;;  %7246 = vmatpush3.xpose.msk.msra.mxu0 %vm374_vm3, %v7709_v57 }
 0xd64   :  { %7247 = vmatprep.subr.msk.mxu0 %vm374_vm3, %v7710_v50 }
 0xd66   :  { %7217 = vmatmul.mubr.msk.f32.gmra.mxu0 %vm541_vm4, %v3980_v3  ;;  %v9736_v3 = vsub.f32 1.0, %v8364_v43 }
 0xd67   :  { %7219 = vmatprep.mubr.msk.f32.mxu0 %vm541_vm4, %v3981_v42  ;;  %7248 = vmatpush3.xpose.msk.msra.mxu0 %vm374_vm3, %v7710_v50 }
 0xd6a   :  { %7220 = vmatmul.mubr.msk.f32.gmra.mxu0 %vm541_vm4, %v3982_v46 }
 0xd6b   :  { %7222 = vmatprep.mubr.msk.f32.mxu0 %vm541_vm4, %v3983_v37 }
 0xd6e   :  { %7223 = vmatmul.mubr.msk.f32.gmra.mxu0 %vm541_vm4, %v3984_v27 }
 0xe02   :  { %v7159_v58 = vpop.f32.mrf.mxu0 }
 0xe03   :  { %v3414_v31 = vadd.f32 %v7159_v58, %v6157_v5 }
 0xe04   :  { %v3408_v26 = vpop.f32.mrf.mxu0 }
 0xe05   :  { %v3409_v17 = vadd.f32 %v6157_v5, %v3408_v26  ;;  %4579 = vrot.lane.b32.xlu1 %v3414_v31, %s7720_s3  ;;  %v9743_v31 = vld [vmem:[#allocation15_spill] sm:$0xff] }
 0xe06   :  { %v7162_v47 = vpop.f32.mrf.mxu0  ;;  %v9744_v26 = vsub.f32 1.0, %v9743_v31 }
 0xe07   :  { %v3424_v59 = vadd.f32 %v7162_v47, %v6157_v5  ;;  %4577 = vrot.lane.b32.xlu0 %v3409_v17, %s7720_s3 }
 0xe08   :  { %v3418_v55 = vpop.f32.mrf.mxu0 }
 0xe09   :  { %v3419_v29 = vadd.f32 %v6157_v5, %v3418_v55  ;;  %4583 = vrot.lane.b32.xlu1 %v3424_v59, %s7720_s3  ;;  %v9746_v59 = vsub.f32 1.0, %v9745_v35 }
 0xe0a   :  { %v7165_v13 = vpop.f32.mrf.mxu0 }
 0xe0b   :  { %v3434_v8 = vadd.f32 %v7165_v13, %v6157_v5 }
 0xe0c   :  { %v3428_v7 = vpop.f32.mrf.mxu0 }
 0xe0d   :  { %v3429_v30 = vadd.f32 %v6157_v5, %v3428_v7  ;;  %4581 = vrot.lane.b32.xlu1 %v3419_v29, %s7720_s3  ;;  %4587 = vrot.lane.b32.xlu0 %v3434_v8, %s7720_s3  ;;  %v9747_v29 = vld [vmem:[#allocation17_spill] sm:$0xff] }
 0xe0e   :  { %v7168_v60 = vpop.f32.mrf.mxu0  ;;  %v9748_v13 = vsub.f32 1.0, %v9747_v29 }
 0xe0f   :  { %v3444_v22 = vadd.f32 %v7168_v60, %v6157_v5 }
 0xe10   :  { %v3438_v54 = vpop.f32.mrf.mxu0 }
 0xe11   :  { %v3439_v4 = vadd.f32 %v6157_v5, %v3438_v54  ;;  %4585 = vrot.lane.b32.xlu1 %v3429_v30, %s7720_s3  ;;  %4591 = vrot.lane.b32.xlu0 %v3444_v22, %s7720_s3  ;;  %v9749_v30 = vld [vmem:[#allocation18_spill] sm:$0xff]  ;;  %v9751_v54 = vld [vmem:[#allocation19_spill] sm:$0xff] }
 0xe12   :  { %v9750_v60 = vsub.f32 1.0, %v9749_v30 }
 0xe15   :  { %4589 = vrot.lane.b32.xlu1 %v3439_v4, %s7720_s3  ;;  %v9752_v4 = vsub.f32 1.0, %v9751_v54  ;;  %v4620_v54 = vpop.permute.xlu1 %4619 }
 0xe22   :  { %v7215_v28 = vpop.f32.mrf.mxu0 }
 0xe23   :  { %v4139_v14 = vmul.f32 %v7215_v28, %v9733_v0 }
 0xe24   :  { %v4099_v45 = vpop.f32.mrf.mxu0 }
 0xe25   :  { %v4138_v10 = vmul.f32 %v4099_v45, %v9732_v2 }
 0xe26   :  { %v7218_v51 = vpop.f32.mrf.mxu0 }
 0xe27   :  { %7233 = vmatprep.mubr.msk.f32.mxu1 %vm541_vm4, %v4138_v10  ;;  %v4141_v36 = vmul.f32 %v7218_v51, %v9735_v16  ;;  %v9753_v10 = vld [vmem:[#allocation5_spill] sm:$0xff]  ;;  %v9755_v51 = vld [vmem:[#allocation7_spill] sm:$0xff] }
 0xe28   :  { %v4109_v57 = vpop.f32.mrf.mxu0  ;;  %7234 = vmatmul.mubr.msk.f32.vlgmr.msra.gmra.mxu1 %vm541_vm4, %v4139_v14  ;;  %v9754_v0 = vsub.f32 1.0, %v9753_v10 }
 0xe29   :  { %v4140_v63 = vmul.f32 %v4109_v57, %v9734_v1  ;;  %7262 = vmatpush3.xpose.msk.msra.mxu1 %vm211_vm2, %v9056_v15  ;;  %v9756_v57 = vsub.f32 1.0, %v9755_v51 }
 0xe2a   :  { %v7221_v39 = vpop.f32.mrf.mxu0 }
 0xe2b   :  { %7236 = vmatprep.mubr.msk.f32.mxu1 %vm541_vm4, %v4140_v63  ;;  %v4143_v42 = vmul.f32 %v7221_v39, %v9737_v62 }
 0xe2c   :  { %v4119_v20 = vpop.f32.mrf.mxu0  ;;  %7237 = vmatmul.mubr.msk.f32.gmra.mxu1 %vm541_vm4, %v4141_v36  ;;  %v9757_v36 = vld [vmem:[#allocation8_spill] sm:$0xff] }
 0xe2d   :  { %v4142_v50 = vmul.f32 %v4119_v20, %v9736_v3  ;;  %v9758_v39 = vsub.f32 1.0, %v9757_v36  ;;  %v9759_v3 = vld [vmem:[#allocation10_spill] sm:$0xff] }
 0xe2e   :  { %v7224_v23 = vpop.f32.mrf.mxu0 }
 0xe2f   :  { %7239 = vmatprep.mubr.msk.f32.mxu1 %vm541_vm4, %v4142_v50  ;;  %v4145_v46 = vmul.f32 %v7224_v23, %v9739_v24  ;;  %v9760_v50 = vsub.f32 1.0, %v9759_v3  ;;  %v9763_v24 = vld [vmem:[#allocation12_spill] sm:$0xff]  ;;  %v9263_v3 = vld [vmem:[%s9632_s0 + $0x18] sm:$0xff] }
 0xe30   :  { %v4129_v11 = vpop.f32.mrf.mxu0  ;;  %7240 = vmatmul.mubr.msk.f32.gmra.mxu1 %vm541_vm4, %v4143_v42 }
 0xe31   :  { %v4144_v15 = vmul.f32 %v4129_v11, %v9738_v12  ;;  %v9761_v11 = vld [vmem:[#allocation11_spill] sm:$0xff] }
 0xe32   :  { %v9762_v12 = vsub.f32 1.0, %v9761_v11 }
 0xe33   :  { %7242 = vmatprep.mubr.msk.f32.mxu1 %vm541_vm4, %v4144_v15 }
 0xe34   :  { %7243 = vmatmul.mubr.msk.f32.gmra.mxu1 %vm541_vm4, %v4145_v46  ;;  %v9764_v46 = vsub.f32 1.0, %v9763_v24  ;;  %v9275_v24 = vld [vmem:[%s9632_s0 + $0x28] sm:$0xff] }
 0xee8   :  { %v7235_v43 = vpop.f32.mrf.mxu1 }
 0xee9   :  { %v4288_v27 = vmul.f32 %v7235_v43, %v9741_v49 }
 0xeea   :  { %v4248_v6 = vpop.f32.mrf.mxu1 }
 0xeeb   :  { %v4287_v37 = vmul.f32 %v4248_v6, %v9740_v40 }
 0xeec   :  { %v7238_v5 = vpop.f32.mrf.mxu1 }
 0xeed   :  { %7249 = vmatprep.mubr.msk.f32.mxu0 %vm374_vm3, %v4287_v37  ;;  %v4290_v17 = vmul.f32 %v7238_v5, %v9744_v26  ;;  %v9765_v37 = vld [vmem:[#allocation13_spill] sm:$0xff]  ;;  %v9767_v5 = vld [vmem:[#allocation14_spill] sm:$0xff] }
 0xeee   :  { %v4258_v61 = vpop.f32.mrf.mxu1  ;;  %7250 = vmatmul.mubr.msk.f32.vlgmr.msra.gmra.mxu0 %vm374_vm3, %v4288_v27  ;;  %v9766_v49 = vsub.f32 1.0, %v9765_v37 }
 0xeef   :  { %v4289_v58 = vmul.f32 %v4258_v61, %v9742_v18  ;;  %v9768_v61 = vsub.f32 1.0, %v9767_v5  ;;  %v9282_v5 = vld [vmem:[%s9632_s0 + $0x20] sm:$0xff] }
 0xef0   :  { %v7241_v47 = vpop.f32.mrf.mxu1 }
 0xef1   :  { %7252 = vmatprep.mubr.msk.f32.mxu0 %vm374_vm3, %v4289_v58  ;;  %v4292_v8 = vmul.f32 %v7241_v47, %v9748_v13  ;;  %v9239_v58 = vld [vmem:[%s9632_s0] sm:$0xff] }
 0xef2   :  { %v4268_v19 = vpop.f32.mrf.mxu1  ;;  %7253 = vmatmul.mubr.msk.f32.gmra.mxu0 %vm374_vm3, %v4290_v17 }
 0xef3   :  { %v4291_v55 = vmul.f32 %v4268_v19, %v9746_v59 }
 0xef4   :  { %v7244_v7 = vpop.f32.mrf.mxu1 }
 0xef5   :  { %7255 = vmatprep.mubr.msk.f32.mxu0 %vm374_vm3, %v4291_v55  ;;  %v4294_v28 = vmul.f32 %v7244_v7, %v9752_v4  ;;  %v4618_v4 = vpop.permute.xlu1 %4617 }
 0xef6   :  { %v4278_v52 = vpop.f32.mrf.mxu1  ;;  %7256 = vmatmul.mubr.msk.f32.gmra.mxu0 %vm374_vm3, %v4292_v8 }
 0xef7   :  { %v4293_v22 = vmul.f32 %v4278_v52, %v9750_v60 }
 0xef9   :  { %7258 = vmatprep.mubr.msk.f32.mxu0 %vm374_vm3, %v4293_v22 }
 0xefa   :  { %7259 = vmatmul.mubr.msk.f32.gmra.mxu0 %vm374_vm3, %v4294_v28  ;;  %v4622_v28 = vpop.permute.xlu1 %4621 }
 0xfae   :  { %v7251_v45 = vpop.f32.mrf.mxu0 }
 0xfaf   :  { %v4431_v1 = vmul.f32 %v7251_v45, %v9756_v57  ;;  %v4626_v45 = vpop.permute.xlu1 %4625 }
 0xfb0   :  { %v4391_v2 = vpop.f32.mrf.mxu0 }
 0xfb1   :  { %v4430_v14 = vmul.f32 %v4391_v2, %v9754_v0 }
 0xfb2   :  { %v7254_v63 = vpop.f32.mrf.mxu0 }
 0xfb3   :  { %7263 = vmatprep.mubr.msk.f32.mxu1 %vm211_vm2, %v4430_v14  ;;  %v4433_v62 = vmul.f32 %v7254_v63, %v9760_v50  ;;  %v4630_v2 = vpop.permute.xlu1 %4629  ;;  %v4624_v14 = vpop.permute.xlu0 %4623 }
 0xfb4   :  { %v4401_v16 = vpop.f32.mrf.mxu0  ;;  %7264 = vmatmul.mubr.msk.f32.vlgmr.msra.gmra.mxu1 %vm211_vm2, %v4431_v1 }
 0xfb5   :  { %v4432_v20 = vmul.f32 %v4401_v16, %v9758_v39  ;;  %v9256_v16 = vld [vmem:[%s9632_s0 + $0x8] sm:$0xff] }
 0xfb6   :  { %v7257_v42 = vpop.f32.mrf.mxu0 }
 0xfb7   :  { %7266 = vmatprep.mubr.msk.f32.mxu1 %vm211_vm2, %v4432_v20  ;;  %v4435_v43 = vmul.f32 %v7257_v42, %v9764_v46  ;;  %v4580_v10 = vpop.permute.xlu1 %4579  ;;  %v4628_v57 = vpop.permute.xlu0 %4627 }
 0xfb8   :  { %v4411_v23 = vpop.f32.mrf.mxu0  ;;  %7267 = vmatmul.mubr.msk.f32.gmra.mxu1 %vm211_vm2, %v4433_v62 }
 0xfb9   :  { %v4434_v15 = vmul.f32 %v4411_v23, %v9762_v12  ;;  %v9269_v12 = vld [vmem:[%s9632_s0 + $0x10] sm:$0xff] }
 0xfba   :  { %v7260_v6 = vpop.f32.mrf.mxu0 }
 0xfbb   :  { %7269 = vmatprep.mubr.msk.f32.mxu1 %vm211_vm2, %v4434_v15  ;;  %v4437_v18 = vmul.f32 %v7260_v6, %v9768_v61  ;;  %v4584_v0 = vpop.permute.xlu1 %4583  ;;  %v4578_v63 = vpop.permute.xlu0 %4577 }
 0xfbc   :  { %v4421_v40 = vpop.f32.mrf.mxu0  ;;  %7270 = vmatmul.mubr.msk.f32.gmra.mxu1 %vm211_vm2, %v4435_v43  ;;  %v4601_v20 = vadd.f32 %v9239_v58, %v4578_v63  ;;  %v4604_v50 = vadd.f32 %v9263_v3, %v4584_v0  ;;  %v9772_v0 = vld [vmem:[#allocation4_spill] sm:$0xff] }
 0xfbd   :  { %v4436_v27 = vmul.f32 %v4421_v40, %v9766_v49 }
 0xfbe   :  { %v4641_v43 = vsub.f32 %v4601_v20, %v4618_v4  ;;  %v4644_v6 = vsub.f32 %v4604_v50, %v4624_v14  ;;  %v9773_v14 = vld [vmem:[#allocation20_spill] sm:$0xff] }
 0xfbf   :  { %7272 = vmatprep.mubr.msk.f32.mxu1 %vm211_vm2, %v4436_v27  ;;  %v4582_v51 = vpop.permute.xlu1 %4581  ;;  %v4588_v36 = vpop.permute.xlu0 %4587 }
 0xfc0   :  { %7273 = vmatmul.mubr.msk.f32.gmra.mxu1 %vm211_vm2, %v4437_v18  ;;  %v4603_v15 = vadd.f32 %v9269_v12, %v4582_v51  ;;  %v4606_v46 = vadd.f32 %v9275_v24, %v4588_v36  ;;  %v9774_v51 = vld [vmem:[#allocation9_spill] sm:$0xff] }
 0xfc1   :  { %7291 = vmatprep.mubr.msk.f32.mxu1 %vm2735_vm5, %v9239_v58 }
 0xfc2   :  { %v4643_v18 = vsub.f32 %v4603_v15, %v4622_v28 }
 0xfc3   :  { %v4586_v1 = vpop.permute.xlu1 %4585  ;;  %v4592_v42 = vpop.permute.xlu0 %4591 }
 0xfc4   :  { %v4605_v61 = vadd.f32 %v9282_v5, %v4586_v1  ;;  %v9776_v1 = vld [vmem:[#allocation21_spill] sm:$0xff] }
 0xfc7   :  { %v4590_v39 = vpop.permute.xlu1 %4589 }
0x1074   :  { %v7265_v31 = vpop.f32.mrf.mxu1 }
0x1075   :  { %v4650_v26 = vmul.f32 0.5, %v7265_v31  ;;  %v4646_v31 = vsub.f32 %v4606_v46, %v4628_v57  ;;  %v9775_v57 = vld [vmem:[#allocation22_spill] sm:$0xff] }
0x1076   :  { %v4530_v17 = vpop.f32.mrf.mxu1 }
0x1077   :  { %4667 = vrot.lane.b32.xlu1 %v4650_v26, %s7720_s3  ;;  %v4649_v19 = vmul.f32 0.5, %v4530_v17 }
0x1078   :  { %v7268_v47 = vpop.f32.mrf.mxu1 }
0x1079   :  { %v4652_v35 = vmul.f32 0.5, %v7268_v47 }
0x107a   :  { %v4540_v59 = vpop.f32.mrf.mxu1 }
0x107b   :  { %4665 = vrot.lane.b32.xlu1 %v4649_v19, %s7720_s3  ;;  %4671 = vrot.lane.b32.xlu0 %v4652_v35, %s7720_s3  ;;  %v4651_v29 = vmul.f32 0.5, %v4540_v59  ;;  %v9290_v35 = vld [vmem:[%s9632_s0 + $0x30] sm:$0xff] }
0x107c   :  { %v7271_v55 = vpop.f32.mrf.mxu1  ;;  %v4607_v59 = vadd.f32 %v9290_v35, %v4590_v39 }
0x107d   :  { %v4654_v13 = vmul.f32 0.5, %v7271_v55  ;;  %v4645_v55 = vsub.f32 %v4605_v61, %v4626_v45  ;;  %v9769_v45 = vld [vmem:[#allocation3_spill] sm:$0xff] }
0x107e   :  { %v4550_v8 = vpop.f32.mrf.mxu1 }
0x107f   :  { %4669 = vrot.lane.b32.xlu1 %v4651_v29, %s7720_s3  ;;  %4675 = vrot.lane.b32.xlu0 %v4654_v13, %s7720_s3  ;;  %v4653_v52 = vmul.f32 0.5, %v4550_v8 }
0x1080   :  { %v7274_v7 = vpop.f32.mrf.mxu1 }
0x1081   :  { %v4656_v22 = vmul.f32 0.5, %v7274_v7  ;;  %v4647_v7 = vsub.f32 %v4607_v59, %v4630_v2  ;;  %v9770_v2 = vld [vmem:[#allocation2_spill] sm:$0xff] }
0x1082   :  { %v4560_v30 = vpop.f32.mrf.mxu1 }
0x1083   :  { %v4655_v60 = vmul.f32 0.5, %v4560_v30  ;;  %4673 = vrot.lane.b32.xlu1 %v4653_v52, %s7720_s3  ;;  %v9299_v30 = vld [vmem:[%s9632_s0 + $0x38] sm:$0xff] }
0x1085   :  { %4677 = vrot.lane.b32.xlu0 %v4655_v60, %s7720_s3  ;;  %v4608_v60 = vadd.f32 %v9299_v30, %v4592_v42 }
0x1087   :  { %4631 = vrot.lane.b32.xlu1 %v8935_v34, %s7720_s3  ;;  %v4602_v34 = vadd.f32 %v9256_v16, %v4580_v10  ;;  %v9771_v10 = vld [vmem:[#allocation6_spill] sm:$0xff] }
0x1089   :  { %v4642_v62 = vsub.f32 %v4602_v34, %v4620_v54 }
0x108b   :  { %4679 = vrot.lane.b32.xlu1 %v4656_v22, %s7720_s3 }
0x10e9   :  { %v4668_v23 = vpop.permute.xlu1 %4667 }
0x10ea   :  { %v4690_v11 = vadd.f32 %v4668_v23, %v4642_v62 }
0x10ec   :  { %4707 = vrot.lane.b32.xlu1 %v4690_v11, %s7721_s12 }
0x10ed   :  { %v4666_v40 = vpop.permute.xlu1 %4665  ;;  %v4672_v37 = vpop.permute.xlu0 %4671 }
0x10ee   :  { %v4689_v49 = vadd.f32 %v4666_v40, %v4641_v43  ;;  %v4692_v27 = vadd.f32 %v4672_v37, %v4644_v6 }
0x10f0   :  { %4705 = vrot.lane.b32.xlu0 %v4689_v49, %s7721_s12  ;;  %4711 = vrot.lane.b32.xlu1 %v4692_v27, %s7721_s12 }
0x10f1   :  { %v4670_v26 = vpop.permute.xlu1 %4669  ;;  %v4676_v17 = vpop.permute.xlu0 %4675 }
0x10f2   :  { %v4691_v47 = vadd.f32 %v4670_v26, %v4643_v18  ;;  %v4694_v19 = vadd.f32 %v4676_v17, %v4646_v31 }
0x10f4   :  { %4709 = vrot.lane.b32.xlu0 %v4691_v47, %s7721_s12  ;;  %4715 = vrot.lane.b32.xlu1 %v4694_v19, %s7721_s12 }
0x10f5   :  { %v4674_v29 = vpop.permute.xlu1 %4673 }
0x10f6   :  { %v4693_v13 = vadd.f32 %v4674_v29, %v4645_v55  ;;  %v9778_v29 = vrot.slane %v8801_v21, 2 }
0x10f7   :  { %v4678_v8 = vpop.permute.xlu0 %4677 }
0x10f8   :  { %4713 = vrot.lane.b32.xlu0 %v4693_v13, %s7721_s12  ;;  %v4695_v22 = vadd.f32 %v4678_v8, %v4647_v7  ;;  %v3652_v8 = vrot.slane %v8840_v44, 3  ;;  %v3685_v7 = vrot.slane %v8840_v44, 1 }
0x10f9   :  { %v4632_v52 = vpop.permute.xlu1 %4631 }
0x10fa   :  { %v4648_v54 = vsub.f32 %v4608_v60, %v4632_v52  ;;  %v3692_v60 = vrot.slane %v8835_v32, 1 }
0x10fc   :  { %4717 = vrot.lane.b32.xlu0 %v4695_v22, %s7721_s12 }
0x10fd   :  { %v4680_v4 = vpop.permute.xlu1 %4679 }
0x10fe   :  { %v4696_v28 = vadd.f32 %v4680_v4, %v4648_v54  ;;  %v3634_v54 = vrot.slane %v8840_v44, 4 }
0x1100   :  { %4719 = vrot.lane.b32.xlu1 %v4696_v28, %s7721_s12 }
0x111a   :  { %3479 = vxpose.xlu0.b32.start [1/8] (short) (narrow) %v9769_v45, 16 }
0x111e   :  { %3480 = vxpose.xlu0.b32.cont [2/8] (short) (narrow) %v9770_v2, 16 }
0x1122   :  { %3481 = vxpose.xlu0.b32.cont [3/8] (short) (narrow) %v9771_v10, 16 }
0x1126   :  { %3482 = vxpose.xlu0.b32.cont [4/8] (short) (narrow) %v9772_v0, 16 }
0x112a   :  { %3483 = vxpose.xlu0.b32.cont [5/8] (short) (narrow) %v9773_v14, 16 }
0x112e   :  { %3484 = vxpose.xlu0.b32.cont [6/8] (short) (narrow) %v9774_v51, 16 }
0x1132   :  { %3485 = vxpose.xlu0.b32.cont [7/8] (short) (narrow) %v9775_v57, 16 }
0x1136   :  { %3486 = vxpose.xlu0.b32.end [8/8] (short) (narrow) %v9776_v1, 16 }
0x115e   :  { %v4708_v34 = vpop.permute.xlu1 %4707 }
0x115f   :  { %5149 = vrot.lane.b32.xlu0 %v9239_v58, %s7721_s12  ;;  %v4910_v58 = vld [vmem:[%s9638_s7 + $0x8] sm:$0xf] }
0x1160   :  { %7275 = vmatprep.subr.msk.mxu0 %vm71_vm0, %v4910_v58 }
0x1161   :  { %7276 = vmatpush3.msk.msra.mxu0 %vm71_vm0, %v4910_v58 }
0x1162   :  { %v4706_v63 = vpop.permute.xlu0 %4705  ;;  %v4712_v39 = vpop.permute.xlu1 %4711 }
0x1163   :  { %4729 = vxpose.xlu1.b32.start [1/8] (short) (narrow) %v4706_v63, 8  ;;  %5153 = vrot.lane.b32.xlu0 %v9269_v12, %s7721_s12 }
0x1166   :  { %v4710_v36 = vpop.permute.xlu0 %4709  ;;  %v4716_v50 = vpop.permute.xlu1 %4715 }
0x1167   :  { %4730 = vxpose.xlu1.b32.cont [2/8] (short) (narrow) %v4708_v34, 8 }
0x116a   :  { %v4714_v20 = vpop.permute.xlu0 %4713 }
0x116b   :  { %4731 = vxpose.xlu1.b32.cont [3/8] (short) (narrow) %v4710_v36, 8 }
0x116e   :  { %v4718_v62 = vpop.permute.xlu0 %4717 }
0x116f   :  { %4732 = vxpose.xlu1.b32.cont [4/8] (short) (narrow) %v4712_v39, 8 }
0x1172   :  { %v4720_v42 = vpop.permute.xlu1 %4719 }
0x1173   :  { %4733 = vxpose.xlu1.b32.cont [5/8] (short) (narrow) %v4714_v20, 8 }
0x1177   :  { %4734 = vxpose.xlu1.b32.cont [6/8] (short) (narrow) %v4716_v50, 8 }
0x117b   :  { %4735 = vxpose.xlu1.b32.cont [7/8] (short) (narrow) %v4718_v62, 8 }
0x117f   :  { %4736 = vxpose.xlu1.b32.end [8/8] (short) (narrow) %v4720_v42, 8 }
0x1196   :  { %v3495_v23 = vpop.trf.xlu0 }
0x1197   :  { %v9334_v11 = vmul.f32 %v8837_v41, %v3495_v23  ;;  %v3577_v15 = vmul.f32 %v3570_v9, %v3495_v23  ;;  %v3595_v37 = vmul.f32 %v3588_v53, %v3495_v23  ;;  %v9777_v41 = vrot.slane %v8801_v21, 3 }
0x1198   :  { %v3660_v53 = vrot.slane %v8835_v32, 3  ;;  %v3687_v28 = vmul.f32 %v3685_v7, %v3495_v23  ;;  %v3654_v0 = vmul.f32 %v3652_v8, %v3495_v23  ;;  %v3636_v51 = vmul.f32 %v3634_v54, %v3495_v23 }
0x1199   :  { %v3579_v46 = vrot.slane %v3577_v15, 4  ;;  %v9340_v43 = vmul.f32 %v9334_v11, %v8801_v21  ;;  %v3585_v40 = vrot.slane %v3577_v15, 5  ;;  %v3597_v61 = vrot.slane %v3595_v37, 7 }
0x119a   :  { %v3496_v49 = vpop.trf.xlu0  ;;  %v3603_v26 = vrot.slane %v3595_v37, 5  ;;  %v3662_v22 = vmul.f32 %v3660_v53, %v3495_v23  ;;  %v3642_v57 = vmul.f32 %v8835_v32, %v9334_v11  ;;  %v3630_v42 = vmul.f32 %v8840_v44, %v9334_v11 }
0x119b   :  { %v3581_v6 = vadd.f32 %v3579_v46, %v9340_v43  ;;  %v3613_v18 = vmul.f32 %v9777_v41, %v3496_v49  ;;  %v3625_v13 = vmul.f32 %v9778_v29, %v3496_v49  ;;  %v3694_v2 = vmul.f32 %v3692_v60, %v3496_v49 }
0x119c   :  { %v3605_v17 = vadd.f32 %v3603_v26, %v9340_v43  ;;  %v3664_v39 = vrot.slane %v3662_v22, 1  ;;  %v3644_v58 = vrot.slane %v3642_v57, 5  ;;  %v3707_v32 = vrot.slane %v8833_v33, 1 }
0x119d   :  { %5151 = vrot.lane.b32.xlu1 %v9256_v16, %s7721_s12  ;;  %v3587_v27 = vadd.f32 %v3585_v40, %v3581_v6  ;;  %v3615_v9 = vrot.slane %v3613_v18, 7  ;;  %v3627_v45 = vrot.slane %v3625_v13, 7  ;;  %v3696_v50 = vrot.slane %v3694_v2, 1 }
0x119e   :  { %v3675_v44 = vmul.f32 %v8833_v33, %v9334_v11  ;;  %v3727_v57 = vmul.f32 %v9340_v43, %v8822_v56 }
0x119f   :  { %v3599_v31 = vadd.f32 %v3597_v61, %v3587_v27  ;;  %v3617_v55 = vadd.f32 %v3615_v9, %v3605_v17  ;;  %v3629_v20 = vadd.f32 %v3627_v45, %v9340_v43  ;;  %v3709_v61 = vmul.f32 %v3707_v32, %v3496_v49  ;;  %v9371_v17 = vpop.eup %7614 }
0x11a0   :  { %v3677_v53 = vrot.slane %v3675_v44, 5 }
0x11a1   :  { %5155 = vrot.lane.b32.xlu1 %v9263_v3, %s7721_s12  ;;  %v3688_v47 = vrot.slane %v3599_v31, 1  ;;  %v3638_v19 = vrot.slane %v3599_v31, 4  ;;  %v3655_v59 = vrot.slane %v3599_v31, 3  ;;  %v3699_v10 = vrot.slane %v3617_v55, 1 }
0x11a2   :  { %v3668_v14 = vrot.slane %v3617_v55, 3  ;;  %v3631_v63 = vmul.f32 %v3599_v31, %v8822_v56  ;;  %v3647_v23 = vmul.f32 %v3617_v55, %v8822_v56  ;;  %v3715_v41 = vrot.slane %v3629_v20, 1 }
0x11a3   :  { %v3690_v52 = vmul.f32 %v3688_v47, %v8798_v48  ;;  %v3640_v4 = vmul.f32 %v3638_v19, %v8798_v48  ;;  %v3657_v21 = vmul.f32 %v3655_v59, %v8798_v48  ;;  %v3701_v62 = vmul.f32 %v3699_v10, %v8806_v25 }
0x11a4   :  { %v3670_v15 = vmul.f32 %v3668_v14, %v8798_v48  ;;  %v3632_v6 = vadd.f32 %v3631_v63, %v3630_v42  ;;  %v3649_v31 = vrot.slane %v3647_v23, 5  ;;  %v3711_v29 = vrot.slane %v3709_v61, 2 }
0x11a5   :  { %5157 = vrot.lane.b32.xlu1 %v9282_v5, %s7721_s12  ;;  %v3691_v1 = vadd.f32 %v3690_v52, %v3687_v28  ;;  %v3641_v34 = vadd.f32 %v3640_v4, %v3636_v51  ;;  %v3658_v36 = vadd.f32 %v3657_v21, %v3654_v0  ;;  %v3703_v27 = vrot.slane %v3701_v62, 1 }
0x11a6   :  { %v3672_v26 = vrot.slane %v3670_v15, 1  ;;  %v3717_v13 = vmul.f32 %v3715_v41, %v8806_v25  ;;  %v3680_v49 = vmul.f32 %v3629_v20, %v8822_v56  ;;  %v3722_v4 = vmul.f32 %v8826_v38, %v9334_v11 }
0x11a7   :  { %v3698_v46 = vadd.f32 %v3696_v50, %v3691_v1  ;;  %v3646_v40 = vadd.f32 %v3644_v58, %v3641_v34  ;;  %v3666_v37 = vadd.f32 %v3664_v39, %v3658_v36  ;;  %v3729_v11 = vrot.slane %v3727_v57, 4 }
0x11a8   :  { %v3719_v54 = vrot.slane %v3717_v13, 2  ;;  %v3682_v21 = vrot.slane %v3680_v49, 5  ;;  %v3724_v51 = vrot.slane %v3722_v4, 4 }
0x11a9   :  { %5159 = vrot.lane.b32.xlu1 %v9275_v24, %s7721_s12  ;;  %v3705_v47 = vadd.f32 %v3703_v27, %v3698_v46  ;;  %v3651_v19 = vadd.f32 %v3649_v31, %v3646_v40  ;;  %v3674_v59 = vadd.f32 %v3672_v26, %v3666_v37 }
0x11ab   :  { %v3713_v7 = vadd.f32 %v3711_v29, %v3705_v47  ;;  %v3679_v52 = vadd.f32 %v3677_v53, %v3674_v59  ;;  %v4763_v33 = vrot.slane %v3651_v19, 3 }
0x11ad   :  { %5161 = vrot.lane.b32.xlu1 %v9290_v35, %s7721_s12  ;;  %v3721_v2 = vadd.f32 %v3719_v54, %v3713_v7  ;;  %v3684_v10 = vadd.f32 %v3682_v21, %v3679_v52 }
0x11af   :  { %v3726_v63 = vadd.f32 %v3724_v51, %v3721_v2  ;;  %v4767_v34 = vrot.slane %v3684_v10, 3 }
0x11b1   :  { %5163 = vrot.lane.b32.xlu1 %v9299_v30, %s7721_s12  ;;  %v3731_v42 = vadd.f32 %v3729_v11, %v3726_v63 }
0x11b3   :  { %v4771_v43 = vrot.slane %v3731_v42, 4 }
0x11df   :  { %v4745_v18 = vpop.trf.xlu1 }
0x11e0   :  { %v4761_v9 = vsub.f32 %v4745_v18, %v3632_v6  ;;  %v4765_v28 = vsub.f32 %v4745_v18, %v4763_v33  ;;  %v4769_v20 = vsub.f32 %v4745_v18, %v4767_v34  ;;  %v4773_v40 = vsub.f32 %v4745_v18, %v4771_v43  ;;  %v5323_v43 = vld [vmem:[%s9638_s7 + $0x38] sm:$0xff] }
0x11e2   :  { %v9374_v55 = vmul.f32 %v9371_v17, %v4761_v9 }
0x11e4   :  { %v4778_v8 = vrot.slane %v9374_v55, 4  ;;  %v4786_v22 = vrot.slane %v9374_v55, 3  ;;  %v4802_v38 = vrot.slane %v9374_v55, 1 }
0x11e6   :  { %v4780_v60 = vmul.f32 %v4778_v8, %v8798_v48  ;;  %v4788_v14 = vmul.f32 %v4786_v22, %v8798_v48  ;;  %v4804_v15 = vmul.f32 %v4802_v38, %v8798_v48 }
0x11e8   :  { %v4782_v45 = vrot.slane %v4780_v60, 3  ;;  %v4790_v36 = vrot.slane %v4788_v14, 3  ;;  %v4806_v6 = vrot.slane %v4804_v15, 4  ;;  %v5326_v15 = vld [vmem:[%s9638_s7 + $0x50] sm:$0xff] }
0x11ea   :  { %v4784_v0 = vsub.f32 %v4765_v28, %v4782_v45  ;;  %v4792_v58 = vsub.f32 %v4769_v20, %v4790_v36  ;;  %v4808_v61 = vsub.f32 %v4773_v40, %v4806_v6  ;;  %v4909_v36 = vld [vmem:[%s9638_s7] sm:$0xff]  ;;  %v5321_v6 = vld [vmem:[%s9638_s7 + $0x28] sm:$0xff] }
0x11eb   :  { %7289 = vmatprep.subr.mxu1 %v4909_v36  ;;  %v5320_v40 = vld [vmem:[%s9638_s7 + $0x20] sm:$0xff] }
0x11ec   :  { %v4785_v1 = vmul.f32 %v9371_v17, %v4784_v0  ;;  %7290 = vmatpush3.msra.mxu1 %v4909_v36 }
0x11ed   :  { %7292 = vmatmul.mubr.msk.f32.vlgmr.msra.gmra.mxu1 %vm2735_vm5, %v9256_v16  ;;  %v5150_v16 = vpop.permute.xlu0 %5149  ;;  %7317 = vmatprep.subr.mxu1 %v5326_v15 }
0x11ee   :  { %v4794_v39 = vrot.slane %v4785_v1, 3  ;;  %v4809_v62 = vrot.slane %v4785_v1, 1  ;;  %7294 = vmatprep.mubr.msk.f32.mxu1 %vm2735_vm5, %v9269_v12  ;;  %7318 = vmatpush3.msra.mxu1 %v5326_v15 }
0x11f0   :  { %v4796_v50 = vmul.f32 %v4794_v39, %v8798_v48  ;;  %v4811_v56 = vmul.f32 %v4809_v62, %v8806_v25 }
0x11f1   :  { %7295 = vmatmul.mubr.msk.f32.gmra.mxu1 %vm2735_vm5, %v9263_v3  ;;  %v5154_v3 = vpop.permute.xlu0 %5153 }
0x11f2   :  { %v4798_v23 = vrot.slane %v4796_v50, 4  ;;  %v4813_v37 = vrot.slane %v4811_v56, 5  ;;  %7297 = vmatprep.mubr.msk.f32.mxu1 %vm2735_vm5, %v9282_v5  ;;  %v5324_v56 = vld [vmem:[%s9638_s7 + $0x40] sm:$0xff] }
0x11f4   :  { %v4800_v32 = vsub.f32 %v4792_v58, %v4798_v23  ;;  %v4815_v31 = vsub.f32 %v4808_v61, %v4813_v37  ;;  %v5319_v37 = vld [vmem:[%s9638_s7 + $0x18] sm:$0xff] }
0x11f5   :  { %7298 = vmatmul.mubr.msk.f32.gmra.mxu1 %vm2735_vm5, %v9275_v24 }
0x11f6   :  { %v4801_v46 = vmul.f32 %v9371_v17, %v4800_v32  ;;  %7300 = vmatprep.mubr.msk.f32.mxu1 %vm2735_vm5, %v9290_v35  ;;  %v5325_v32 = vld [vmem:[%s9638_s7 + $0x48] sm:$0xff] }
0x11f7   :  { %7319 = vmatprep.subr.mxu1 %v5325_v32 }
0x11f8   :  { %v4817_v27 = vrot.slane %v4801_v46, 1  ;;  %7320 = vmatpush3.msra.mxu1 %v5325_v32 }
0x11f9   :  { %7301 = vmatmul.mubr.msk.f32.gmra.mxu1 %vm2735_vm5, %v9299_v30  ;;  %7321 = vmatprep.subr.mxu1 %v5324_v56 }
0x11fa   :  { %v4819_v41 = vmul.f32 %v4817_v27, %v8806_v25  ;;  %7322 = vmatpush3.msra.mxu1 %v5324_v56 }
0x11fb   :  { %7323 = vmatprep.subr.mxu1 %v5323_v43 }
0x11fc   :  { %v4821_v26 = vrot.slane %v4819_v41, 6  ;;  %7324 = vmatpush3.msra.mxu1 %v5323_v43 }
0x11fe   :  { %v4823_v44 = vsub.f32 %v4815_v31, %v4821_v26 }
0x1200   :  { %v4824_v9 = vmul.f32 %v9371_v17, %v4823_v44 }
0x1202   :  { %v4825_v47 = vmul.f32 %v9371_v17, %v4824_v9 }
0x1204   :  { %v4827_v19 = vrot.slane %v4825_v47, 2  ;;  %v4843_v18 = vrot.slane %v4825_v47, 3  ;;  %v4866_v28 = vrot.slane %v4825_v47, 4 }
0x1206   :  { %v4829_v59 = vmul.f32 %v4827_v19, %v8806_v25  ;;  %v4845_v7 = vmul.f32 %v4843_v18, %v8806_v25  ;;  %v4868_v0 = vmul.f32 %v4866_v28, %v8798_v48 }
0x1208   :  { %v4831_v29 = vrot.slane %v4829_v59, 7  ;;  %v4847_v60 = vrot.slane %v4845_v7, 7  ;;  %v4870_v57 = vrot.slane %v4868_v0, 7 }
0x120a   :  { %v4833_v13 = vsub.f32 %v4801_v46, %v4831_v29  ;;  %v5322_v46 = vld [vmem:[%s9638_s7 + $0x30] sm:$0xff] }
0x120b   :  { %7325 = vmatprep.subr.mxu1 %v5322_v46 }
0x120c   :  { %v4834_v49 = vmul.f32 %v9371_v17, %v4833_v13  ;;  %7326 = vmatpush3.msra.mxu1 %v5322_v46 }
0x120d   :  { %7327 = vmatprep.subr.mxu1 %v5321_v6 }
0x120e   :  { %v4836_v53 = vrot.slane %v4834_v49, 4  ;;  %v4859_v4 = vrot.slane %v4834_v49, 5  ;;  %7328 = vmatpush3.msra.mxu1 %v5321_v6 }
0x120f   :  { %v5152_v30 = vpop.permute.xlu1 %5151  ;;  %7329 = vmatprep.subr.mxu1 %v5320_v40 }
0x1210   :  { %v4838_v8 = vmul.f32 %v4836_v53, %v8798_v48  ;;  %v4861_v2 = vmul.f32 %v4859_v4, %v8798_v48  ;;  %7330 = vmatpush3.msra.mxu1 %v5320_v40 }
0x1211   :  { %7331 = vmatprep.subr.mxu1 %v5319_v37 }
0x1212   :  { %v4840_v52 = vrot.slane %v4838_v8, 5  ;;  %v4863_v51 = vrot.slane %v4861_v2, 5  ;;  %7332 = vmatpush3.msra.mxu1 %v5319_v37 }
0x1214   :  { %v4842_v33 = vsub.f32 %v4785_v1, %v4840_v52  ;;  %v6255_v52 = vld [vmem:[%s9639_s8] ss:$0 sm:$0xff] }
0x1216   :  { %v4849_v22 = vsub.f32 %v4842_v33, %v4847_v60 }
0x1218   :  { %v4850_v54 = vmul.f32 %v9371_v17, %v4849_v22 }
0x121a   :  { %v4852_v21 = vrot.slane %v4850_v54, 5 }
0x121c   :  { %v4854_v45 = vmul.f32 %v4852_v21, %v8798_v48  ;;  %v4911_v48 = vld [vmem:[%s9638_s7 + $0x10] sm:$0x1f] }
0x121d   :  { %7303 = vmatprep.subr.msk.mxu0 %vm3784_vm10, %v4911_v48 }
0x121e   :  { %v4856_v10 = vrot.slane %v4854_v45, 4 }
0x1220   :  { %v4858_v14 = vsub.f32 %v9374_v55, %v4856_v10  ;;  %v5156_v55 = vpop.permute.xlu1 %5155 }
0x1222   :  { %v4865_v25 = vsub.f32 %v4858_v14, %v4863_v51 }
0x1224   :  { %v4872_v1 = vsub.f32 %v4865_v25, %v4870_v57  ;;  %v5158_v50 = vpop.permute.xlu1 %5157 }
0x1226   :  { %v4873_v63 = vmul.f32 %v9371_v17, %v4872_v1 }
0x1228   :  { %v4874_v34 = vsel %vm3777_vm7, %v4873_v63, %v4850_v54  ;;  %v5160_v42 = vpop.permute.xlu1 %5159 }
0x1229   :  { %v4875_v39 = vsel %vm3779_vm8, %v4874_v34, %v4834_v49 }
0x122a   :  { %v4876_v38 = vsel %vm3781_vm9, %v4875_v39, %v4825_v47 }
0x122b   :  { %4877 = vxpose.xlu0.b32.start.end [1/1] (short) (narrow) %v4876_v38, 64 }
0x122c   :  { %v5162_v58 = vpop.permute.xlu1 %5161 }
0x1230   :  { %v5164_v23 = vpop.permute.xlu1 %5163 }
0x12a7   :  { %v9429_v12 = vpop.trf.xlu0 }
0x12a8   :  { %7277 = vmatprep.mubr.msk.f32.mxu0 %vm46_vm1, %v9429_v12  ;;  %5909 = vrot.lane.b32.xlu1 %v9429_v12, %s7722_s23 }
0x12ab   :  { %v9434_v24 = vpop.trf.xlu0 }
0x12ac   :  { %7278 = vmatmul.mubr.msk.f32.vlgmr.msra.gmra.mxu0 %vm46_vm1, %v9434_v24  ;;  %5911 = vrot.lane.b32.xlu1 %v9434_v24, %s7722_s23 }
0x12ad   :  { %7304 = vmatpush3.msk.msra.mxu0 %vm3784_vm10, %v4911_v48  ;;  %v7293_v31 = vpop.f32.mrf.mxu1 }
0x12af   :  { %v9440_v5 = vpop.trf.xlu0  ;;  %v5110_v9 = vpop.f32.mrf.mxu1 }
0x12b0   :  { %7280 = vmatprep.mubr.msk.f32.mxu0 %vm46_vm1, %v9440_v5  ;;  %5913 = vrot.lane.b32.xlu1 %v9440_v5, %s7722_s23 }
0x12b1   :  { %v7296_v47 = vpop.f32.mrf.mxu1 }
0x12b3   :  { %v9445_v35 = vpop.trf.xlu0  ;;  %v5120_v29 = vpop.f32.mrf.mxu1 }
0x12b4   :  { %7281 = vmatmul.mubr.msk.f32.gmra.mxu0 %vm46_vm1, %v9445_v35  ;;  %5915 = vrot.lane.b32.xlu1 %v9445_v35, %s7722_s23 }
0x12b5   :  { %v7299_v18 = vpop.f32.mrf.mxu1 }
0x12b7   :  { %v9450_v17 = vpop.trf.xlu0  ;;  %v5130_v54 = vpop.f32.mrf.mxu1 }
0x12b8   :  { %7283 = vmatprep.mubr.msk.f32.mxu0 %vm46_vm1, %v9450_v17  ;;  %5917 = vrot.lane.b32.xlu0 %v9450_v17, %s7722_s23 }
0x12b9   :  { %v7302_v10 = vpop.f32.mrf.mxu1 }
0x12bb   :  { %v9455_v11 = vpop.trf.xlu0  ;;  %v5140_v36 = vpop.f32.mrf.mxu1 }
0x12bc   :  { %7284 = vmatmul.mubr.msk.f32.gmra.mxu0 %vm46_vm1, %v9455_v11  ;;  %5919 = vrot.lane.b32.xlu1 %v9455_v11, %s7722_s23 }
0x12bf   :  { %v9460_v20 = vpop.trf.xlu0 }
0x12c0   :  { %7286 = vmatprep.mubr.msk.f32.mxu0 %vm46_vm1, %v9460_v20  ;;  %5921 = vrot.lane.b32.xlu1 %v9460_v20, %s7722_s23 }
0x12c3   :  { %v9465_v62 = vpop.trf.xlu0 }
0x12c4   :  { %7287 = vmatmul.mubr.msk.f32.gmra.mxu0 %vm46_vm1, %v9465_v62  ;;  %5923 = vrot.lane.b32.xlu1 %v9465_v62, %s7722_s23 }
0x12c5   :  { %7305 = vmatprep.mubr.msk.f32.mxu0 %vm5165_vm14, %v5150_v16 }
0x12c8   :  { %7306 = vmatmul.mubr.msk.f32.vlgmr.msra.gmra.mxu0 %vm5165_vm14, %v5152_v30 }
0x12c9   :  { %7308 = vmatprep.mubr.msk.f32.mxu0 %vm5165_vm14, %v5154_v3 }
0x12cc   :  { %7309 = vmatmul.mubr.msk.f32.gmra.mxu0 %vm5165_vm14, %v5156_v55 }
0x12cd   :  { %7311 = vmatprep.mubr.msk.f32.mxu0 %vm5165_vm14, %v5158_v50 }
0x12d0   :  { %7312 = vmatmul.mubr.msk.f32.gmra.mxu0 %vm5165_vm14, %v5160_v42 }
0x12d1   :  { %7314 = vmatprep.mubr.msk.f32.mxu0 %vm5165_vm14, %v5162_v58 }
0x12d4   :  { %7315 = vmatmul.mubr.msk.f32.gmra.mxu0 %vm5165_vm14, %v5164_v23 }
0x136c   :  { %v7279_v27 = vpop.f32.mrf.mxu0 }
0x136d   :  { %v5116_v49 = vadd.f32 %v7293_v31, %v7279_v27  ;;  %v5474_v31 = vld [vmem:[%s9638_s7 + $0x80] sm:$0xff] }
0x136e   :  { %v5005_v61 = vpop.f32.mrf.mxu0 }
0x136f   :  { %v5111_v8 = vadd.f32 %v5110_v9, %v5005_v61  ;;  %v5476_v61 = vld [vmem:[%s9638_s7 + $0x90] sm:$0xff]  ;;  %v5471_v9 = vld [vmem:[%s9638_s7 + $0x68] sm:$0xff] }
0x1370   :  { %7345 = vmatprep.subr.mxu0 %v5476_v61 }
0x1371   :  { %7346 = vmatpush3.msra.mxu0 %v5476_v61 }
0x1374   :  { %v7282_v41 = vpop.f32.mrf.mxu0 }
0x1375   :  { %v5126_v60 = vadd.f32 %v7296_v47, %v7282_v41  ;;  %v5475_v41 = vld [vmem:[%s9638_s7 + $0x88] sm:$0xff]  ;;  %v5470_v47 = vld [vmem:[%s9638_s7 + $0x60] sm:$0xff] }
0x1376   :  { %v5015_v26 = vpop.f32.mrf.mxu0  ;;  %7347 = vmatprep.subr.mxu0 %v5475_v41 }
0x1377   :  { %v5121_v28 = vadd.f32 %v5120_v29, %v5015_v26  ;;  %7348 = vmatpush3.msra.mxu0 %v5475_v41  ;;  %v5473_v26 = vld [vmem:[%s9638_s7 + $0x78] sm:$0xff] }
0x1378   :  { %7349 = vmatprep.subr.mxu0 %v5474_v31 }
0x1379   :  { %7350 = vmatpush3.msra.mxu0 %v5474_v31 }
0x137a   :  { %7351 = vmatprep.subr.mxu0 %v5473_v26 }
0x137b   :  { %7352 = vmatpush3.msra.mxu0 %v5473_v26 }
0x137c   :  { %v7285_v44 = vpop.f32.mrf.mxu0 }
0x137d   :  { %v5136_v14 = vadd.f32 %v7299_v18, %v7285_v44  ;;  %v5472_v44 = vld [vmem:[%s9638_s7 + $0x70] sm:$0xff] }
0x137e   :  { %v5025_v19 = vpop.f32.mrf.mxu0  ;;  %7353 = vmatprep.subr.mxu0 %v5472_v44 }
0x137f   :  { %v5131_v1 = vadd.f32 %v5130_v54, %v5025_v19  ;;  %7354 = vmatpush3.msra.mxu0 %v5472_v44  ;;  %v5469_v19 = vld [vmem:[%s9638_s7 + $0x58] sm:$0xff] }
0x1380   :  { %7355 = vmatprep.subr.mxu0 %v5471_v9 }
0x1381   :  { %7356 = vmatpush3.msra.mxu0 %v5471_v9 }
0x1382   :  { %7357 = vmatprep.subr.mxu0 %v5470_v47 }
0x1383   :  { %7358 = vmatpush3.msra.mxu0 %v5470_v47  ;;  %v5766_v47 = vld [vmem:[%s9638_s7 + $0xc0] sm:$0xff] }
0x1384   :  { %v7288_v59 = vpop.f32.mrf.mxu0  ;;  %7359 = vmatprep.subr.mxu0 %v5469_v19 }
0x1385   :  { %v5146_v38 = vadd.f32 %v7302_v10, %v7288_v59  ;;  %7360 = vmatpush3.msra.mxu0 %v5469_v19  ;;  %v6256_v59 = vld [vmem:[%s9639_s8 + $0x1] ss:$0 sm:$0xff]  ;;  %v5765_v19 = vld [vmem:[%s9638_s7 + $0xb8] sm:$0xff] }
0x1386   :  { %v5035_v13 = vpop.f32.mrf.mxu0  ;;  %7393 = vmatprep.subr.mxu0 %v5766_v47 }
0x1387   :  { %v5141_v30 = vadd.f32 %v5140_v36, %v5035_v13  ;;  %v5620_v36 = vld [vmem:[%s9638_s7 + $0xa0] sm:$0xff] }
0x1388   :  { %v7307_v53 = vpop.f32.mrf.mxu0 }
0x1389   :  { %v5291_v7 = vadd.f32 %v7307_v53, %v5116_v49 }
0x138a   :  { %v5251_v33 = vpop.f32.mrf.mxu0 }
0x138b   :  { %v5290_v22 = vadd.f32 %v5251_v33, %v5111_v8  ;;  %v5304_v4 = vadd.f32 %v6255_v52, %v5291_v7 }
0x138c   :  { %v7310_v21 = vpop.f32.mrf.mxu0 }
0x138d   :  { %v5303_v45 = vadd.f32 %v6255_v52, %v5290_v22  ;;  %v5293_v2 = vadd.f32 %v7310_v21, %v5126_v60 }
0x138e   :  { %v5261_v0 = vpop.f32.mrf.mxu0 }
0x138f   :  { %7616 = vtanh.f32 %v5303_v45  ;;  %v5292_v51 = vadd.f32 %v5261_v0, %v5121_v28  ;;  %v5306_v25 = vadd.f32 %v6255_v52, %v5293_v2 }
0x1390   :  { %7618 = vtanh.f32 %v5304_v4  ;;  %v7313_v57 = vpop.f32.mrf.mxu0 }
0x1391   :  { %v5305_v63 = vadd.f32 %v6255_v52, %v5292_v51  ;;  %v5295_v34 = vadd.f32 %v7313_v57, %v5136_v14 }
0x1392   :  { %v5271_v39 = vpop.f32.mrf.mxu0 }
0x1393   :  { %7620 = vtanh.f32 %v5305_v63  ;;  %v5294_v48 = vadd.f32 %v5271_v39, %v5131_v1  ;;  %v5308_v16 = vadd.f32 %v6255_v52, %v5295_v34  ;;  %v5622_v63 = vld [vmem:[%s9638_s7 + $0xb0] sm:$0xff]  ;;  %v5621_v34 = vld [vmem:[%s9638_s7 + $0xa8] sm:$0xff]  ;;  %v5619_v39 = vld [vmem:[%s9638_s7 + $0x98] sm:$0xff] }
0x1394   :  { %7622 = vtanh.f32 %v5306_v25  ;;  %v7316_v3 = vpop.f32.mrf.mxu0  ;;  %7373 = vmatprep.subr.mxu1 %v5622_v63 }
0x1395   :  { %v5307_v55 = vadd.f32 %v6255_v52, %v5294_v48  ;;  %v5297_v50 = vadd.f32 %v7316_v3, %v5146_v38  ;;  %v6265_v38 = vld [vmem:[%s9639_s8 + $0x2] ss:$0 sm:$0xff] }
0x1396   :  { %v5281_v42 = vpop.f32.mrf.mxu0 }
0x1397   :  { %7624 = vtanh.f32 %v5307_v55  ;;  %v5296_v58 = vadd.f32 %v5281_v42, %v5141_v30  ;;  %v5310_v23 = vadd.f32 %v6255_v52, %v5297_v50 }
0x1398   :  { %7626 = vtanh.f32 %v5308_v16 }
0x1399   :  { %v5309_v15 = vadd.f32 %v6255_v52, %v5296_v58 }
0x139b   :  { %7628 = vtanh.f32 %v5309_v15 }
0x139c   :  { %v7617_v32 = vpop.eup %7616  ;;  %7630 = vtanh.f32 %v5310_v23 }
0x139d   :  { %v7619_v56 = vpop.eup %7618  ;;  %7333 = vmatprep.mubr.msk.f32.mxu1 %vm541_vm4, %v7617_v32 }
0x139e   :  { %7334 = vmatmul.mubr.msk.f32.vlgmr.msra.gmra.mxu1 %vm541_vm4, %v7619_v56 }
0x139f   :  { %7374 = vmatpush3.msra.mxu1 %v5622_v63  ;;  %v5910_v63 = vpop.permute.xlu1 %5909 }
0x13a0   :  { %v7621_v43 = vpop.eup %7620  ;;  %7375 = vmatprep.subr.mxu1 %v5621_v34 }
0x13a1   :  { %v7623_v46 = vpop.eup %7622  ;;  %7336 = vmatprep.mubr.msk.f32.mxu1 %vm541_vm4, %v7621_v43  ;;  %7376 = vmatpush3.msra.mxu1 %v5621_v34 }
0x13a2   :  { %7337 = vmatmul.mubr.msk.f32.gmra.mxu1 %vm541_vm4, %v7623_v46  ;;  %7377 = vmatprep.subr.mxu1 %v5620_v36 }
0x13a3   :  { %7378 = vmatpush3.msra.mxu1 %v5620_v36  ;;  %v5912_v34 = vpop.permute.xlu1 %5911 }
0x13a4   :  { %v7625_v6 = vpop.eup %7624  ;;  %7379 = vmatprep.subr.mxu1 %v5619_v39 }
0x13a5   :  { %v7627_v40 = vpop.eup %7626  ;;  %7339 = vmatprep.mubr.msk.f32.mxu1 %vm541_vm4, %v7625_v6  ;;  %7380 = vmatpush3.msra.mxu1 %v5619_v39  ;;  %v6283_v39 = vld [vmem:[%s9639_s8 + $0x4] ss:$0 sm:$0xff] }
0x13a6   :  { %7340 = vmatmul.mubr.msk.f32.gmra.mxu1 %vm541_vm4, %v7627_v40 }
0x13a7   :  { %v5914_v36 = vpop.permute.xlu1 %5913 }
0x13a8   :  { %v7629_v37 = vpop.eup %7628 }
0x13a9   :  { %v7631_v27 = vpop.eup %7630  ;;  %7342 = vmatprep.mubr.msk.f32.mxu1 %vm541_vm4, %v7629_v37 }
0x13aa   :  { %7343 = vmatmul.mubr.msk.f32.gmra.mxu1 %vm541_vm4, %v7631_v27 }
0x145e   :  { %v7335_v29 = vpop.f32.mrf.mxu1 }
0x145f   :  { %v5428_v13 = vadd.f32 %v7335_v29, %v6256_v59 }
0x1460   :  { %v5422_v49 = vpop.f32.mrf.mxu1 }
0x1461   :  { %v5423_v18 = vadd.f32 %v6256_v59, %v5422_v49 }
0x1462   :  { %v7338_v53 = vpop.f32.mrf.mxu1 }
0x1463   :  { %7632 = vtanh.f32 %v5423_v18  ;;  %v5438_v8 = vadd.f32 %v7338_v53, %v6256_v59 }
0x1464   :  { %7634 = vtanh.f32 %v5428_v13  ;;  %v5432_v7 = vpop.f32.mrf.mxu1 }
0x1465   :  { %v5433_v52 = vadd.f32 %v6256_v59, %v5432_v7 }
0x1466   :  { %v7341_v33 = vpop.f32.mrf.mxu1 }
0x1467   :  { %7636 = vtanh.f32 %v5433_v52  ;;  %v5448_v60 = vadd.f32 %v7341_v33, %v6256_v59 }
0x1468   :  { %7638 = vtanh.f32 %v5438_v8  ;;  %v5442_v22 = vpop.f32.mrf.mxu1 }
0x1469   :  { %v5443_v54 = vadd.f32 %v6256_v59, %v5442_v22 }
0x146a   :  { %v7344_v4 = vpop.f32.mrf.mxu1 }
0x146b   :  { %7640 = vtanh.f32 %v5443_v54  ;;  %v5458_v21 = vadd.f32 %v7344_v4, %v6256_v59 }
0x146c   :  { %7642 = vtanh.f32 %v5448_v60  ;;  %v5452_v28 = vpop.f32.mrf.mxu1 }
0x146d   :  { %v5453_v45 = vadd.f32 %v6256_v59, %v5452_v28  ;;  %v6274_v59 = vld [vmem:[%s9639_s8 + $0x3] ss:$0 sm:$0xff] }
0x146f   :  { %7644 = vtanh.f32 %v5453_v45 }
0x1470   :  { %v7633_v2 = vpop.eup %7632  ;;  %7646 = vtanh.f32 %v5458_v21 }
0x1471   :  { %v7635_v10 = vpop.eup %7634  ;;  %7361 = vmatprep.mubr.msk.f32.mxu0 %vm541_vm4, %v7633_v2 }
0x1472   :  { %7362 = vmatmul.mubr.msk.f32.vlgmr.msra.gmra.mxu0 %vm541_vm4, %v7635_v10 }
0x1473   :  { %7394 = vmatpush3.msra.mxu0 %v5766_v47 }
0x1474   :  { %v7637_v0 = vpop.eup %7636  ;;  %7395 = vmatprep.subr.mxu0 %v5765_v19 }
0x1475   :  { %v7639_v14 = vpop.eup %7638  ;;  %7364 = vmatprep.mubr.msk.f32.mxu0 %vm541_vm4, %v7637_v0  ;;  %7396 = vmatpush3.msra.mxu0 %v5765_v19 }
0x1476   :  { %7365 = vmatmul.mubr.msk.f32.gmra.mxu0 %vm541_vm4, %v7639_v14 }
0x1478   :  { %v7641_v51 = vpop.eup %7640 }
0x1479   :  { %v7643_v25 = vpop.eup %7642  ;;  %7367 = vmatprep.mubr.msk.f32.mxu0 %vm541_vm4, %v7641_v51 }
0x147a   :  { %7368 = vmatmul.mubr.msk.f32.gmra.mxu0 %vm541_vm4, %v7643_v25 }
0x147c   :  { %v7645_v57 = vpop.eup %7644 }
0x147d   :  { %v7647_v1 = vpop.eup %7646  ;;  %7370 = vmatprep.mubr.msk.f32.mxu0 %vm541_vm4, %v7645_v57 }
0x147e   :  { %7371 = vmatmul.mubr.msk.f32.gmra.mxu0 %vm541_vm4, %v7647_v1 }
0x1532   :  { %v7363_v48 = vpop.f32.mrf.mxu0 }
0x1533   :  { %v5578_v16 = vadd.f32 %v7363_v48, %v6265_v38 }
0x1534   :  { %v5572_v3 = vpop.f32.mrf.mxu0 }
0x1535   :  { %v5573_v30 = vadd.f32 %v6265_v38, %v5572_v3 }
0x1536   :  { %v7366_v55 = vpop.f32.mrf.mxu0 }
0x1537   :  { %7648 = vtanh.f32 %v5573_v30  ;;  %v5588_v50 = vadd.f32 %v7366_v55, %v6265_v38 }
0x1538   :  { %7650 = vtanh.f32 %v5578_v16  ;;  %v5582_v42 = vpop.f32.mrf.mxu0 }
0x1539   :  { %v5583_v58 = vadd.f32 %v6265_v38, %v5582_v42 }
0x153a   :  { %v7369_v23 = vpop.f32.mrf.mxu0 }
0x153b   :  { %7652 = vtanh.f32 %v5583_v58  ;;  %v5598_v15 = vadd.f32 %v7369_v23, %v6265_v38 }
0x153c   :  { %7654 = vtanh.f32 %v5588_v50  ;;  %v5592_v32 = vpop.f32.mrf.mxu0 }
0x153d   :  { %v5593_v56 = vadd.f32 %v6265_v38, %v5592_v32 }
0x153e   :  { %v7372_v43 = vpop.f32.mrf.mxu0 }
0x153f   :  { %7656 = vtanh.f32 %v5593_v56  ;;  %v5608_v46 = vadd.f32 %v7372_v43, %v6265_v38 }
0x1540   :  { %7658 = vtanh.f32 %v5598_v15  ;;  %v5602_v6 = vpop.f32.mrf.mxu0 }
0x1541   :  { %v5603_v40 = vadd.f32 %v6265_v38, %v5602_v6  ;;  %v5916_v38 = vpop.permute.xlu1 %5915 }
0x1543   :  { %7660 = vtanh.f32 %v5603_v40 }
0x1544   :  { %v7649_v37 = vpop.eup %7648  ;;  %7662 = vtanh.f32 %v5608_v46 }
0x1545   :  { %v7651_v27 = vpop.eup %7650  ;;  %7381 = vmatprep.mubr.msk.f32.mxu1 %vm374_vm3, %v7649_v37  ;;  %v5920_v50 = vpop.permute.xlu1 %5919 }
0x1546   :  { %7382 = vmatmul.mubr.msk.f32.vlgmr.msra.gmra.mxu1 %vm374_vm3, %v7651_v27 }
0x1548   :  { %v7653_v61 = vpop.eup %7652 }
0x1549   :  { %v7655_v41 = vpop.eup %7654  ;;  %7384 = vmatprep.mubr.msk.f32.mxu1 %vm374_vm3, %v7653_v61  ;;  %v5922_v37 = vpop.permute.xlu1 %5921 }
0x154a   :  { %7385 = vmatmul.mubr.msk.f32.gmra.mxu1 %vm374_vm3, %v7655_v41 }
0x154c   :  { %v7657_v31 = vpop.eup %7656 }
0x154d   :  { %v7659_v26 = vpop.eup %7658  ;;  %7387 = vmatprep.mubr.msk.f32.mxu1 %vm374_vm3, %v7657_v31 }
0x154e   :  { %7388 = vmatmul.mubr.msk.f32.gmra.mxu1 %vm374_vm3, %v7659_v26 }
0x1550   :  { %v7661_v44 = vpop.eup %7660 }
0x1551   :  { %v7663_v9 = vpop.eup %7662  ;;  %7390 = vmatprep.mubr.msk.f32.mxu1 %vm374_vm3, %v7661_v44 }
0x1552   :  { %7391 = vmatmul.mubr.msk.f32.gmra.mxu1 %vm374_vm3, %v7663_v9  ;;  %v5918_v9 = vpop.permute.xlu0 %5917 }
0x1606   :  { %v7383_v29 = vpop.f32.mrf.mxu1 }
0x1607   :  { %v5724_v13 = vadd.f32 %v7383_v29, %v6274_v59  ;;  %v5924_v29 = vpop.permute.xlu1 %5923 }
0x1608   :  { %v5718_v49 = vpop.f32.mrf.mxu1 }
0x1609   :  { %v5719_v18 = vadd.f32 %v6274_v59, %v5718_v49 }
0x160a   :  { %v7386_v53 = vpop.f32.mrf.mxu1 }
0x160b   :  { %7664 = vtanh.f32 %v5719_v18  ;;  %v5734_v8 = vadd.f32 %v7386_v53, %v6274_v59 }
0x160c   :  { %7666 = vtanh.f32 %v5724_v13  ;;  %v5728_v7 = vpop.f32.mrf.mxu1 }
0x160d   :  { %v5729_v52 = vadd.f32 %v6274_v59, %v5728_v7 }
0x160e   :  { %v7389_v33 = vpop.f32.mrf.mxu1 }
0x160f   :  { %7668 = vtanh.f32 %v5729_v52  ;;  %v5744_v60 = vadd.f32 %v7389_v33, %v6274_v59 }
0x1610   :  { %7670 = vtanh.f32 %v5734_v8  ;;  %v5738_v22 = vpop.f32.mrf.mxu1 }
0x1611   :  { %v5739_v54 = vadd.f32 %v6274_v59, %v5738_v22 }
0x1612   :  { %v7392_v4 = vpop.f32.mrf.mxu1 }
0x1613   :  { %7672 = vtanh.f32 %v5739_v54  ;;  %v5754_v21 = vadd.f32 %v7392_v4, %v6274_v59 }
0x1614   :  { %7674 = vtanh.f32 %v5744_v60  ;;  %v5748_v28 = vpop.f32.mrf.mxu1 }
0x1615   :  { %v5749_v45 = vadd.f32 %v6274_v59, %v5748_v28 }
0x1617   :  { %7676 = vtanh.f32 %v5749_v45 }
0x1618   :  { %v7665_v2 = vpop.eup %7664  ;;  %7678 = vtanh.f32 %v5754_v21 }
0x1619   :  { %v7667_v10 = vpop.eup %7666  ;;  %7397 = vmatprep.mubr.msk.f32.mxu0 %vm211_vm2, %v7665_v2 }
0x161a   :  { %7398 = vmatmul.mubr.msk.f32.vlgmr.msra.gmra.mxu0 %vm211_vm2, %v7667_v10 }
0x161c   :  { %v7669_v0 = vpop.eup %7668 }
0x161d   :  { %v7671_v14 = vpop.eup %7670  ;;  %7400 = vmatprep.mubr.msk.f32.mxu0 %vm211_vm2, %v7669_v0 }
0x161e   :  { %7401 = vmatmul.mubr.msk.f32.gmra.mxu0 %vm211_vm2, %v7671_v14 }
0x1620   :  { %v7673_v51 = vpop.eup %7672 }
0x1621   :  { %v7675_v25 = vpop.eup %7674  ;;  %7403 = vmatprep.mubr.msk.f32.mxu0 %vm211_vm2, %v7673_v51 }
0x1622   :  { %7404 = vmatmul.mubr.msk.f32.gmra.mxu0 %vm211_vm2, %v7675_v25 }
0x1624   :  { %v7677_v57 = vpop.eup %7676 }
0x1625   :  { %v7679_v1 = vpop.eup %7678  ;;  %7406 = vmatprep.mubr.msk.f32.mxu0 %vm211_vm2, %v7677_v57 }
0x1626   :  { %7407 = vmatmul.mubr.msk.f32.gmra.mxu0 %vm211_vm2, %v7679_v1 }
0x16da   :  { %v7399_v48 = vpop.f32.mrf.mxu0 }
0x16db   :  { %v5868_v16 = vadd.f32 %v7399_v48, %v6283_v39 }
0x16dc   :  { %v5862_v3 = vpop.f32.mrf.mxu0 }
0x16dd   :  { %v5902_v30 = vadd.f32 %v5868_v16, %v9434_v24  ;;  %v5863_v55 = vadd.f32 %v6283_v39, %v5862_v3 }
0x16de   :  { %v7402_v42 = vpop.f32.mrf.mxu0 }
0x16df   :  { %v5934_v58 = vsel %vm46_vm1, %v5902_v30, %v5912_v34  ;;  %v5901_v23 = vadd.f32 %v5863_v55, %v9429_v12  ;;  %v5878_v15 = vadd.f32 %v7402_v42, %v6283_v39 }
0x16e0   :  { %5942 = vst.msk [vmem:[%s9640_s9 + $0x8] sm:$0xff] %vm2735_vm5, %v5934_v58  ;;  %v5872_v32 = vpop.f32.mrf.mxu0 }
0x16e1   :  { %v5933_v56 = vsel %vm46_vm1, %v5901_v23, %v5910_v63  ;;  %v5904_v43 = vadd.f32 %v5878_v15, %v9445_v35  ;;  %v5873_v46 = vadd.f32 %v6283_v39, %v5872_v32 }
0x16e2   :  { %5941 = vst.msk [vmem:[%s9640_s9] sm:$0xff] %vm2735_vm5, %v5933_v56  ;;  %v7405_v24 = vpop.f32.mrf.mxu0 }
0x16e3   :  { %v5936_v12 = vsel %vm46_vm1, %v5904_v43, %v5916_v38  ;;  %v5903_v6 = vadd.f32 %v5873_v46, %v9440_v5  ;;  %v5888_v40 = vadd.f32 %v7405_v24, %v6283_v39 }
0x16e4   :  { %5944 = vst.msk [vmem:[%s9640_s9 + $0x18] sm:$0xff] %vm2735_vm5, %v5936_v12  ;;  %v5882_v27 = vpop.f32.mrf.mxu0 }
0x16e5   :  { %v5935_v35 = vsel %vm46_vm1, %v5903_v6, %v5914_v36  ;;  %v5906_v61 = vadd.f32 %v5888_v40, %v9455_v11  ;;  %v5883_v41 = vadd.f32 %v6283_v39, %v5882_v27 }
0x16e6   :  { %5943 = vst.msk [vmem:[%s9640_s9 + $0x10] sm:$0xff] %vm2735_vm5, %v5935_v35  ;;  %v7408_v31 = vpop.f32.mrf.mxu0 }
0x16e7   :  { %v5938_v5 = vsel %vm46_vm1, %v5906_v61, %v5920_v50  ;;  %v5905_v26 = vadd.f32 %v5883_v41, %v9450_v17  ;;  %v5898_v44 = vadd.f32 %v7408_v31, %v6283_v39 }
0x16e8   :  { %5946 = vst.msk [vmem:[%s9640_s9 + $0x28] sm:$0xff] %vm2735_vm5, %v5938_v5  ;;  %v5892_v47 = vpop.f32.mrf.mxu0 }
0x16e9   :  { %v5937_v11 = vsel %vm46_vm1, %v5905_v26, %v5918_v9  ;;  %v5908_v19 = vadd.f32 %v5898_v44, %v9465_v62  ;;  %v5893_v59 = vadd.f32 %v6283_v39, %v5892_v47 }
0x16ea   :  { %5945 = vst.msk [vmem:[%s9640_s9 + $0x20] sm:$0xff] %vm2735_vm5, %v5937_v11 }
0x16eb   :  { %v5940_v17 = vsel %vm46_vm1, %v5908_v19, %v5924_v29  ;;  %v5907_v13 = vadd.f32 %v5893_v59, %v9460_v20 }
0x16ec   :  { %5948 = vst.msk [vmem:[%s9640_s9 + $0x38] sm:$0xff] %vm2735_vm5, %v5940_v17 }
0x16ed   :  { %v5939_v49 = vsel %vm46_vm1, %v5907_v13, %v5922_v37 }
0x16ee   :  { %5947 = vst.msk [vmem:[%s9640_s9 + $0x30] sm:$0xff] %vm2735_vm5, %v5939_v49 }

</bundles_post_ra>
